<compile_context>
chip_gen: v6e
topology: v6e:2x2x1
jax: 0.10.0
libtpu: 0.0.40
codegen_flags: <defaults>
</compile_context>

<pallas_src>
import functools
import numpy as np
import jax
import jax.numpy as jnp
from jax.experimental import pallas as pl
from jax.experimental.pallas import tpu as pltpu


def _make_kernel(C, M):
    """Build the fused FVIM kernel for static channel count C and lane width M."""

    def kernel(x_ref, wre_ref, wim_ref, ire_ref, iim_ref,
               wr1_ref, br1_ref, wr2_ref, br2_ref,
               wi1_ref, bi1_ref, wi2_ref, bi2_ref,
               wsp_ref, bsp_ref, o_ref):
        x = x_ref[...]                       # (C, N, M) f32 (kept for residual)
        xb = x.astype(jnp.bfloat16)          # MXU operand
        wreT = wre_ref[...]                  # (F, N) bf16
        wimT = wim_ref[...]                  # (F, N) bf16
        ireT = ire_ref[...]                  # (N, F) bf16
        iimT = iim_ref[...]                  # (N, F) bf16

        def lrelu(z):
            return jnp.where(z > 0, z, 0.1 * z)

        def mix1x1(z, w_ref, b_ref):
            # 1x1 conv == (C,C) channel mix; C is small so do C*C VPU
            # broadcast-MACs with scalars from SMEM instead of an MXU op.
            out = []
            for o in range(C):
                s = z[0] * w_ref[o, 0]
                for c in range(1, C):
                    s = s + z[c] * w_ref[o, c]
                out.append(s + b_ref[o])
            return out

        def conv1x3(h, w_ref, b_ref):
            # (1,3) conv along frequency (sublane axis), zero padding of 1.
            zero = jnp.zeros((1, M), jnp.float32)
            taps = []
            for c in range(C):
                hm1 = jnp.concatenate([zero, h[c][:-1, :]], axis=0)  # in[f-1]
                hp1 = jnp.concatenate([h[c][1:, :], zero], axis=0)   # in[f+1]
                taps.append((hm1, h[c], hp1))
            out = []
            for o in range(C):
                s = None
                for c in range(C):
                    for k in range(3):
                        t = taps[c][k] * w_ref[o, 3 * c + k]
                        s = t if s is None else s + t
                out.append(s + b_ref[o])
            return out

        def branch(wdftT, w1_ref, b1_ref, w2_ref, b2_ref):
            # forward DFT (real or imag part), per-channel bf16 MXU matmul
            z = [jnp.dot(wdftT, xb[c], preferred_element_type=jnp.float32)
                 for c in range(C)]
            h = [lrelu(v) for v in mix1x1(z, w1_ref, b1_ref)]
            return conv1x3(h, w2_ref, b2_ref)        # list of C slabs (F, M)

        # Real branch first, folded straight into the inverse DFT, then the
        # imaginary branch (keeps fre/pre dead before fim/pim go live).
        pre = branch(wreT, wr1_ref, br1_ref, wr2_ref, br2_ref)
        sp = [jnp.dot(ireT, pre[c].astype(jnp.bfloat16),
                      preferred_element_type=jnp.float32) for c in range(C)]
        pim = branch(wimT, wi1_ref, bi1_ref, wi2_ref, bi2_ref)
        sp = [sp[c] + jnp.dot(iimT, pim[c].astype(jnp.bfloat16),
                              preferred_element_type=jnp.float32)
              for c in range(C)]

        # frequency_spatial 1x1 conv + residual, all f32
        y = mix1x1(sp, wsp_ref, bsp_ref)
        for c in range(C):
            o_ref[c] = (y[c] + x[c]).astype(o_ref.dtype)

    return kernel


@functools.lru_cache(maxsize=None)
def _dft_constants(N):
    """Host-side, cached DFT / iDFT matrices (norm='ortho'), bf16 MXU operands."""
    F = N // 2 + 1
    eye_n = np.eye(N, dtype=np.float64)
    Wf = np.fft.rfft(eye_n, axis=-1, norm='ortho')              # (N, F) complex
    wreT = np.ascontiguousarray(Wf.real.T)                       # (F, N)
    wimT = np.ascontiguousarray(Wf.imag.T)                       # (F, N)
    eye_f = np.eye(F, dtype=np.complex128)
    ib_re = np.fft.irfft(eye_f, n=N, axis=-1, norm='ortho')      # (F, N)
    ib_im = np.fft.irfft(1j * eye_f, n=N, axis=-1, norm='ortho')  # (F, N)
    as_bf16 = lambda a: jnp.asarray(a, jnp.bfloat16)
    return (as_bf16(wreT), as_bf16(wimT),
            as_bf16(ib_re.T), as_bf16(ib_im.T))                  # (N, F) each


def _pick_b_blk(B, L):
    """Largest batch block whose lane width b_blk*L is 128-aligned (<= 2048)."""
    best = None
    for bb in range(1, B + 1):
        if B % bb == 0 and (bb * L) % 128 == 0 and bb * L <= 2048:
            best = bb
    return best if best is not None else B


def fvim_forward(x, params, b_blk=None):
    """x: (B, C, L, N) float32.  params: torch-shaped conv weights/biases."""
    B, C, L, N = x.shape
    F = N // 2 + 1
    if b_blk is None:
        b_blk = _pick_b_blk(B, L)
    assert B % b_blk == 0
    M = b_blk * L                  # lane width per grid step
    G = B // b_blk                 # grid length (batch blocks)

    wreT, wimT, ireT, iimT = _dft_constants(N)

    f32 = lambda a: jnp.asarray(a, jnp.float32)
    wr1 = f32(params['wr1']);                     br1 = f32(params['br1'])
    wr2 = f32(params['wr2']).reshape(C, 3 * C);   br2 = f32(params['br2'])
    wi1 = f32(params['wi1']);                     bi1 = f32(params['bi1'])
    wi2 = f32(params['wi2']).reshape(C, 3 * C);   bi2 = f32(params['bi2'])
    wsp = f32(params['wsp']);                     bsp = f32(params['bsp'])

    # NCHW (B, C, L, N) -> (C, N, B*L): big fused batch*L dim on lanes.
    x2 = jnp.transpose(x, (1, 3, 0, 2)).reshape(C, N, B * L)

    smem = lambda: pl.BlockSpec(memory_space=pltpu.MemorySpace.SMEM)
    vfull = lambda shape: pl.BlockSpec(shape, lambda i: (0,) * len(shape))

    in_specs = [
        pl.BlockSpec((C, N, M), lambda i: (0, 0, i)),    # x, one batch block/step
        vfull((F, N)), vfull((F, N)),                    # WreT, WimT (bf16, tiny)
        vfull((N, F)), vfull((N, F)),                    # IreT, IimT (bf16, tiny)
        smem(), smem(), smem(), smem(),                  # real branch w1,b1,w2,b2
        smem(), smem(), smem(), smem(),                  # imag branch w1,b1,w2,b2
        smem(), smem(),                                  # frequency_spatial w,b
    ]
    out_specs = pl.BlockSpec((C, N, M), lambda i: (0, 0, i))

    # Scoped VMEM: resident constants are a few KiB; size the limit around the
    # double-buffered activation tile with headroom.
    tile_bytes = C * N * M * 4
    vmem_limit = int(min(64 * 1024 * 1024, max(32 * 1024 * 1024, 24 * tile_bytes)))

    out2 = pl.pallas_call(
        _make_kernel(C, M),
        grid=(G,),
        in_specs=in_specs,
        out_specs=out_specs,
        out_shape=jax.ShapeDtypeStruct((C, N, B * L), x.dtype),
        compiler_params=pltpu.CompilerParams(
            dimension_semantics=("parallel",),
            vmem_limit_bytes=vmem_limit),
    )(x2, wreT, wimT, ireT, iimT,
      wr1, br1, wr2, br2,
      wi1, bi1, wi2, bi2,
      wsp, bsp)

    return jnp.transpose(out2.reshape(C, N, B, L), (2, 0, 3, 1))


def fvim_reference(x, params):
    """Pure-JAX replica of the PyTorch forward (correctness check, f32)."""
    B, C, L, N = x.shape
    xf = jnp.fft.rfft(x, axis=-1, norm='ortho')
    re, im = jnp.real(xf), jnp.imag(xf)

    def conv1x1(z, w, b):
        return jnp.einsum('oc,bclf->bolf', w, z) + b.reshape(1, C, 1, 1)

    def lrelu(z):
        return jnp.where(z > 0, z, 0.1 * z)

    def conv13(z, w, b):
        Fd = z.shape[-1]
        zp = jnp.pad(z, ((0, 0), (0, 0), (0, 0), (1, 1)))
        out = sum(jnp.einsum('oc,bclf->bolf', w[:, :, d], zp[..., d:d + Fd])
                  for d in range(3))
        return out + b.reshape(1, C, 1, 1)

    pr = conv13(lrelu(conv1x1(re, params['wr1'], params['br1'])),
                params['wr2'], params['br2'])
    pi = conv13(lrelu(conv1x1(im, params['wi1'], params['bi1'])),
                params['wi2'], params['bi2'])
    sp = jnp.fft.irfft(pr + 1j * pi, n=N, axis=-1, norm='ortho')
    return conv1x1(sp, params['wsp'], params['bsp']) + x


if __name__ == "__main__":
    B, C, L, N = 2, 4, 16, 16
    key = jax.random.PRNGKey(0)
    keys = jax.random.split(key, 12)
    x = jax.random.normal(keys[0], (B, C, L, N), jnp.float32)

    def w(k, shape):
        return 0.1 * jax.random.normal(k, shape, jnp.float32)

    params = dict(
        wr1=w(keys[1], (C, C)),    br1=w(keys[2], (C,)),
        wr2=w(keys[3], (C, C, 3)), br2=w(keys[4], (C,)),
        wi1=w(keys[5], (C, C)),    bi1=w(keys[6], (C,)),
        wi2=w(keys[7], (C, C, 3)), bi2=w(keys[8], (C,)),
        wsp=w(keys[9], (C, C)),    bsp=w(keys[10], (C,)),
    )

    out = fvim_forward(x, params)
    out = jax.block_until_ready(out)

    ref = fvim_reference(x, params)
    err = float(jnp.max(jnp.abs(out - ref)))
    assert out.shape == (B, C, L, N), out.shape
    # bf16 MXU operands (DFT matrices + activations) vs the f32 FFT reference:
    # tolerance widened deliberately; bias/activation/residual math stays f32.
    assert err < 5e-2, f"max abs error {err}"
    print("KERNEL_OK")
</pallas_src>

<mosaic_0001>
module attributes {stable_mosaic.version = 11 : i64} {
  func.func @kernel(%arg0: i32, %arg1: memref<4x16x32xf32, #tpu.memory_space<vmem>>, %arg2: memref<9x16xbf16, #tpu.memory_space<vmem>>, %arg3: memref<9x16xbf16, #tpu.memory_space<vmem>>, %arg4: memref<16x9xbf16, #tpu.memory_space<vmem>>, %arg5: memref<16x9xbf16, #tpu.memory_space<vmem>>, %arg6: memref<4x4xf32, #tpu.memory_space<smem>>, %arg7: memref<4xf32, #tpu.memory_space<smem>>, %arg8: memref<4x12xf32, #tpu.memory_space<smem>>, %arg9: memref<4xf32, #tpu.memory_space<smem>>, %arg10: memref<4x4xf32, #tpu.memory_space<smem>>, %arg11: memref<4xf32, #tpu.memory_space<smem>>, %arg12: memref<4x12xf32, #tpu.memory_space<smem>>, %arg13: memref<4xf32, #tpu.memory_space<smem>>, %arg14: memref<4x4xf32, #tpu.memory_space<smem>>, %arg15: memref<4xf32, #tpu.memory_space<smem>>, %arg16: memref<4x16x32xf32, #tpu.memory_space<vmem>>) attributes {dimension_semantics = [#tpu.dimension_semantics<parallel>], iteration_bounds = array<i64: 1>, scalar_prefetch = 0 : i64, scratch_operands = 0 : i64, tpu.core_type = #tpu.core_type<tc>, window_params = [{transform_indices = @transform_0, window_bounds = array<i64: 4, 16, 32>}, {pipeline_mode = #tpu.pipeline_mode<synchronous>, transform_indices = @transform_1, window_bounds = array<i64: 9, 16>}, {pipeline_mode = #tpu.pipeline_mode<synchronous>, transform_indices = @transform_2, window_bounds = array<i64: 9, 16>}, {pipeline_mode = #tpu.pipeline_mode<synchronous>, transform_indices = @transform_3, window_bounds = array<i64: 16, 9>}, {pipeline_mode = #tpu.pipeline_mode<synchronous>, transform_indices = @transform_4, window_bounds = array<i64: 16, 9>}, {transform_indices = @transform_5, window_bounds = array<i64: 4, 4>}, {transform_indices = @transform_6, window_bounds = array<i64: 4>}, {transform_indices = @transform_7, window_bounds = array<i64: 4, 12>}, {transform_indices = @transform_8, window_bounds = array<i64: 4>}, {transform_indices = @transform_9, window_bounds = array<i64: 4, 4>}, {transform_indices = @transform_10, window_bounds = array<i64: 4>}, {transform_indices = @transform_11, window_bounds = array<i64: 4, 12>}, {transform_indices = @transform_12, window_bounds = array<i64: 4>}, {transform_indices = @transform_13, window_bounds = array<i64: 4, 4>}, {transform_indices = @transform_14, window_bounds = array<i64: 4>}, {transform_indices = @transform_15, window_bounds = array<i64: 4, 16, 32>}]} {
    %c0 = arith.constant 0 : index
    %c0_0 = arith.constant 0 : index
    %c0_1 = arith.constant 0 : index
    %0 = vector.load %arg1[%c0, %c0_0, %c0_1] : memref<4x16x32xf32, #tpu.memory_space<vmem>>, vector<4x16x32xf32>
    %1 = arith.truncf %0 : vector<4x16x32xf32> to vector<4x16x32xbf16>
    %c0_2 = arith.constant 0 : index
    %c0_3 = arith.constant 0 : index
    %2 = vector.load %arg2[%c0_2, %c0_3] : memref<9x16xbf16, #tpu.memory_space<vmem>>, vector<9x16xbf16>
    %c0_4 = arith.constant 0 : index
    %c0_5 = arith.constant 0 : index
    %3 = vector.load %arg3[%c0_4, %c0_5] : memref<9x16xbf16, #tpu.memory_space<vmem>>, vector<9x16xbf16>
    %c0_6 = arith.constant 0 : index
    %c0_7 = arith.constant 0 : index
    %4 = vector.load %arg4[%c0_6, %c0_7] : memref<16x9xbf16, #tpu.memory_space<vmem>>, vector<16x9xbf16>
    %c0_8 = arith.constant 0 : index
    %c0_9 = arith.constant 0 : index
    %5 = vector.load %arg5[%c0_8, %c0_9] : memref<16x9xbf16, #tpu.memory_space<vmem>>, vector<16x9xbf16>
    %6 = vector.extract_strided_slice %1 {offsets = [0, 0, 0], sizes = [1, 16, 32], strides = [1, 1, 1]} : vector<4x16x32xbf16> to vector<1x16x32xbf16>
    %7 = vector.shape_cast %6 : vector<1x16x32xbf16> to vector<16x32xbf16>
    %cst = arith.constant dense<0.000000e+00> : vector<9x32xf32>
    %8 = tpu.matmul %2, %7, %cst {dimension_numbers = #tpu.dot_dimension_numbers<[1], [0], [0], [1], [0, 0, 1, 1], [], []>} : vector<9x16xbf16>, vector<16x32xbf16>, vector<9x32xf32> -> vector<9x32xf32>
    %9 = vector.extract_strided_slice %1 {offsets = [1, 0, 0], sizes = [1, 16, 32], strides = [1, 1, 1]} : vector<4x16x32xbf16> to vector<1x16x32xbf16>
    %10 = vector.shape_cast %9 : vector<1x16x32xbf16> to vector<16x32xbf16>
    %cst_10 = arith.constant dense<0.000000e+00> : vector<9x32xf32>
    %11 = tpu.matmul %2, %10, %cst_10 {dimension_numbers = #tpu.dot_dimension_numbers<[1], [0], [0], [1], [0, 0, 1, 1], [], []>} : vector<9x16xbf16>, vector<16x32xbf16>, vector<9x32xf32> -> vector<9x32xf32>
    %12 = vector.extract_strided_slice %1 {offsets = [2, 0, 0], sizes = [1, 16, 32], strides = [1, 1, 1]} : vector<4x16x32xbf16> to vector<1x16x32xbf16>
    %13 = vector.shape_cast %12 : vector<1x16x32xbf16> to vector<16x32xbf16>
    %cst_11 = arith.constant dense<0.000000e+00> : vector<9x32xf32>
    %14 = tpu.matmul %2, %13, %cst_11 {dimension_numbers = #tpu.dot_dimension_numbers<[1], [0], [0], [1], [0, 0, 1, 1], [], []>} : vector<9x16xbf16>, vector<16x32xbf16>, vector<9x32xf32> -> vector<9x32xf32>
    %15 = vector.extract_strided_slice %1 {offsets = [3, 0, 0], sizes = [1, 16, 32], strides = [1, 1, 1]} : vector<4x16x32xbf16> to vector<1x16x32xbf16>
    %16 = vector.shape_cast %15 : vector<1x16x32xbf16> to vector<16x32xbf16>
    %cst_12 = arith.constant dense<0.000000e+00> : vector<9x32xf32>
    %17 = tpu.matmul %2, %16, %cst_12 {dimension_numbers = #tpu.dot_dimension_numbers<[1], [0], [0], [1], [0, 0, 1, 1], [], []>} : vector<9x16xbf16>, vector<16x32xbf16>, vector<9x32xf32> -> vector<9x32xf32>
    %c0_13 = arith.constant 0 : index
    %c0_14 = arith.constant 0 : index
    %18 = memref.load %arg6[%c0_13, %c0_14] : memref<4x4xf32, #tpu.memory_space<smem>>
    %19 = vector.broadcast %18 : f32 to vector<9x32xf32>
    %20 = arith.mulf %8, %19 : vector<9x32xf32>
    %c0_15 = arith.constant 0 : index
    %c1 = arith.constant 1 : index
    %21 = memref.load %arg6[%c0_15, %c1] : memref<4x4xf32, #tpu.memory_space<smem>>
    %22 = vector.broadcast %21 : f32 to vector<9x32xf32>
    %23 = arith.mulf %11, %22 : vector<9x32xf32>
    %24 = arith.addf %20, %23 : vector<9x32xf32>
    %c0_16 = arith.constant 0 : index
    %c2 = arith.constant 2 : index
    %25 = memref.load %arg6[%c0_16, %c2] : memref<4x4xf32, #tpu.memory_space<smem>>
    %26 = vector.broadcast %25 : f32 to vector<9x32xf32>
    %27 = arith.mulf %14, %26 : vector<9x32xf32>
    %28 = arith.addf %24, %27 : vector<9x32xf32>
    %c0_17 = arith.constant 0 : index
    %c3 = arith.constant 3 : index
    %29 = memref.load %arg6[%c0_17, %c3] : memref<4x4xf32, #tpu.memory_space<smem>>
    %30 = vector.broadcast %29 : f32 to vector<9x32xf32>
    %31 = arith.mulf %17, %30 : vector<9x32xf32>
    %32 = arith.addf %28, %31 : vector<9x32xf32>
    %c0_18 = arith.constant 0 : index
    %33 = memref.load %arg7[%c0_18] : memref<4xf32, #tpu.memory_space<smem>>
    %34 = vector.broadcast %33 : f32 to vector<9x32xf32>
    %35 = arith.addf %32, %34 : vector<9x32xf32>
    %c1_19 = arith.constant 1 : index
    %c0_20 = arith.constant 0 : index
    %36 = memref.load %arg6[%c1_19, %c0_20] : memref<4x4xf32, #tpu.memory_space<smem>>
    %37 = vector.broadcast %36 : f32 to vector<9x32xf32>
    %38 = arith.mulf %8, %37 : vector<9x32xf32>
    %c1_21 = arith.constant 1 : index
    %c1_22 = arith.constant 1 : index
    %39 = memref.load %arg6[%c1_21, %c1_22] : memref<4x4xf32, #tpu.memory_space<smem>>
    %40 = vector.broadcast %39 : f32 to vector<9x32xf32>
    %41 = arith.mulf %11, %40 : vector<9x32xf32>
    %42 = arith.addf %38, %41 : vector<9x32xf32>
    %c1_23 = arith.constant 1 : index
    %c2_24 = arith.constant 2 : index
    %43 = memref.load %arg6[%c1_23, %c2_24] : memref<4x4xf32, #tpu.memory_space<smem>>
    %44 = vector.broadcast %43 : f32 to vector<9x32xf32>
    %45 = arith.mulf %14, %44 : vector<9x32xf32>
    %46 = arith.addf %42, %45 : vector<9x32xf32>
    %c1_25 = arith.constant 1 : index
    %c3_26 = arith.constant 3 : index
    %47 = memref.load %arg6[%c1_25, %c3_26] : memref<4x4xf32, #tpu.memory_space<smem>>
    %48 = vector.broadcast %47 : f32 to vector<9x32xf32>
    %49 = arith.mulf %17, %48 : vector<9x32xf32>
    %50 = arith.addf %46, %49 : vector<9x32xf32>
    %c1_27 = arith.constant 1 : index
    %51 = memref.load %arg7[%c1_27] : memref<4xf32, #tpu.memory_space<smem>>
    %52 = vector.broadcast %51 : f32 to vector<9x32xf32>
    %53 = arith.addf %50, %52 : vector<9x32xf32>
    %c2_28 = arith.constant 2 : index
    %c0_29 = arith.constant 0 : index
    %54 = memref.load %arg6[%c2_28, %c0_29] : memref<4x4xf32, #tpu.memory_space<smem>>
    %55 = vector.broadcast %54 : f32 to vector<9x32xf32>
    %56 = arith.mulf %8, %55 : vector<9x32xf32>
    %c2_30 = arith.constant 2 : index
    %c1_31 = arith.constant 1 : index
    %57 = memref.load %arg6[%c2_30, %c1_31] : memref<4x4xf32, #tpu.memory_space<smem>>
    %58 = vector.broadcast %57 : f32 to vector<9x32xf32>
    %59 = arith.mulf %11, %58 : vector<9x32xf32>
    %60 = arith.addf %56, %59 : vector<9x32xf32>
    %c2_32 = arith.constant 2 : index
    %c2_33 = arith.constant 2 : index
    %61 = memref.load %arg6[%c2_32, %c2_33] : memref<4x4xf32, #tpu.memory_space<smem>>
    %62 = vector.broadcast %61 : f32 to vector<9x32xf32>
    %63 = arith.mulf %14, %62 : vector<9x32xf32>
    %64 = arith.addf %60, %63 : vector<9x32xf32>
    %c2_34 = arith.constant 2 : index
    %c3_35 = arith.constant 3 : index
    %65 = memref.load %arg6[%c2_34, %c3_35] : memref<4x4xf32, #tpu.memory_space<smem>>
    %66 = vector.broadcast %65 : f32 to vector<9x32xf32>
    %67 = arith.mulf %17, %66 : vector<9x32xf32>
    %68 = arith.addf %64, %67 : vector<9x32xf32>
    %c2_36 = arith.constant 2 : index
    %69 = memref.load %arg7[%c2_36] : memref<4xf32, #tpu.memory_space<smem>>
    %70 = vector.broadcast %69 : f32 to vector<9x32xf32>
    %71 = arith.addf %68, %70 : vector<9x32xf32>
    %c3_37 = arith.constant 3 : index
    %c0_38 = arith.constant 0 : index
    %72 = memref.load %arg6[%c3_37, %c0_38] : memref<4x4xf32, #tpu.memory_space<smem>>
    %73 = vector.broadcast %72 : f32 to vector<9x32xf32>
    %74 = arith.mulf %8, %73 : vector<9x32xf32>
    %c3_39 = arith.constant 3 : index
    %c1_40 = arith.constant 1 : index
    %75 = memref.load %arg6[%c3_39, %c1_40] : memref<4x4xf32, #tpu.memory_space<smem>>
    %76 = vector.broadcast %75 : f32 to vector<9x32xf32>
    %77 = arith.mulf %11, %76 : vector<9x32xf32>
    %78 = arith.addf %74, %77 : vector<9x32xf32>
    %c3_41 = arith.constant 3 : index
    %c2_42 = arith.constant 2 : index
    %79 = memref.load %arg6[%c3_41, %c2_42] : memref<4x4xf32, #tpu.memory_space<smem>>
    %80 = vector.broadcast %79 : f32 to vector<9x32xf32>
    %81 = arith.mulf %14, %80 : vector<9x32xf32>
    %82 = arith.addf %78, %81 : vector<9x32xf32>
    %c3_43 = arith.constant 3 : index
    %c3_44 = arith.constant 3 : index
    %83 = memref.load %arg6[%c3_43, %c3_44] : memref<4x4xf32, #tpu.memory_space<smem>>
    %84 = vector.broadcast %83 : f32 to vector<9x32xf32>
    %85 = arith.mulf %17, %84 : vector<9x32xf32>
    %86 = arith.addf %82, %85 : vector<9x32xf32>
    %c3_45 = arith.constant 3 : index
    %87 = memref.load %arg7[%c3_45] : memref<4xf32, #tpu.memory_space<smem>>
    %88 = vector.broadcast %87 : f32 to vector<9x32xf32>
    %89 = arith.addf %86, %88 : vector<9x32xf32>
    %cst_46 = arith.constant 0.000000e+00 : f32
    %90 = vector.broadcast %cst_46 : f32 to vector<9x32xf32>
    %91 = arith.cmpf ogt, %35, %90 : vector<9x32xf32>
    %cst_47 = arith.constant 1.000000e-01 : f32
    %92 = vector.broadcast %cst_47 : f32 to vector<9x32xf32>
    %93 = arith.mulf %92, %35 : vector<9x32xf32>
    %94 = arith.select %91, %35, %93 : vector<9x32xi1>, vector<9x32xf32>
    %cst_48 = arith.constant 0.000000e+00 : f32
    %95 = vector.broadcast %cst_48 : f32 to vector<9x32xf32>
    %96 = arith.cmpf ogt, %53, %95 : vector<9x32xf32>
    %cst_49 = arith.constant 1.000000e-01 : f32
    %97 = vector.broadcast %cst_49 : f32 to vector<9x32xf32>
    %98 = arith.mulf %97, %53 : vector<9x32xf32>
    %99 = arith.select %96, %53, %98 : vector<9x32xi1>, vector<9x32xf32>
    %cst_50 = arith.constant 0.000000e+00 : f32
    %100 = vector.broadcast %cst_50 : f32 to vector<9x32xf32>
    %101 = arith.cmpf ogt, %71, %100 : vector<9x32xf32>
    %cst_51 = arith.constant 1.000000e-01 : f32
    %102 = vector.broadcast %cst_51 : f32 to vector<9x32xf32>
    %103 = arith.mulf %102, %71 : vector<9x32xf32>
    %104 = arith.select %101, %71, %103 : vector<9x32xi1>, vector<9x32xf32>
    %cst_52 = arith.constant 0.000000e+00 : f32
    %105 = vector.broadcast %cst_52 : f32 to vector<9x32xf32>
    %106 = arith.cmpf ogt, %89, %105 : vector<9x32xf32>
    %cst_53 = arith.constant 1.000000e-01 : f32
    %107 = vector.broadcast %cst_53 : f32 to vector<9x32xf32>
    %108 = arith.mulf %107, %89 : vector<9x32xf32>
    %109 = arith.select %106, %89, %108 : vector<9x32xi1>, vector<9x32xf32>
    %cst_54 = arith.constant 0.000000e+00 : f32
    %110 = vector.broadcast %cst_54 : f32 to vector<1x32xf32>
    %111 = vector.extract_strided_slice %94 {offsets = [0, 0], sizes = [8, 32], strides = [1, 1]} : vector<9x32xf32> to vector<8x32xf32>
    %112 = tpu.concatenate %110, %111 in 0 : vector<1x32xf32>, vector<8x32xf32> -> vector<9x32xf32>
    %113 = vector.extract_strided_slice %94 {offsets = [1, 0], sizes = [8, 32], strides = [1, 1]} : vector<9x32xf32> to vector<8x32xf32>
    %114 = tpu.concatenate %113, %110 in 0 : vector<8x32xf32>, vector<1x32xf32> -> vector<9x32xf32>
    %115 = vector.extract_strided_slice %99 {offsets = [0, 0], sizes = [8, 32], strides = [1, 1]} : vector<9x32xf32> to vector<8x32xf32>
    %116 = tpu.concatenate %110, %115 in 0 : vector<1x32xf32>, vector<8x32xf32> -> vector<9x32xf32>
    %117 = vector.extract_strided_slice %99 {offsets = [1, 0], sizes = [8, 32], strides = [1, 1]} : vector<9x32xf32> to vector<8x32xf32>
    %118 = tpu.concatenate %117, %110 in 0 : vector<8x32xf32>, vector<1x32xf32> -> vector<9x32xf32>
    %119 = vector.extract_strided_slice %104 {offsets = [0, 0], sizes = [8, 32], strides = [1, 1]} : vector<9x32xf32> to vector<8x32xf32>
    %120 = tpu.concatenate %110, %119 in 0 : vector<1x32xf32>, vector<8x32xf32> -> vector<9x32xf32>
    %121 = vector.extract_strided_slice %104 {offsets = [1, 0], sizes = [8, 32], strides = [1, 1]} : vector<9x32xf32> to vector<8x32xf32>
    %122 = tpu.concatenate %121, %110 in 0 : vector<8x32xf32>, vector<1x32xf32> -> vector<9x32xf32>
    %123 = vector.extract_strided_slice %109 {offsets = [0, 0], sizes = [8, 32], strides = [1, 1]} : vector<9x32xf32> to vector<8x32xf32>
    %124 = tpu.concatenate %110, %123 in 0 : vector<1x32xf32>, vector<8x32xf32> -> vector<9x32xf32>
    %125 = vector.extract_strided_slice %109 {offsets = [1, 0], sizes = [8, 32], strides = [1, 1]} : vector<9x32xf32> to vector<8x32xf32>
    %126 = tpu.concatenate %125, %110 in 0 : vector<8x32xf32>, vector<1x32xf32> -> vector<9x32xf32>
    %c0_55 = arith.constant 0 : index
    %c0_56 = arith.constant 0 : index
    %127 = memref.load %arg8[%c0_55, %c0_56] : memref<4x12xf32, #tpu.memory_space<smem>>
    %128 = vector.broadcast %127 : f32 to vector<9x32xf32>
    %129 = arith.mulf %112, %128 : vector<9x32xf32>
    %c0_57 = arith.constant 0 : index
    %c1_58 = arith.constant 1 : index
    %130 = memref.load %arg8[%c0_57, %c1_58] : memref<4x12xf32, #tpu.memory_space<smem>>
    %131 = vector.broadcast %130 : f32 to vector<9x32xf32>
    %132 = arith.mulf %94, %131 : vector<9x32xf32>
    %133 = arith.addf %129, %132 : vector<9x32xf32>
    %c0_59 = arith.constant 0 : index
    %c2_60 = arith.constant 2 : index
    %134 = memref.load %arg8[%c0_59, %c2_60] : memref<4x12xf32, #tpu.memory_space<smem>>
    %135 = vector.broadcast %134 : f32 to vector<9x32xf32>
    %136 = arith.mulf %114, %135 : vector<9x32xf32>
    %137 = arith.addf %133, %136 : vector<9x32xf32>
    %c0_61 = arith.constant 0 : index
    %c3_62 = arith.constant 3 : index
    %138 = memref.load %arg8[%c0_61, %c3_62] : memref<4x12xf32, #tpu.memory_space<smem>>
    %139 = vector.broadcast %138 : f32 to vector<9x32xf32>
    %140 = arith.mulf %116, %139 : vector<9x32xf32>
    %141 = arith.addf %137, %140 : vector<9x32xf32>
    %c0_63 = arith.constant 0 : index
    %c4 = arith.constant 4 : index
    %142 = memref.load %arg8[%c0_63, %c4] : memref<4x12xf32, #tpu.memory_space<smem>>
    %143 = vector.broadcast %142 : f32 to vector<9x32xf32>
    %144 = arith.mulf %99, %143 : vector<9x32xf32>
    %145 = arith.addf %141, %144 : vector<9x32xf32>
    %c0_64 = arith.constant 0 : index
    %c5 = arith.constant 5 : index
    %146 = memref.load %arg8[%c0_64, %c5] : memref<4x12xf32, #tpu.memory_space<smem>>
    %147 = vector.broadcast %146 : f32 to vector<9x32xf32>
    %148 = arith.mulf %118, %147 : vector<9x32xf32>
    %149 = arith.addf %145, %148 : vector<9x32xf32>
    %c0_65 = arith.constant 0 : index
    %c6 = arith.constant 6 : index
    %150 = memref.load %arg8[%c0_65, %c6] : memref<4x12xf32, #tpu.memory_space<smem>>
    %151 = vector.broadcast %150 : f32 to vector<9x32xf32>
    %152 = arith.mulf %120, %151 : vector<9x32xf32>
    %153 = arith.addf %149, %152 : vector<9x32xf32>
    %c0_66 = arith.constant 0 : index
    %c7 = arith.constant 7 : index
    %154 = memref.load %arg8[%c0_66, %c7] : memref<4x12xf32, #tpu.memory_space<smem>>
    %155 = vector.broadcast %154 : f32 to vector<9x32xf32>
    %156 = arith.mulf %104, %155 : vector<9x32xf32>
    %157 = arith.addf %153, %156 : vector<9x32xf32>
    %c0_67 = arith.constant 0 : index
    %c8 = arith.constant 8 : index
    %158 = memref.load %arg8[%c0_67, %c8] : memref<4x12xf32, #tpu.memory_space<smem>>
    %159 = vector.broadcast %158 : f32 to vector<9x32xf32>
    %160 = arith.mulf %122, %159 : vector<9x32xf32>
    %161 = arith.addf %157, %160 : vector<9x32xf32>
    %c0_68 = arith.constant 0 : index
    %c9 = arith.constant 9 : index
    %162 = memref.load %arg8[%c0_68, %c9] : memref<4x12xf32, #tpu.memory_space<smem>>
    %163 = vector.broadcast %162 : f32 to vector<9x32xf32>
    %164 = arith.mulf %124, %163 : vector<9x32xf32>
    %165 = arith.addf %161, %164 : vector<9x32xf32>
    %c0_69 = arith.constant 0 : index
    %c10 = arith.constant 10 : index
    %166 = memref.load %arg8[%c0_69, %c10] : memref<4x12xf32, #tpu.memory_space<smem>>
    %167 = vector.broadcast %166 : f32 to vector<9x32xf32>
    %168 = arith.mulf %109, %167 : vector<9x32xf32>
    %169 = arith.addf %165, %168 : vector<9x32xf32>
    %c0_70 = arith.constant 0 : index
    %c11 = arith.constant 11 : index
    %170 = memref.load %arg8[%c0_70, %c11] : memref<4x12xf32, #tpu.memory_space<smem>>
    %171 = vector.broadcast %170 : f32 to vector<9x32xf32>
    %172 = arith.mulf %126, %171 : vector<9x32xf32>
    %173 = arith.addf %169, %172 : vector<9x32xf32>
    %c0_71 = arith.constant 0 : index
    %174 = memref.load %arg9[%c0_71] : memref<4xf32, #tpu.memory_space<smem>>
    %175 = vector.broadcast %174 : f32 to vector<9x32xf32>
    %176 = arith.addf %173, %175 : vector<9x32xf32>
    %c1_72 = arith.constant 1 : index
    %c0_73 = arith.constant 0 : index
    %177 = memref.load %arg8[%c1_72, %c0_73] : memref<4x12xf32, #tpu.memory_space<smem>>
    %178 = vector.broadcast %177 : f32 to vector<9x32xf32>
    %179 = arith.mulf %112, %178 : vector<9x32xf32>
    %c1_74 = arith.constant 1 : index
    %c1_75 = arith.constant 1 : index
    %180 = memref.load %arg8[%c1_74, %c1_75] : memref<4x12xf32, #tpu.memory_space<smem>>
    %181 = vector.broadcast %180 : f32 to vector<9x32xf32>
    %182 = arith.mulf %94, %181 : vector<9x32xf32>
    %183 = arith.addf %179, %182 : vector<9x32xf32>
    %c1_76 = arith.constant 1 : index
    %c2_77 = arith.constant 2 : index
    %184 = memref.load %arg8[%c1_76, %c2_77] : memref<4x12xf32, #tpu.memory_space<smem>>
    %185 = vector.broadcast %184 : f32 to vector<9x32xf32>
    %186 = arith.mulf %114, %185 : vector<9x32xf32>
    %187 = arith.addf %183, %186 : vector<9x32xf32>
    %c1_78 = arith.constant 1 : index
    %c3_79 = arith.constant 3 : index
    %188 = memref.load %arg8[%c1_78, %c3_79] : memref<4x12xf32, #tpu.memory_space<smem>>
    %189 = vector.broadcast %188 : f32 to vector<9x32xf32>
    %190 = arith.mulf %116, %189 : vector<9x32xf32>
    %191 = arith.addf %187, %190 : vector<9x32xf32>
    %c1_80 = arith.constant 1 : index
    %c4_81 = arith.constant 4 : index
    %192 = memref.load %arg8[%c1_80, %c4_81] : memref<4x12xf32, #tpu.memory_space<smem>>
    %193 = vector.broadcast %192 : f32 to vector<9x32xf32>
    %194 = arith.mulf %99, %193 : vector<9x32xf32>
    %195 = arith.addf %191, %194 : vector<9x32xf32>
    %c1_82 = arith.constant 1 : index
    %c5_83 = arith.constant 5 : index
    %196 = memref.load %arg8[%c1_82, %c5_83] : memref<4x12xf32, #tpu.memory_space<smem>>
    %197 = vector.broadcast %196 : f32 to vector<9x32xf32>
    %198 = arith.mulf %118, %197 : vector<9x32xf32>
    %199 = arith.addf %195, %198 : vector<9x32xf32>
    %c1_84 = arith.constant 1 : index
    %c6_85 = arith.constant 6 : index
    %200 = memref.load %arg8[%c1_84, %c6_85] : memref<4x12xf32, #tpu.memory_space<smem>>
    %201 = vector.broadcast %200 : f32 to vector<9x32xf32>
    %202 = arith.mulf %120, %201 : vector<9x32xf32>
    %203 = arith.addf %199, %202 : vector<9x32xf32>
    %c1_86 = arith.constant 1 : index
    %c7_87 = arith.constant 7 : index
    %204 = memref.load %arg8[%c1_86, %c7_87] : memref<4x12xf32, #tpu.memory_space<smem>>
    %205 = vector.broadcast %204 : f32 to vector<9x32xf32>
    %206 = arith.mulf %104, %205 : vector<9x32xf32>
    %207 = arith.addf %203, %206 : vector<9x32xf32>
    %c1_88 = arith.constant 1 : index
    %c8_89 = arith.constant 8 : index
    %208 = memref.load %arg8[%c1_88, %c8_89] : memref<4x12xf32, #tpu.memory_space<smem>>
    %209 = vector.broadcast %208 : f32 to vector<9x32xf32>
    %210 = arith.mulf %122, %209 : vector<9x32xf32>
    %211 = arith.addf %207, %210 : vector<9x32xf32>
    %c1_90 = arith.constant 1 : index
    %c9_91 = arith.constant 9 : index
    %212 = memref.load %arg8[%c1_90, %c9_91] : memref<4x12xf32, #tpu.memory_space<smem>>
    %213 = vector.broadcast %212 : f32 to vector<9x32xf32>
    %214 = arith.mulf %124, %213 : vector<9x32xf32>
    %215 = arith.addf %211, %214 : vector<9x32xf32>
    %c1_92 = arith.constant 1 : index
    %c10_93 = arith.constant 10 : index
    %216 = memref.load %arg8[%c1_92, %c10_93] : memref<4x12xf32, #tpu.memory_space<smem>>
    %217 = vector.broadcast %216 : f32 to vector<9x32xf32>
    %218 = arith.mulf %109, %217 : vector<9x32xf32>
    %219 = arith.addf %215, %218 : vector<9x32xf32>
    %c1_94 = arith.constant 1 : index
    %c11_95 = arith.constant 11 : index
    %220 = memref.load %arg8[%c1_94, %c11_95] : memref<4x12xf32, #tpu.memory_space<smem>>
    %221 = vector.broadcast %220 : f32 to vector<9x32xf32>
    %222 = arith.mulf %126, %221 : vector<9x32xf32>
    %223 = arith.addf %219, %222 : vector<9x32xf32>
    %c1_96 = arith.constant 1 : index
    %224 = memref.load %arg9[%c1_96] : memref<4xf32, #tpu.memory_space<smem>>
    %225 = vector.broadcast %224 : f32 to vector<9x32xf32>
    %226 = arith.addf %223, %225 : vector<9x32xf32>
    %c2_97 = arith.constant 2 : index
    %c0_98 = arith.constant 0 : index
    %227 = memref.load %arg8[%c2_97, %c0_98] : memref<4x12xf32, #tpu.memory_space<smem>>
    %228 = vector.broadcast %227 : f32 to vector<9x32xf32>
    %229 = arith.mulf %112, %228 : vector<9x32xf32>
    %c2_99 = arith.constant 2 : index
    %c1_100 = arith.constant 1 : index
    %230 = memref.load %arg8[%c2_99, %c1_100] : memref<4x12xf32, #tpu.memory_space<smem>>
    %231 = vector.broadcast %230 : f32 to vector<9x32xf32>
    %232 = arith.mulf %94, %231 : vector<9x32xf32>
    %233 = arith.addf %229, %232 : vector<9x32xf32>
    %c2_101 = arith.constant 2 : index
    %c2_102 = arith.constant 2 : index
    %234 = memref.load %arg8[%c2_101, %c2_102] : memref<4x12xf32, #tpu.memory_space<smem>>
    %235 = vector.broadcast %234 : f32 to vector<9x32xf32>
    %236 = arith.mulf %114, %235 : vector<9x32xf32>
    %237 = arith.addf %233, %236 : vector<9x32xf32>
    %c2_103 = arith.constant 2 : index
    %c3_104 = arith.constant 3 : index
    %238 = memref.load %arg8[%c2_103, %c3_104] : memref<4x12xf32, #tpu.memory_space<smem>>
    %239 = vector.broadcast %238 : f32 to vector<9x32xf32>
    %240 = arith.mulf %116, %239 : vector<9x32xf32>
    %241 = arith.addf %237, %240 : vector<9x32xf32>
    %c2_105 = arith.constant 2 : index
    %c4_106 = arith.constant 4 : index
    %242 = memref.load %arg8[%c2_105, %c4_106] : memref<4x12xf32, #tpu.memory_space<smem>>
    %243 = vector.broadcast %242 : f32 to vector<9x32xf32>
    %244 = arith.mulf %99, %243 : vector<9x32xf32>
    %245 = arith.addf %241, %244 : vector<9x32xf32>
    %c2_107 = arith.constant 2 : index
    %c5_108 = arith.constant 5 : index
    %246 = memref.load %arg8[%c2_107, %c5_108] : memref<4x12xf32, #tpu.memory_space<smem>>
    %247 = vector.broadcast %246 : f32 to vector<9x32xf32>
    %248 = arith.mulf %118, %247 : vector<9x32xf32>
    %249 = arith.addf %245, %248 : vector<9x32xf32>
    %c2_109 = arith.constant 2 : index
    %c6_110 = arith.constant 6 : index
    %250 = memref.load %arg8[%c2_109, %c6_110] : memref<4x12xf32, #tpu.memory_space<smem>>
    %251 = vector.broadcast %250 : f32 to vector<9x32xf32>
    %252 = arith.mulf %120, %251 : vector<9x32xf32>
    %253 = arith.addf %249, %252 : vector<9x32xf32>
    %c2_111 = arith.constant 2 : index
    %c7_112 = arith.constant 7 : index
    %254 = memref.load %arg8[%c2_111, %c7_112] : memref<4x12xf32, #tpu.memory_space<smem>>
    %255 = vector.broadcast %254 : f32 to vector<9x32xf32>
    %256 = arith.mulf %104, %255 : vector<9x32xf32>
    %257 = arith.addf %253, %256 : vector<9x32xf32>
    %c2_113 = arith.constant 2 : index
    %c8_114 = arith.constant 8 : index
    %258 = memref.load %arg8[%c2_113, %c8_114] : memref<4x12xf32, #tpu.memory_space<smem>>
    %259 = vector.broadcast %258 : f32 to vector<9x32xf32>
    %260 = arith.mulf %122, %259 : vector<9x32xf32>
    %261 = arith.addf %257, %260 : vector<9x32xf32>
    %c2_115 = arith.constant 2 : index
    %c9_116 = arith.constant 9 : index
    %262 = memref.load %arg8[%c2_115, %c9_116] : memref<4x12xf32, #tpu.memory_space<smem>>
    %263 = vector.broadcast %262 : f32 to vector<9x32xf32>
    %264 = arith.mulf %124, %263 : vector<9x32xf32>
    %265 = arith.addf %261, %264 : vector<9x32xf32>
    %c2_117 = arith.constant 2 : index
    %c10_118 = arith.constant 10 : index
    %266 = memref.load %arg8[%c2_117, %c10_118] : memref<4x12xf32, #tpu.memory_space<smem>>
    %267 = vector.broadcast %266 : f32 to vector<9x32xf32>
    %268 = arith.mulf %109, %267 : vector<9x32xf32>
    %269 = arith.addf %265, %268 : vector<9x32xf32>
    %c2_119 = arith.constant 2 : index
    %c11_120 = arith.constant 11 : index
    %270 = memref.load %arg8[%c2_119, %c11_120] : memref<4x12xf32, #tpu.memory_space<smem>>
    %271 = vector.broadcast %270 : f32 to vector<9x32xf32>
    %272 = arith.mulf %126, %271 : vector<9x32xf32>
    %273 = arith.addf %269, %272 : vector<9x32xf32>
    %c2_121 = arith.constant 2 : index
    %274 = memref.load %arg9[%c2_121] : memref<4xf32, #tpu.memory_space<smem>>
    %275 = vector.broadcast %274 : f32 to vector<9x32xf32>
    %276 = arith.addf %273, %275 : vector<9x32xf32>
    %c3_122 = arith.constant 3 : index
    %c0_123 = arith.constant 0 : index
    %277 = memref.load %arg8[%c3_122, %c0_123] : memref<4x12xf32, #tpu.memory_space<smem>>
    %278 = vector.broadcast %277 : f32 to vector<9x32xf32>
    %279 = arith.mulf %112, %278 : vector<9x32xf32>
    %c3_124 = arith.constant 3 : index
    %c1_125 = arith.constant 1 : index
    %280 = memref.load %arg8[%c3_124, %c1_125] : memref<4x12xf32, #tpu.memory_space<smem>>
    %281 = vector.broadcast %280 : f32 to vector<9x32xf32>
    %282 = arith.mulf %94, %281 : vector<9x32xf32>
    %283 = arith.addf %279, %282 : vector<9x32xf32>
    %c3_126 = arith.constant 3 : index
    %c2_127 = arith.constant 2 : index
    %284 = memref.load %arg8[%c3_126, %c2_127] : memref<4x12xf32, #tpu.memory_space<smem>>
    %285 = vector.broadcast %284 : f32 to vector<9x32xf32>
    %286 = arith.mulf %114, %285 : vector<9x32xf32>
    %287 = arith.addf %283, %286 : vector<9x32xf32>
    %c3_128 = arith.constant 3 : index
    %c3_129 = arith.constant 3 : index
    %288 = memref.load %arg8[%c3_128, %c3_129] : memref<4x12xf32, #tpu.memory_space<smem>>
    %289 = vector.broadcast %288 : f32 to vector<9x32xf32>
    %290 = arith.mulf %116, %289 : vector<9x32xf32>
    %291 = arith.addf %287, %290 : vector<9x32xf32>
    %c3_130 = arith.constant 3 : index
    %c4_131 = arith.constant 4 : index
    %292 = memref.load %arg8[%c3_130, %c4_131] : memref<4x12xf32, #tpu.memory_space<smem>>
    %293 = vector.broadcast %292 : f32 to vector<9x32xf32>
    %294 = arith.mulf %99, %293 : vector<9x32xf32>
    %295 = arith.addf %291, %294 : vector<9x32xf32>
    %c3_132 = arith.constant 3 : index
    %c5_133 = arith.constant 5 : index
    %296 = memref.load %arg8[%c3_132, %c5_133] : memref<4x12xf32, #tpu.memory_space<smem>>
    %297 = vector.broadcast %296 : f32 to vector<9x32xf32>
    %298 = arith.mulf %118, %297 : vector<9x32xf32>
    %299 = arith.addf %295, %298 : vector<9x32xf32>
    %c3_134 = arith.constant 3 : index
    %c6_135 = arith.constant 6 : index
    %300 = memref.load %arg8[%c3_134, %c6_135] : memref<4x12xf32, #tpu.memory_space<smem>>
    %301 = vector.broadcast %300 : f32 to vector<9x32xf32>
    %302 = arith.mulf %120, %301 : vector<9x32xf32>
    %303 = arith.addf %299, %302 : vector<9x32xf32>
    %c3_136 = arith.constant 3 : index
    %c7_137 = arith.constant 7 : index
    %304 = memref.load %arg8[%c3_136, %c7_137] : memref<4x12xf32, #tpu.memory_space<smem>>
    %305 = vector.broadcast %304 : f32 to vector<9x32xf32>
    %306 = arith.mulf %104, %305 : vector<9x32xf32>
    %307 = arith.addf %303, %306 : vector<9x32xf32>
    %c3_138 = arith.constant 3 : index
    %c8_139 = arith.constant 8 : index
    %308 = memref.load %arg8[%c3_138, %c8_139] : memref<4x12xf32, #tpu.memory_space<smem>>
    %309 = vector.broadcast %308 : f32 to vector<9x32xf32>
    %310 = arith.mulf %122, %309 : vector<9x32xf32>
    %311 = arith.addf %307, %310 : vector<9x32xf32>
    %c3_140 = arith.constant 3 : index
    %c9_141 = arith.constant 9 : index
    %312 = memref.load %arg8[%c3_140, %c9_141] : memref<4x12xf32, #tpu.memory_space<smem>>
    %313 = vector.broadcast %312 : f32 to vector<9x32xf32>
    %314 = arith.mulf %124, %313 : vector<9x32xf32>
    %315 = arith.addf %311, %314 : vector<9x32xf32>
    %c3_142 = arith.constant 3 : index
    %c10_143 = arith.constant 10 : index
    %316 = memref.load %arg8[%c3_142, %c10_143] : memref<4x12xf32, #tpu.memory_space<smem>>
    %317 = vector.broadcast %316 : f32 to vector<9x32xf32>
    %318 = arith.mulf %109, %317 : vector<9x32xf32>
    %319 = arith.addf %315, %318 : vector<9x32xf32>
    %c3_144 = arith.constant 3 : index
    %c11_145 = arith.constant 11 : index
    %320 = memref.load %arg8[%c3_144, %c11_145] : memref<4x12xf32, #tpu.memory_space<smem>>
    %321 = vector.broadcast %320 : f32 to vector<9x32xf32>
    %322 = arith.mulf %126, %321 : vector<9x32xf32>
    %323 = arith.addf %319, %322 : vector<9x32xf32>
    %c3_146 = arith.constant 3 : index
    %324 = memref.load %arg9[%c3_146] : memref<4xf32, #tpu.memory_space<smem>>
    %325 = vector.broadcast %324 : f32 to vector<9x32xf32>
    %326 = arith.addf %323, %325 : vector<9x32xf32>
    %327 = arith.truncf %176 : vector<9x32xf32> to vector<9x32xbf16>
    %cst_147 = arith.constant dense<0.000000e+00> : vector<16x32xf32>
    %328 = tpu.matmul %4, %327, %cst_147 {dimension_numbers = #tpu.dot_dimension_numbers<[1], [0], [0], [1], [0, 0, 1, 1], [], []>} : vector<16x9xbf16>, vector<9x32xbf16>, vector<16x32xf32> -> vector<16x32xf32>
    %329 = arith.truncf %226 : vector<9x32xf32> to vector<9x32xbf16>
    %cst_148 = arith.constant dense<0.000000e+00> : vector<16x32xf32>
    %330 = tpu.matmul %4, %329, %cst_148 {dimension_numbers = #tpu.dot_dimension_numbers<[1], [0], [0], [1], [0, 0, 1, 1], [], []>} : vector<16x9xbf16>, vector<9x32xbf16>, vector<16x32xf32> -> vector<16x32xf32>
    %331 = arith.truncf %276 : vector<9x32xf32> to vector<9x32xbf16>
    %cst_149 = arith.constant dense<0.000000e+00> : vector<16x32xf32>
    %332 = tpu.matmul %4, %331, %cst_149 {dimension_numbers = #tpu.dot_dimension_numbers<[1], [0], [0], [1], [0, 0, 1, 1], [], []>} : vector<16x9xbf16>, vector<9x32xbf16>, vector<16x32xf32> -> vector<16x32xf32>
    %333 = arith.truncf %326 : vector<9x32xf32> to vector<9x32xbf16>
    %cst_150 = arith.constant dense<0.000000e+00> : vector<16x32xf32>
    %334 = tpu.matmul %4, %333, %cst_150 {dimension_numbers = #tpu.dot_dimension_numbers<[1], [0], [0], [1], [0, 0, 1, 1], [], []>} : vector<16x9xbf16>, vector<9x32xbf16>, vector<16x32xf32> -> vector<16x32xf32>
    %335 = vector.extract_strided_slice %1 {offsets = [0, 0, 0], sizes = [1, 16, 32], strides = [1, 1, 1]} : vector<4x16x32xbf16> to vector<1x16x32xbf16>
    %336 = vector.shape_cast %335 : vector<1x16x32xbf16> to vector<16x32xbf16>
    %cst_151 = arith.constant dense<0.000000e+00> : vector<9x32xf32>
    %337 = tpu.matmul %3, %336, %cst_151 {dimension_numbers = #tpu.dot_dimension_numbers<[1], [0], [0], [1], [0, 0, 1, 1], [], []>} : vector<9x16xbf16>, vector<16x32xbf16>, vector<9x32xf32> -> vector<9x32xf32>
    %338 = vector.extract_strided_slice %1 {offsets = [1, 0, 0], sizes = [1, 16, 32], strides = [1, 1, 1]} : vector<4x16x32xbf16> to vector<1x16x32xbf16>
    %339 = vector.shape_cast %338 : vector<1x16x32xbf16> to vector<16x32xbf16>
    %cst_152 = arith.constant dense<0.000000e+00> : vector<9x32xf32>
    %340 = tpu.matmul %3, %339, %cst_152 {dimension_numbers = #tpu.dot_dimension_numbers<[1], [0], [0], [1], [0, 0, 1, 1], [], []>} : vector<9x16xbf16>, vector<16x32xbf16>, vector<9x32xf32> -> vector<9x32xf32>
    %341 = vector.extract_strided_slice %1 {offsets = [2, 0, 0], sizes = [1, 16, 32], strides = [1, 1, 1]} : vector<4x16x32xbf16> to vector<1x16x32xbf16>
    %342 = vector.shape_cast %341 : vector<1x16x32xbf16> to vector<16x32xbf16>
    %cst_153 = arith.constant dense<0.000000e+00> : vector<9x32xf32>
    %343 = tpu.matmul %3, %342, %cst_153 {dimension_numbers = #tpu.dot_dimension_numbers<[1], [0], [0], [1], [0, 0, 1, 1], [], []>} : vector<9x16xbf16>, vector<16x32xbf16>, vector<9x32xf32> -> vector<9x32xf32>
    %344 = vector.extract_strided_slice %1 {offsets = [3, 0, 0], sizes = [1, 16, 32], strides = [1, 1, 1]} : vector<4x16x32xbf16> to vector<1x16x32xbf16>
    %345 = vector.shape_cast %344 : vector<1x16x32xbf16> to vector<16x32xbf16>
    %cst_154 = arith.constant dense<0.000000e+00> : vector<9x32xf32>
    %346 = tpu.matmul %3, %345, %cst_154 {dimension_numbers = #tpu.dot_dimension_numbers<[1], [0], [0], [1], [0, 0, 1, 1], [], []>} : vector<9x16xbf16>, vector<16x32xbf16>, vector<9x32xf32> -> vector<9x32xf32>
    %c0_155 = arith.constant 0 : index
    %c0_156 = arith.constant 0 : index
    %347 = memref.load %arg10[%c0_155, %c0_156] : memref<4x4xf32, #tpu.memory_space<smem>>
    %348 = vector.broadcast %347 : f32 to vector<9x32xf32>
    %349 = arith.mulf %337, %348 : vector<9x32xf32>
    %c0_157 = arith.constant 0 : index
    %c1_158 = arith.constant 1 : index
    %350 = memref.load %arg10[%c0_157, %c1_158] : memref<4x4xf32, #tpu.memory_space<smem>>
    %351 = vector.broadcast %350 : f32 to vector<9x32xf32>
    %352 = arith.mulf %340, %351 : vector<9x32xf32>
    %353 = arith.addf %349, %352 : vector<9x32xf32>
    %c0_159 = arith.constant 0 : index
    %c2_160 = arith.constant 2 : index
    %354 = memref.load %arg10[%c0_159, %c2_160] : memref<4x4xf32, #tpu.memory_space<smem>>
    %355 = vector.broadcast %354 : f32 to vector<9x32xf32>
    %356 = arith.mulf %343, %355 : vector<9x32xf32>
    %357 = arith.addf %353, %356 : vector<9x32xf32>
    %c0_161 = arith.constant 0 : index
    %c3_162 = arith.constant 3 : index
    %358 = memref.load %arg10[%c0_161, %c3_162] : memref<4x4xf32, #tpu.memory_space<smem>>
    %359 = vector.broadcast %358 : f32 to vector<9x32xf32>
    %360 = arith.mulf %346, %359 : vector<9x32xf32>
    %361 = arith.addf %357, %360 : vector<9x32xf32>
    %c0_163 = arith.constant 0 : index
    %362 = memref.load %arg11[%c0_163] : memref<4xf32, #tpu.memory_space<smem>>
    %363 = vector.broadcast %362 : f32 to vector<9x32xf32>
    %364 = arith.addf %361, %363 : vector<9x32xf32>
    %c1_164 = arith.constant 1 : index
    %c0_165 = arith.constant 0 : index
    %365 = memref.load %arg10[%c1_164, %c0_165] : memref<4x4xf32, #tpu.memory_space<smem>>
    %366 = vector.broadcast %365 : f32 to vector<9x32xf32>
    %367 = arith.mulf %337, %366 : vector<9x32xf32>
    %c1_166 = arith.constant 1 : index
    %c1_167 = arith.constant 1 : index
    %368 = memref.load %arg10[%c1_166, %c1_167] : memref<4x4xf32, #tpu.memory_space<smem>>
    %369 = vector.broadcast %368 : f32 to vector<9x32xf32>
    %370 = arith.mulf %340, %369 : vector<9x32xf32>
    %371 = arith.addf %367, %370 : vector<9x32xf32>
    %c1_168 = arith.constant 1 : index
    %c2_169 = arith.constant 2 : index
    %372 = memref.load %arg10[%c1_168, %c2_169] : memref<4x4xf32, #tpu.memory_space<smem>>
    %373 = vector.broadcast %372 : f32 to vector<9x32xf32>
    %374 = arith.mulf %343, %373 : vector<9x32xf32>
    %375 = arith.addf %371, %374 : vector<9x32xf32>
    %c1_170 = arith.constant 1 : index
    %c3_171 = arith.constant 3 : index
    %376 = memref.load %arg10[%c1_170, %c3_171] : memref<4x4xf32, #tpu.memory_space<smem>>
    %377 = vector.broadcast %376 : f32 to vector<9x32xf32>
    %378 = arith.mulf %346, %377 : vector<9x32xf32>
    %379 = arith.addf %375, %378 : vector<9x32xf32>
    %c1_172 = arith.constant 1 : index
    %380 = memref.load %arg11[%c1_172] : memref<4xf32, #tpu.memory_space<smem>>
    %381 = vector.broadcast %380 : f32 to vector<9x32xf32>
    %382 = arith.addf %379, %381 : vector<9x32xf32>
    %c2_173 = arith.constant 2 : index
    %c0_174 = arith.constant 0 : index
    %383 = memref.load %arg10[%c2_173, %c0_174] : memref<4x4xf32, #tpu.memory_space<smem>>
    %384 = vector.broadcast %383 : f32 to vector<9x32xf32>
    %385 = arith.mulf %337, %384 : vector<9x32xf32>
    %c2_175 = arith.constant 2 : index
    %c1_176 = arith.constant 1 : index
    %386 = memref.load %arg10[%c2_175, %c1_176] : memref<4x4xf32, #tpu.memory_space<smem>>
    %387 = vector.broadcast %386 : f32 to vector<9x32xf32>
    %388 = arith.mulf %340, %387 : vector<9x32xf32>
    %389 = arith.addf %385, %388 : vector<9x32xf32>
    %c2_177 = arith.constant 2 : index
    %c2_178 = arith.constant 2 : index
    %390 = memref.load %arg10[%c2_177, %c2_178] : memref<4x4xf32, #tpu.memory_space<smem>>
    %391 = vector.broadcast %390 : f32 to vector<9x32xf32>
    %392 = arith.mulf %343, %391 : vector<9x32xf32>
    %393 = arith.addf %389, %392 : vector<9x32xf32>
    %c2_179 = arith.constant 2 : index
    %c3_180 = arith.constant 3 : index
    %394 = memref.load %arg10[%c2_179, %c3_180] : memref<4x4xf32, #tpu.memory_space<smem>>
    %395 = vector.broadcast %394 : f32 to vector<9x32xf32>
    %396 = arith.mulf %346, %395 : vector<9x32xf32>
    %397 = arith.addf %393, %396 : vector<9x32xf32>
    %c2_181 = arith.constant 2 : index
    %398 = memref.load %arg11[%c2_181] : memref<4xf32, #tpu.memory_space<smem>>
    %399 = vector.broadcast %398 : f32 to vector<9x32xf32>
    %400 = arith.addf %397, %399 : vector<9x32xf32>
    %c3_182 = arith.constant 3 : index
    %c0_183 = arith.constant 0 : index
    %401 = memref.load %arg10[%c3_182, %c0_183] : memref<4x4xf32, #tpu.memory_space<smem>>
    %402 = vector.broadcast %401 : f32 to vector<9x32xf32>
    %403 = arith.mulf %337, %402 : vector<9x32xf32>
    %c3_184 = arith.constant 3 : index
    %c1_185 = arith.constant 1 : index
    %404 = memref.load %arg10[%c3_184, %c1_185] : memref<4x4xf32, #tpu.memory_space<smem>>
    %405 = vector.broadcast %404 : f32 to vector<9x32xf32>
    %406 = arith.mulf %340, %405 : vector<9x32xf32>
    %407 = arith.addf %403, %406 : vector<9x32xf32>
    %c3_186 = arith.constant 3 : index
    %c2_187 = arith.constant 2 : index
    %408 = memref.load %arg10[%c3_186, %c2_187] : memref<4x4xf32, #tpu.memory_space<smem>>
    %409 = vector.broadcast %408 : f32 to vector<9x32xf32>
    %410 = arith.mulf %343, %409 : vector<9x32xf32>
    %411 = arith.addf %407, %410 : vector<9x32xf32>
    %c3_188 = arith.constant 3 : index
    %c3_189 = arith.constant 3 : index
    %412 = memref.load %arg10[%c3_188, %c3_189] : memref<4x4xf32, #tpu.memory_space<smem>>
    %413 = vector.broadcast %412 : f32 to vector<9x32xf32>
    %414 = arith.mulf %346, %413 : vector<9x32xf32>
    %415 = arith.addf %411, %414 : vector<9x32xf32>
    %c3_190 = arith.constant 3 : index
    %416 = memref.load %arg11[%c3_190] : memref<4xf32, #tpu.memory_space<smem>>
    %417 = vector.broadcast %416 : f32 to vector<9x32xf32>
    %418 = arith.addf %415, %417 : vector<9x32xf32>
    %cst_191 = arith.constant 0.000000e+00 : f32
    %419 = vector.broadcast %cst_191 : f32 to vector<9x32xf32>
    %420 = arith.cmpf ogt, %364, %419 : vector<9x32xf32>
    %cst_192 = arith.constant 1.000000e-01 : f32
    %421 = vector.broadcast %cst_192 : f32 to vector<9x32xf32>
    %422 = arith.mulf %421, %364 : vector<9x32xf32>
    %423 = arith.select %420, %364, %422 : vector<9x32xi1>, vector<9x32xf32>
    %cst_193 = arith.constant 0.000000e+00 : f32
    %424 = vector.broadcast %cst_193 : f32 to vector<9x32xf32>
    %425 = arith.cmpf ogt, %382, %424 : vector<9x32xf32>
    %cst_194 = arith.constant 1.000000e-01 : f32
    %426 = vector.broadcast %cst_194 : f32 to vector<9x32xf32>
    %427 = arith.mulf %426, %382 : vector<9x32xf32>
    %428 = arith.select %425, %382, %427 : vector<9x32xi1>, vector<9x32xf32>
    %cst_195 = arith.constant 0.000000e+00 : f32
    %429 = vector.broadcast %cst_195 : f32 to vector<9x32xf32>
    %430 = arith.cmpf ogt, %400, %429 : vector<9x32xf32>
    %cst_196 = arith.constant 1.000000e-01 : f32
    %431 = vector.broadcast %cst_196 : f32 to vector<9x32xf32>
    %432 = arith.mulf %431, %400 : vector<9x32xf32>
    %433 = arith.select %430, %400, %432 : vector<9x32xi1>, vector<9x32xf32>
    %cst_197 = arith.constant 0.000000e+00 : f32
    %434 = vector.broadcast %cst_197 : f32 to vector<9x32xf32>
    %435 = arith.cmpf ogt, %418, %434 : vector<9x32xf32>
    %cst_198 = arith.constant 1.000000e-01 : f32
    %436 = vector.broadcast %cst_198 : f32 to vector<9x32xf32>
    %437 = arith.mulf %436, %418 : vector<9x32xf32>
    %438 = arith.select %435, %418, %437 : vector<9x32xi1>, vector<9x32xf32>
    %cst_199 = arith.constant 0.000000e+00 : f32
    %439 = vector.broadcast %cst_199 : f32 to vector<1x32xf32>
    %440 = vector.extract_strided_slice %423 {offsets = [0, 0], sizes = [8, 32], strides = [1, 1]} : vector<9x32xf32> to vector<8x32xf32>
    %441 = tpu.concatenate %439, %440 in 0 : vector<1x32xf32>, vector<8x32xf32> -> vector<9x32xf32>
    %442 = vector.extract_strided_slice %423 {offsets = [1, 0], sizes = [8, 32], strides = [1, 1]} : vector<9x32xf32> to vector<8x32xf32>
    %443 = tpu.concatenate %442, %439 in 0 : vector<8x32xf32>, vector<1x32xf32> -> vector<9x32xf32>
    %444 = vector.extract_strided_slice %428 {offsets = [0, 0], sizes = [8, 32], strides = [1, 1]} : vector<9x32xf32> to vector<8x32xf32>
    %445 = tpu.concatenate %439, %444 in 0 : vector<1x32xf32>, vector<8x32xf32> -> vector<9x32xf32>
    %446 = vector.extract_strided_slice %428 {offsets = [1, 0], sizes = [8, 32], strides = [1, 1]} : vector<9x32xf32> to vector<8x32xf32>
    %447 = tpu.concatenate %446, %439 in 0 : vector<8x32xf32>, vector<1x32xf32> -> vector<9x32xf32>
    %448 = vector.extract_strided_slice %433 {offsets = [0, 0], sizes = [8, 32], strides = [1, 1]} : vector<9x32xf32> to vector<8x32xf32>
    %449 = tpu.concatenate %439, %448 in 0 : vector<1x32xf32>, vector<8x32xf32> -> vector<9x32xf32>
    %450 = vector.extract_strided_slice %433 {offsets = [1, 0], sizes = [8, 32], strides = [1, 1]} : vector<9x32xf32> to vector<8x32xf32>
    %451 = tpu.concatenate %450, %439 in 0 : vector<8x32xf32>, vector<1x32xf32> -> vector<9x32xf32>
    %452 = vector.extract_strided_slice %438 {offsets = [0, 0], sizes = [8, 32], strides = [1, 1]} : vector<9x32xf32> to vector<8x32xf32>
    %453 = tpu.concatenate %439, %452 in 0 : vector<1x32xf32>, vector<8x32xf32> -> vector<9x32xf32>
    %454 = vector.extract_strided_slice %438 {offsets = [1, 0], sizes = [8, 32], strides = [1, 1]} : vector<9x32xf32> to vector<8x32xf32>
    %455 = tpu.concatenate %454, %439 in 0 : vector<8x32xf32>, vector<1x32xf32> -> vector<9x32xf32>
    %c0_200 = arith.constant 0 : index
    %c0_201 = arith.constant 0 : index
    %456 = memref.load %arg12[%c0_200, %c0_201] : memref<4x12xf32, #tpu.memory_space<smem>>
    %457 = vector.broadcast %456 : f32 to vector<9x32xf32>
    %458 = arith.mulf %441, %457 : vector<9x32xf32>
    %c0_202 = arith.constant 0 : index
    %c1_203 = arith.constant 1 : index
    %459 = memref.load %arg12[%c0_202, %c1_203] : memref<4x12xf32, #tpu.memory_space<smem>>
    %460 = vector.broadcast %459 : f32 to vector<9x32xf32>
    %461 = arith.mulf %423, %460 : vector<9x32xf32>
    %462 = arith.addf %458, %461 : vector<9x32xf32>
    %c0_204 = arith.constant 0 : index
    %c2_205 = arith.constant 2 : index
    %463 = memref.load %arg12[%c0_204, %c2_205] : memref<4x12xf32, #tpu.memory_space<smem>>
    %464 = vector.broadcast %463 : f32 to vector<9x32xf32>
    %465 = arith.mulf %443, %464 : vector<9x32xf32>
    %466 = arith.addf %462, %465 : vector<9x32xf32>
    %c0_206 = arith.constant 0 : index
    %c3_207 = arith.constant 3 : index
    %467 = memref.load %arg12[%c0_206, %c3_207] : memref<4x12xf32, #tpu.memory_space<smem>>
    %468 = vector.broadcast %467 : f32 to vector<9x32xf32>
    %469 = arith.mulf %445, %468 : vector<9x32xf32>
    %470 = arith.addf %466, %469 : vector<9x32xf32>
    %c0_208 = arith.constant 0 : index
    %c4_209 = arith.constant 4 : index
    %471 = memref.load %arg12[%c0_208, %c4_209] : memref<4x12xf32, #tpu.memory_space<smem>>
    %472 = vector.broadcast %471 : f32 to vector<9x32xf32>
    %473 = arith.mulf %428, %472 : vector<9x32xf32>
    %474 = arith.addf %470, %473 : vector<9x32xf32>
    %c0_210 = arith.constant 0 : index
    %c5_211 = arith.constant 5 : index
    %475 = memref.load %arg12[%c0_210, %c5_211] : memref<4x12xf32, #tpu.memory_space<smem>>
    %476 = vector.broadcast %475 : f32 to vector<9x32xf32>
    %477 = arith.mulf %447, %476 : vector<9x32xf32>
    %478 = arith.addf %474, %477 : vector<9x32xf32>
    %c0_212 = arith.constant 0 : index
    %c6_213 = arith.constant 6 : index
    %479 = memref.load %arg12[%c0_212, %c6_213] : memref<4x12xf32, #tpu.memory_space<smem>>
    %480 = vector.broadcast %479 : f32 to vector<9x32xf32>
    %481 = arith.mulf %449, %480 : vector<9x32xf32>
    %482 = arith.addf %478, %481 : vector<9x32xf32>
    %c0_214 = arith.constant 0 : index
    %c7_215 = arith.constant 7 : index
    %483 = memref.load %arg12[%c0_214, %c7_215] : memref<4x12xf32, #tpu.memory_space<smem>>
    %484 = vector.broadcast %483 : f32 to vector<9x32xf32>
    %485 = arith.mulf %433, %484 : vector<9x32xf32>
    %486 = arith.addf %482, %485 : vector<9x32xf32>
    %c0_216 = arith.constant 0 : index
    %c8_217 = arith.constant 8 : index
    %487 = memref.load %arg12[%c0_216, %c8_217] : memref<4x12xf32, #tpu.memory_space<smem>>
    %488 = vector.broadcast %487 : f32 to vector<9x32xf32>
    %489 = arith.mulf %451, %488 : vector<9x32xf32>
    %490 = arith.addf %486, %489 : vector<9x32xf32>
    %c0_218 = arith.constant 0 : index
    %c9_219 = arith.constant 9 : index
    %491 = memref.load %arg12[%c0_218, %c9_219] : memref<4x12xf32, #tpu.memory_space<smem>>
    %492 = vector.broadcast %491 : f32 to vector<9x32xf32>
    %493 = arith.mulf %453, %492 : vector<9x32xf32>
    %494 = arith.addf %490, %493 : vector<9x32xf32>
    %c0_220 = arith.constant 0 : index
    %c10_221 = arith.constant 10 : index
    %495 = memref.load %arg12[%c0_220, %c10_221] : memref<4x12xf32, #tpu.memory_space<smem>>
    %496 = vector.broadcast %495 : f32 to vector<9x32xf32>
    %497 = arith.mulf %438, %496 : vector<9x32xf32>
    %498 = arith.addf %494, %497 : vector<9x32xf32>
    %c0_222 = arith.constant 0 : index
    %c11_223 = arith.constant 11 : index
    %499 = memref.load %arg12[%c0_222, %c11_223] : memref<4x12xf32, #tpu.memory_space<smem>>
    %500 = vector.broadcast %499 : f32 to vector<9x32xf32>
    %501 = arith.mulf %455, %500 : vector<9x32xf32>
    %502 = arith.addf %498, %501 : vector<9x32xf32>
    %c0_224 = arith.constant 0 : index
    %503 = memref.load %arg13[%c0_224] : memref<4xf32, #tpu.memory_space<smem>>
    %504 = vector.broadcast %503 : f32 to vector<9x32xf32>
    %505 = arith.addf %502, %504 : vector<9x32xf32>
    %c1_225 = arith.constant 1 : index
    %c0_226 = arith.constant 0 : index
    %506 = memref.load %arg12[%c1_225, %c0_226] : memref<4x12xf32, #tpu.memory_space<smem>>
    %507 = vector.broadcast %506 : f32 to vector<9x32xf32>
    %508 = arith.mulf %441, %507 : vector<9x32xf32>
    %c1_227 = arith.constant 1 : index
    %c1_228 = arith.constant 1 : index
    %509 = memref.load %arg12[%c1_227, %c1_228] : memref<4x12xf32, #tpu.memory_space<smem>>
    %510 = vector.broadcast %509 : f32 to vector<9x32xf32>
    %511 = arith.mulf %423, %510 : vector<9x32xf32>
    %512 = arith.addf %508, %511 : vector<9x32xf32>
    %c1_229 = arith.constant 1 : index
    %c2_230 = arith.constant 2 : index
    %513 = memref.load %arg12[%c1_229, %c2_230] : memref<4x12xf32, #tpu.memory_space<smem>>
    %514 = vector.broadcast %513 : f32 to vector<9x32xf32>
    %515 = arith.mulf %443, %514 : vector<9x32xf32>
    %516 = arith.addf %512, %515 : vector<9x32xf32>
    %c1_231 = arith.constant 1 : index
    %c3_232 = arith.constant 3 : index
    %517 = memref.load %arg12[%c1_231, %c3_232] : memref<4x12xf32, #tpu.memory_space<smem>>
    %518 = vector.broadcast %517 : f32 to vector<9x32xf32>
    %519 = arith.mulf %445, %518 : vector<9x32xf32>
    %520 = arith.addf %516, %519 : vector<9x32xf32>
    %c1_233 = arith.constant 1 : index
    %c4_234 = arith.constant 4 : index
    %521 = memref.load %arg12[%c1_233, %c4_234] : memref<4x12xf32, #tpu.memory_space<smem>>
    %522 = vector.broadcast %521 : f32 to vector<9x32xf32>
    %523 = arith.mulf %428, %522 : vector<9x32xf32>
    %524 = arith.addf %520, %523 : vector<9x32xf32>
    %c1_235 = arith.constant 1 : index
    %c5_236 = arith.constant 5 : index
    %525 = memref.load %arg12[%c1_235, %c5_236] : memref<4x12xf32, #tpu.memory_space<smem>>
    %526 = vector.broadcast %525 : f32 to vector<9x32xf32>
    %527 = arith.mulf %447, %526 : vector<9x32xf32>
    %528 = arith.addf %524, %527 : vector<9x32xf32>
    %c1_237 = arith.constant 1 : index
    %c6_238 = arith.constant 6 : index
    %529 = memref.load %arg12[%c1_237, %c6_238] : memref<4x12xf32, #tpu.memory_space<smem>>
    %530 = vector.broadcast %529 : f32 to vector<9x32xf32>
    %531 = arith.mulf %449, %530 : vector<9x32xf32>
    %532 = arith.addf %528, %531 : vector<9x32xf32>
    %c1_239 = arith.constant 1 : index
    %c7_240 = arith.constant 7 : index
    %533 = memref.load %arg12[%c1_239, %c7_240] : memref<4x12xf32, #tpu.memory_space<smem>>
    %534 = vector.broadcast %533 : f32 to vector<9x32xf32>
    %535 = arith.mulf %433, %534 : vector<9x32xf32>
    %536 = arith.addf %532, %535 : vector<9x32xf32>
    %c1_241 = arith.constant 1 : index
    %c8_242 = arith.constant 8 : index
    %537 = memref.load %arg12[%c1_241, %c8_242] : memref<4x12xf32, #tpu.memory_space<smem>>
    %538 = vector.broadcast %537 : f32 to vector<9x32xf32>
    %539 = arith.mulf %451, %538 : vector<9x32xf32>
    %540 = arith.addf %536, %539 : vector<9x32xf32>
    %c1_243 = arith.constant 1 : index
    %c9_244 = arith.constant 9 : index
    %541 = memref.load %arg12[%c1_243, %c9_244] : memref<4x12xf32, #tpu.memory_space<smem>>
    %542 = vector.broadcast %541 : f32 to vector<9x32xf32>
    %543 = arith.mulf %453, %542 : vector<9x32xf32>
    %544 = arith.addf %540, %543 : vector<9x32xf32>
    %c1_245 = arith.constant 1 : index
    %c10_246 = arith.constant 10 : index
    %545 = memref.load %arg12[%c1_245, %c10_246] : memref<4x12xf32, #tpu.memory_space<smem>>
    %546 = vector.broadcast %545 : f32 to vector<9x32xf32>
    %547 = arith.mulf %438, %546 : vector<9x32xf32>
    %548 = arith.addf %544, %547 : vector<9x32xf32>
    %c1_247 = arith.constant 1 : index
    %c11_248 = arith.constant 11 : index
    %549 = memref.load %arg12[%c1_247, %c11_248] : memref<4x12xf32, #tpu.memory_space<smem>>
    %550 = vector.broadcast %549 : f32 to vector<9x32xf32>
    %551 = arith.mulf %455, %550 : vector<9x32xf32>
    %552 = arith.addf %548, %551 : vector<9x32xf32>
    %c1_249 = arith.constant 1 : index
    %553 = memref.load %arg13[%c1_249] : memref<4xf32, #tpu.memory_space<smem>>
    %554 = vector.broadcast %553 : f32 to vector<9x32xf32>
    %555 = arith.addf %552, %554 : vector<9x32xf32>
    %c2_250 = arith.constant 2 : index
    %c0_251 = arith.constant 0 : index
    %556 = memref.load %arg12[%c2_250, %c0_251] : memref<4x12xf32, #tpu.memory_space<smem>>
    %557 = vector.broadcast %556 : f32 to vector<9x32xf32>
    %558 = arith.mulf %441, %557 : vector<9x32xf32>
    %c2_252 = arith.constant 2 : index
    %c1_253 = arith.constant 1 : index
    %559 = memref.load %arg12[%c2_252, %c1_253] : memref<4x12xf32, #tpu.memory_space<smem>>
    %560 = vector.broadcast %559 : f32 to vector<9x32xf32>
    %561 = arith.mulf %423, %560 : vector<9x32xf32>
    %562 = arith.addf %558, %561 : vector<9x32xf32>
    %c2_254 = arith.constant 2 : index
    %c2_255 = arith.constant 2 : index
    %563 = memref.load %arg12[%c2_254, %c2_255] : memref<4x12xf32, #tpu.memory_space<smem>>
    %564 = vector.broadcast %563 : f32 to vector<9x32xf32>
    %565 = arith.mulf %443, %564 : vector<9x32xf32>
    %566 = arith.addf %562, %565 : vector<9x32xf32>
    %c2_256 = arith.constant 2 : index
    %c3_257 = arith.constant 3 : index
    %567 = memref.load %arg12[%c2_256, %c3_257] : memref<4x12xf32, #tpu.memory_space<smem>>
    %568 = vector.broadcast %567 : f32 to vector<9x32xf32>
    %569 = arith.mulf %445, %568 : vector<9x32xf32>
    %570 = arith.addf %566, %569 : vector<9x32xf32>
    %c2_258 = arith.constant 2 : index
    %c4_259 = arith.constant 4 : index
    %571 = memref.load %arg12[%c2_258, %c4_259] : memref<4x12xf32, #tpu.memory_space<smem>>
    %572 = vector.broadcast %571 : f32 to vector<9x32xf32>
    %573 = arith.mulf %428, %572 : vector<9x32xf32>
    %574 = arith.addf %570, %573 : vector<9x32xf32>
    %c2_260 = arith.constant 2 : index
    %c5_261 = arith.constant 5 : index
    %575 = memref.load %arg12[%c2_260, %c5_261] : memref<4x12xf32, #tpu.memory_space<smem>>
    %576 = vector.broadcast %575 : f32 to vector<9x32xf32>
    %577 = arith.mulf %447, %576 : vector<9x32xf32>
    %578 = arith.addf %574, %577 : vector<9x32xf32>
    %c2_262 = arith.constant 2 : index
    %c6_263 = arith.constant 6 : index
    %579 = memref.load %arg12[%c2_262, %c6_263] : memref<4x12xf32, #tpu.memory_space<smem>>
    %580 = vector.broadcast %579 : f32 to vector<9x32xf32>
    %581 = arith.mulf %449, %580 : vector<9x32xf32>
    %582 = arith.addf %578, %581 : vector<9x32xf32>
    %c2_264 = arith.constant 2 : index
    %c7_265 = arith.constant 7 : index
    %583 = memref.load %arg12[%c2_264, %c7_265] : memref<4x12xf32, #tpu.memory_space<smem>>
    %584 = vector.broadcast %583 : f32 to vector<9x32xf32>
    %585 = arith.mulf %433, %584 : vector<9x32xf32>
    %586 = arith.addf %582, %585 : vector<9x32xf32>
    %c2_266 = arith.constant 2 : index
    %c8_267 = arith.constant 8 : index
    %587 = memref.load %arg12[%c2_266, %c8_267] : memref<4x12xf32, #tpu.memory_space<smem>>
    %588 = vector.broadcast %587 : f32 to vector<9x32xf32>
    %589 = arith.mulf %451, %588 : vector<9x32xf32>
    %590 = arith.addf %586, %589 : vector<9x32xf32>
    %c2_268 = arith.constant 2 : index
    %c9_269 = arith.constant 9 : index
    %591 = memref.load %arg12[%c2_268, %c9_269] : memref<4x12xf32, #tpu.memory_space<smem>>
    %592 = vector.broadcast %591 : f32 to vector<9x32xf32>
    %593 = arith.mulf %453, %592 : vector<9x32xf32>
    %594 = arith.addf %590, %593 : vector<9x32xf32>
    %c2_270 = arith.constant 2 : index
    %c10_271 = arith.constant 10 : index
    %595 = memref.load %arg12[%c2_270, %c10_271] : memref<4x12xf32, #tpu.memory_space<smem>>
    %596 = vector.broadcast %595 : f32 to vector<9x32xf32>
    %597 = arith.mulf %438, %596 : vector<9x32xf32>
    %598 = arith.addf %594, %597 : vector<9x32xf32>
    %c2_272 = arith.constant 2 : index
    %c11_273 = arith.constant 11 : index
    %599 = memref.load %arg12[%c2_272, %c11_273] : memref<4x12xf32, #tpu.memory_space<smem>>
    %600 = vector.broadcast %599 : f32 to vector<9x32xf32>
    %601 = arith.mulf %455, %600 : vector<9x32xf32>
    %602 = arith.addf %598, %601 : vector<9x32xf32>
    %c2_274 = arith.constant 2 : index
    %603 = memref.load %arg13[%c2_274] : memref<4xf32, #tpu.memory_space<smem>>
    %604 = vector.broadcast %603 : f32 to vector<9x32xf32>
    %605 = arith.addf %602, %604 : vector<9x32xf32>
    %c3_275 = arith.constant 3 : index
    %c0_276 = arith.constant 0 : index
    %606 = memref.load %arg12[%c3_275, %c0_276] : memref<4x12xf32, #tpu.memory_space<smem>>
    %607 = vector.broadcast %606 : f32 to vector<9x32xf32>
    %608 = arith.mulf %441, %607 : vector<9x32xf32>
    %c3_277 = arith.constant 3 : index
    %c1_278 = arith.constant 1 : index
    %609 = memref.load %arg12[%c3_277, %c1_278] : memref<4x12xf32, #tpu.memory_space<smem>>
    %610 = vector.broadcast %609 : f32 to vector<9x32xf32>
    %611 = arith.mulf %423, %610 : vector<9x32xf32>
    %612 = arith.addf %608, %611 : vector<9x32xf32>
    %c3_279 = arith.constant 3 : index
    %c2_280 = arith.constant 2 : index
    %613 = memref.load %arg12[%c3_279, %c2_280] : memref<4x12xf32, #tpu.memory_space<smem>>
    %614 = vector.broadcast %613 : f32 to vector<9x32xf32>
    %615 = arith.mulf %443, %614 : vector<9x32xf32>
    %616 = arith.addf %612, %615 : vector<9x32xf32>
    %c3_281 = arith.constant 3 : index
    %c3_282 = arith.constant 3 : index
    %617 = memref.load %arg12[%c3_281, %c3_282] : memref<4x12xf32, #tpu.memory_space<smem>>
    %618 = vector.broadcast %617 : f32 to vector<9x32xf32>
    %619 = arith.mulf %445, %618 : vector<9x32xf32>
    %620 = arith.addf %616, %619 : vector<9x32xf32>
    %c3_283 = arith.constant 3 : index
    %c4_284 = arith.constant 4 : index
    %621 = memref.load %arg12[%c3_283, %c4_284] : memref<4x12xf32, #tpu.memory_space<smem>>
    %622 = vector.broadcast %621 : f32 to vector<9x32xf32>
    %623 = arith.mulf %428, %622 : vector<9x32xf32>
    %624 = arith.addf %620, %623 : vector<9x32xf32>
    %c3_285 = arith.constant 3 : index
    %c5_286 = arith.constant 5 : index
    %625 = memref.load %arg12[%c3_285, %c5_286] : memref<4x12xf32, #tpu.memory_space<smem>>
    %626 = vector.broadcast %625 : f32 to vector<9x32xf32>
    %627 = arith.mulf %447, %626 : vector<9x32xf32>
    %628 = arith.addf %624, %627 : vector<9x32xf32>
    %c3_287 = arith.constant 3 : index
    %c6_288 = arith.constant 6 : index
    %629 = memref.load %arg12[%c3_287, %c6_288] : memref<4x12xf32, #tpu.memory_space<smem>>
    %630 = vector.broadcast %629 : f32 to vector<9x32xf32>
    %631 = arith.mulf %449, %630 : vector<9x32xf32>
    %632 = arith.addf %628, %631 : vector<9x32xf32>
    %c3_289 = arith.constant 3 : index
    %c7_290 = arith.constant 7 : index
    %633 = memref.load %arg12[%c3_289, %c7_290] : memref<4x12xf32, #tpu.memory_space<smem>>
    %634 = vector.broadcast %633 : f32 to vector<9x32xf32>
    %635 = arith.mulf %433, %634 : vector<9x32xf32>
    %636 = arith.addf %632, %635 : vector<9x32xf32>
    %c3_291 = arith.constant 3 : index
    %c8_292 = arith.constant 8 : index
    %637 = memref.load %arg12[%c3_291, %c8_292] : memref<4x12xf32, #tpu.memory_space<smem>>
    %638 = vector.broadcast %637 : f32 to vector<9x32xf32>
    %639 = arith.mulf %451, %638 : vector<9x32xf32>
    %640 = arith.addf %636, %639 : vector<9x32xf32>
    %c3_293 = arith.constant 3 : index
    %c9_294 = arith.constant 9 : index
    %641 = memref.load %arg12[%c3_293, %c9_294] : memref<4x12xf32, #tpu.memory_space<smem>>
    %642 = vector.broadcast %641 : f32 to vector<9x32xf32>
    %643 = arith.mulf %453, %642 : vector<9x32xf32>
    %644 = arith.addf %640, %643 : vector<9x32xf32>
    %c3_295 = arith.constant 3 : index
    %c10_296 = arith.constant 10 : index
    %645 = memref.load %arg12[%c3_295, %c10_296] : memref<4x12xf32, #tpu.memory_space<smem>>
    %646 = vector.broadcast %645 : f32 to vector<9x32xf32>
    %647 = arith.mulf %438, %646 : vector<9x32xf32>
    %648 = arith.addf %644, %647 : vector<9x32xf32>
    %c3_297 = arith.constant 3 : index
    %c11_298 = arith.constant 11 : index
    %649 = memref.load %arg12[%c3_297, %c11_298] : memref<4x12xf32, #tpu.memory_space<smem>>
    %650 = vector.broadcast %649 : f32 to vector<9x32xf32>
    %651 = arith.mulf %455, %650 : vector<9x32xf32>
    %652 = arith.addf %648, %651 : vector<9x32xf32>
    %c3_299 = arith.constant 3 : index
    %653 = memref.load %arg13[%c3_299] : memref<4xf32, #tpu.memory_space<smem>>
    %654 = vector.broadcast %653 : f32 to vector<9x32xf32>
    %655 = arith.addf %652, %654 : vector<9x32xf32>
    %656 = arith.truncf %505 : vector<9x32xf32> to vector<9x32xbf16>
    %cst_300 = arith.constant dense<0.000000e+00> : vector<16x32xf32>
    %657 = tpu.matmul %5, %656, %cst_300 {dimension_numbers = #tpu.dot_dimension_numbers<[1], [0], [0], [1], [0, 0, 1, 1], [], []>} : vector<16x9xbf16>, vector<9x32xbf16>, vector<16x32xf32> -> vector<16x32xf32>
    %658 = arith.addf %328, %657 : vector<16x32xf32>
    %659 = arith.truncf %555 : vector<9x32xf32> to vector<9x32xbf16>
    %cst_301 = arith.constant dense<0.000000e+00> : vector<16x32xf32>
    %660 = tpu.matmul %5, %659, %cst_301 {dimension_numbers = #tpu.dot_dimension_numbers<[1], [0], [0], [1], [0, 0, 1, 1], [], []>} : vector<16x9xbf16>, vector<9x32xbf16>, vector<16x32xf32> -> vector<16x32xf32>
    %661 = arith.addf %330, %660 : vector<16x32xf32>
    %662 = arith.truncf %605 : vector<9x32xf32> to vector<9x32xbf16>
    %cst_302 = arith.constant dense<0.000000e+00> : vector<16x32xf32>
    %663 = tpu.matmul %5, %662, %cst_302 {dimension_numbers = #tpu.dot_dimension_numbers<[1], [0], [0], [1], [0, 0, 1, 1], [], []>} : vector<16x9xbf16>, vector<9x32xbf16>, vector<16x32xf32> -> vector<16x32xf32>
    %664 = arith.addf %332, %663 : vector<16x32xf32>
    %665 = arith.truncf %655 : vector<9x32xf32> to vector<9x32xbf16>
    %cst_303 = arith.constant dense<0.000000e+00> : vector<16x32xf32>
    %666 = tpu.matmul %5, %665, %cst_303 {dimension_numbers = #tpu.dot_dimension_numbers<[1], [0], [0], [1], [0, 0, 1, 1], [], []>} : vector<16x9xbf16>, vector<9x32xbf16>, vector<16x32xf32> -> vector<16x32xf32>
    %667 = arith.addf %334, %666 : vector<16x32xf32>
    %c0_304 = arith.constant 0 : index
    %c0_305 = arith.constant 0 : index
    %668 = memref.load %arg14[%c0_304, %c0_305] : memref<4x4xf32, #tpu.memory_space<smem>>
    %669 = vector.broadcast %668 : f32 to vector<16x32xf32>
    %670 = arith.mulf %658, %669 : vector<16x32xf32>
    %c0_306 = arith.constant 0 : index
    %c1_307 = arith.constant 1 : index
    %671 = memref.load %arg14[%c0_306, %c1_307] : memref<4x4xf32, #tpu.memory_space<smem>>
    %672 = vector.broadcast %671 : f32 to vector<16x32xf32>
    %673 = arith.mulf %661, %672 : vector<16x32xf32>
    %674 = arith.addf %670, %673 : vector<16x32xf32>
    %c0_308 = arith.constant 0 : index
    %c2_309 = arith.constant 2 : index
    %675 = memref.load %arg14[%c0_308, %c2_309] : memref<4x4xf32, #tpu.memory_space<smem>>
    %676 = vector.broadcast %675 : f32 to vector<16x32xf32>
    %677 = arith.mulf %664, %676 : vector<16x32xf32>
    %678 = arith.addf %674, %677 : vector<16x32xf32>
    %c0_310 = arith.constant 0 : index
    %c3_311 = arith.constant 3 : index
    %679 = memref.load %arg14[%c0_310, %c3_311] : memref<4x4xf32, #tpu.memory_space<smem>>
    %680 = vector.broadcast %679 : f32 to vector<16x32xf32>
    %681 = arith.mulf %667, %680 : vector<16x32xf32>
    %682 = arith.addf %678, %681 : vector<16x32xf32>
    %c0_312 = arith.constant 0 : index
    %683 = memref.load %arg15[%c0_312] : memref<4xf32, #tpu.memory_space<smem>>
    %684 = vector.broadcast %683 : f32 to vector<16x32xf32>
    %685 = arith.addf %682, %684 : vector<16x32xf32>
    %c1_313 = arith.constant 1 : index
    %c0_314 = arith.constant 0 : index
    %686 = memref.load %arg14[%c1_313, %c0_314] : memref<4x4xf32, #tpu.memory_space<smem>>
    %687 = vector.broadcast %686 : f32 to vector<16x32xf32>
    %688 = arith.mulf %658, %687 : vector<16x32xf32>
    %c1_315 = arith.constant 1 : index
    %c1_316 = arith.constant 1 : index
    %689 = memref.load %arg14[%c1_315, %c1_316] : memref<4x4xf32, #tpu.memory_space<smem>>
    %690 = vector.broadcast %689 : f32 to vector<16x32xf32>
    %691 = arith.mulf %661, %690 : vector<16x32xf32>
    %692 = arith.addf %688, %691 : vector<16x32xf32>
    %c1_317 = arith.constant 1 : index
    %c2_318 = arith.constant 2 : index
    %693 = memref.load %arg14[%c1_317, %c2_318] : memref<4x4xf32, #tpu.memory_space<smem>>
    %694 = vector.broadcast %693 : f32 to vector<16x32xf32>
    %695 = arith.mulf %664, %694 : vector<16x32xf32>
    %696 = arith.addf %692, %695 : vector<16x32xf32>
    %c1_319 = arith.constant 1 : index
    %c3_320 = arith.constant 3 : index
    %697 = memref.load %arg14[%c1_319, %c3_320] : memref<4x4xf32, #tpu.memory_space<smem>>
    %698 = vector.broadcast %697 : f32 to vector<16x32xf32>
    %699 = arith.mulf %667, %698 : vector<16x32xf32>
    %700 = arith.addf %696, %699 : vector<16x32xf32>
    %c1_321 = arith.constant 1 : index
    %701 = memref.load %arg15[%c1_321] : memref<4xf32, #tpu.memory_space<smem>>
    %702 = vector.broadcast %701 : f32 to vector<16x32xf32>
    %703 = arith.addf %700, %702 : vector<16x32xf32>
    %c2_322 = arith.constant 2 : index
    %c0_323 = arith.constant 0 : index
    %704 = memref.load %arg14[%c2_322, %c0_323] : memref<4x4xf32, #tpu.memory_space<smem>>
    %705 = vector.broadcast %704 : f32 to vector<16x32xf32>
    %706 = arith.mulf %658, %705 : vector<16x32xf32>
    %c2_324 = arith.constant 2 : index
    %c1_325 = arith.constant 1 : index
    %707 = memref.load %arg14[%c2_324, %c1_325] : memref<4x4xf32, #tpu.memory_space<smem>>
    %708 = vector.broadcast %707 : f32 to vector<16x32xf32>
    %709 = arith.mulf %661, %708 : vector<16x32xf32>
    %710 = arith.addf %706, %709 : vector<16x32xf32>
    %c2_326 = arith.constant 2 : index
    %c2_327 = arith.constant 2 : index
    %711 = memref.load %arg14[%c2_326, %c2_327] : memref<4x4xf32, #tpu.memory_space<smem>>
    %712 = vector.broadcast %711 : f32 to vector<16x32xf32>
    %713 = arith.mulf %664, %712 : vector<16x32xf32>
    %714 = arith.addf %710, %713 : vector<16x32xf32>
    %c2_328 = arith.constant 2 : index
    %c3_329 = arith.constant 3 : index
    %715 = memref.load %arg14[%c2_328, %c3_329] : memref<4x4xf32, #tpu.memory_space<smem>>
    %716 = vector.broadcast %715 : f32 to vector<16x32xf32>
    %717 = arith.mulf %667, %716 : vector<16x32xf32>
    %718 = arith.addf %714, %717 : vector<16x32xf32>
    %c2_330 = arith.constant 2 : index
    %719 = memref.load %arg15[%c2_330] : memref<4xf32, #tpu.memory_space<smem>>
    %720 = vector.broadcast %719 : f32 to vector<16x32xf32>
    %721 = arith.addf %718, %720 : vector<16x32xf32>
    %c3_331 = arith.constant 3 : index
    %c0_332 = arith.constant 0 : index
    %722 = memref.load %arg14[%c3_331, %c0_332] : memref<4x4xf32, #tpu.memory_space<smem>>
    %723 = vector.broadcast %722 : f32 to vector<16x32xf32>
    %724 = arith.mulf %658, %723 : vector<16x32xf32>
    %c3_333 = arith.constant 3 : index
    %c1_334 = arith.constant 1 : index
    %725 = memref.load %arg14[%c3_333, %c1_334] : memref<4x4xf32, #tpu.memory_space<smem>>
    %726 = vector.broadcast %725 : f32 to vector<16x32xf32>
    %727 = arith.mulf %661, %726 : vector<16x32xf32>
    %728 = arith.addf %724, %727 : vector<16x32xf32>
    %c3_335 = arith.constant 3 : index
    %c2_336 = arith.constant 2 : index
    %729 = memref.load %arg14[%c3_335, %c2_336] : memref<4x4xf32, #tpu.memory_space<smem>>
    %730 = vector.broadcast %729 : f32 to vector<16x32xf32>
    %731 = arith.mulf %664, %730 : vector<16x32xf32>
    %732 = arith.addf %728, %731 : vector<16x32xf32>
    %c3_337 = arith.constant 3 : index
    %c3_338 = arith.constant 3 : index
    %733 = memref.load %arg14[%c3_337, %c3_338] : memref<4x4xf32, #tpu.memory_space<smem>>
    %734 = vector.broadcast %733 : f32 to vector<16x32xf32>
    %735 = arith.mulf %667, %734 : vector<16x32xf32>
    %736 = arith.addf %732, %735 : vector<16x32xf32>
    %c3_339 = arith.constant 3 : index
    %737 = memref.load %arg15[%c3_339] : memref<4xf32, #tpu.memory_space<smem>>
    %738 = vector.broadcast %737 : f32 to vector<16x32xf32>
    %739 = arith.addf %736, %738 : vector<16x32xf32>
    %740 = vector.extract_strided_slice %0 {offsets = [0, 0, 0], sizes = [1, 16, 32], strides = [1, 1, 1]} : vector<4x16x32xf32> to vector<1x16x32xf32>
    %741 = vector.shape_cast %740 : vector<1x16x32xf32> to vector<16x32xf32>
    %742 = arith.addf %685, %741 : vector<16x32xf32>
    %c0_340 = arith.constant 0 : index
    %c0_341 = arith.constant 0 : index
    %c0_342 = arith.constant 0 : index
    %743 = vector.load %arg16[%c0_340, %c0_341, %c0_342] : memref<4x16x32xf32, #tpu.memory_space<vmem>>, vector<1x16x32xf32>
    %744 = vector.shape_cast %743 : vector<1x16x32xf32> to vector<16x32xf32>
    %745 = vector.shape_cast %742 : vector<16x32xf32> to vector<1x16x32xf32>
    tpu.vector_store %arg16[%c0_340, %c0_341, %c0_342], %745 {strides = array<i32>} : memref<4x16x32xf32, #tpu.memory_space<vmem>>, vector<1x16x32xf32>,
    %746 = vector.extract_strided_slice %0 {offsets = [1, 0, 0], sizes = [1, 16, 32], strides = [1, 1, 1]} : vector<4x16x32xf32> to vector<1x16x32xf32>
    %747 = vector.shape_cast %746 : vector<1x16x32xf32> to vector<16x32xf32>
    %748 = arith.addf %703, %747 : vector<16x32xf32>
    %c1_343 = arith.constant 1 : index
    %c0_344 = arith.constant 0 : index
    %c0_345 = arith.constant 0 : index
    %749 = vector.load %arg16[%c1_343, %c0_344, %c0_345] : memref<4x16x32xf32, #tpu.memory_space<vmem>>, vector<1x16x32xf32>
    %750 = vector.shape_cast %749 : vector<1x16x32xf32> to vector<16x32xf32>
    %751 = vector.shape_cast %748 : vector<16x32xf32> to vector<1x16x32xf32>
    tpu.vector_store %arg16[%c1_343, %c0_344, %c0_345], %751 {strides = array<i32>} : memref<4x16x32xf32, #tpu.memory_space<vmem>>, vector<1x16x32xf32>,
    %752 = vector.extract_strided_slice %0 {offsets = [2, 0, 0], sizes = [1, 16, 32], strides = [1, 1, 1]} : vector<4x16x32xf32> to vector<1x16x32xf32>
    %753 = vector.shape_cast %752 : vector<1x16x32xf32> to vector<16x32xf32>
    %754 = arith.addf %721, %753 : vector<16x32xf32>
    %c2_346 = arith.constant 2 : index
    %c0_347 = arith.constant 0 : index
    %c0_348 = arith.constant 0 : index
    %755 = vector.load %arg16[%c2_346, %c0_347, %c0_348] : memref<4x16x32xf32, #tpu.memory_space<vmem>>, vector<1x16x32xf32>
    %756 = vector.shape_cast %755 : vector<1x16x32xf32> to vector<16x32xf32>
    %757 = vector.shape_cast %754 : vector<16x32xf32> to vector<1x16x32xf32>
    tpu.vector_store %arg16[%c2_346, %c0_347, %c0_348], %757 {strides = array<i32>} : memref<4x16x32xf32, #tpu.memory_space<vmem>>, vector<1x16x32xf32>,
    %758 = vector.extract_strided_slice %0 {offsets = [3, 0, 0], sizes = [1, 16, 32], strides = [1, 1, 1]} : vector<4x16x32xf32> to vector<1x16x32xf32>
    %759 = vector.shape_cast %758 : vector<1x16x32xf32> to vector<16x32xf32>
    %760 = arith.addf %739, %759 : vector<16x32xf32>
    %c3_349 = arith.constant 3 : index
    %c0_350 = arith.constant 0 : index
    %c0_351 = arith.constant 0 : index
    %761 = vector.load %arg16[%c3_349, %c0_350, %c0_351] : memref<4x16x32xf32, #tpu.memory_space<vmem>>, vector<1x16x32xf32>
    %762 = vector.shape_cast %761 : vector<1x16x32xf32> to vector<16x32xf32>
    %763 = vector.shape_cast %760 : vector<16x32xf32> to vector<1x16x32xf32>
    tpu.vector_store %arg16[%c3_349, %c0_350, %c0_351], %763 {strides = array<i32>} : memref<4x16x32xf32, #tpu.memory_space<vmem>>, vector<1x16x32xf32>,
    return
  }
  func.func @transform_0(%arg0: i32) -> (i32, i32, i32) {
    %c0_i32 = arith.constant 0 : i32
    %c0_i32_0 = arith.constant 0 : i32
    %c0_i32_1 = arith.constant 0 : i32
    return %c0_i32, %c0_i32_0, %arg0 : i32, i32, i32
  }
  func.func @transform_1(%arg0: i32) -> (i32, i32) {
    %c0_i32 = arith.constant 0 : i32
    %c0_i32_0 = arith.constant 0 : i32
    %c0_i32_1 = arith.constant 0 : i32
    return %c0_i32, %c0_i32_0 : i32, i32
  }
  func.func @transform_2(%arg0: i32) -> (i32, i32) {
    %c0_i32 = arith.constant 0 : i32
    %c0_i32_0 = arith.constant 0 : i32
    %c0_i32_1 = arith.constant 0 : i32
    return %c0_i32, %c0_i32_0 : i32, i32
  }
  func.func @transform_3(%arg0: i32) -> (i32, i32) {
    %c0_i32 = arith.constant 0 : i32
    %c0_i32_0 = arith.constant 0 : i32
    %c0_i32_1 = arith.constant 0 : i32
    return %c0_i32, %c0_i32_0 : i32, i32
  }
  func.func @transform_4(%arg0: i32) -> (i32, i32) {
    %c0_i32 = arith.constant 0 : i32
    %c0_i32_0 = arith.constant 0 : i32
    %c0_i32_1 = arith.constant 0 : i32
    return %c0_i32, %c0_i32_0 : i32, i32
  }
  func.func @transform_5(%arg0: i32) -> (i32, i32) {
    %c0_i32 = arith.constant 0 : i32
    %c0_i32_0 = arith.constant 0 : i32
    %c0_i32_1 = arith.constant 0 : i32
    return %c0_i32, %c0_i32_0 : i32, i32
  }
  func.func @transform_6(%arg0: i32) -> i32 {
    %c0_i32 = arith.constant 0 : i32
    %c0_i32_0 = arith.constant 0 : i32
    return %c0_i32 : i32
  }
  func.func @transform_7(%arg0: i32) -> (i32, i32) {
    %c0_i32 = arith.constant 0 : i32
    %c0_i32_0 = arith.constant 0 : i32
    %c0_i32_1 = arith.constant 0 : i32
    return %c0_i32, %c0_i32_0 : i32, i32
  }
  func.func @transform_8(%arg0: i32) -> i32 {
    %c0_i32 = arith.constant 0 : i32
    %c0_i32_0 = arith.constant 0 : i32
    return %c0_i32 : i32
  }
  func.func @transform_9(%arg0: i32) -> (i32, i32) {
    %c0_i32 = arith.constant 0 : i32
    %c0_i32_0 = arith.constant 0 : i32
    %c0_i32_1 = arith.constant 0 : i32
    return %c0_i32, %c0_i32_0 : i32, i32
  }
  func.func @transform_10(%arg0: i32) -> i32 {
    %c0_i32 = arith.constant 0 : i32
    %c0_i32_0 = arith.constant 0 : i32
    return %c0_i32 : i32
  }
  func.func @transform_11(%arg0: i32) -> (i32, i32) {
    %c0_i32 = arith.constant 0 : i32
    %c0_i32_0 = arith.constant 0 : i32
    %c0_i32_1 = arith.constant 0 : i32
    return %c0_i32, %c0_i32_0 : i32, i32
  }
  func.func @transform_12(%arg0: i32) -> i32 {
    %c0_i32 = arith.constant 0 : i32
    %c0_i32_0 = arith.constant 0 : i32
    return %c0_i32 : i32
  }
  func.func @transform_13(%arg0: i32) -> (i32, i32) {
    %c0_i32 = arith.constant 0 : i32
    %c0_i32_0 = arith.constant 0 : i32
    %c0_i32_1 = arith.constant 0 : i32
    return %c0_i32, %c0_i32_0 : i32, i32
  }
  func.func @transform_14(%arg0: i32) -> i32 {
    %c0_i32 = arith.constant 0 : i32
    %c0_i32_0 = arith.constant 0 : i32
    return %c0_i32 : i32
  }
  func.func @transform_15(%arg0: i32) -> (i32, i32, i32) {
    %c0_i32 = arith.constant 0 : i32
    %c0_i32_0 = arith.constant 0 : i32
    %c0_i32_1 = arith.constant 0 : i32
    return %c0_i32, %c0_i32_0, %arg0 : i32, i32, i32
  }
}

</mosaic_0001>

<bundles_post_ra>
// kernel: tpu_custom_call.1
= control target key start
LH: loop header
LB: loop body
LE: loop exit
PB: predicated region body
PF: predicated region fallthrough
CT: control target
= control target key end

     0   :  { %s4448_s0 = inlined_call_operand.hbm [shape: f32[4,16,32], index: 0, kind: input, shape index: {}]   ;;  %s4449_s1 = inlined_call_operand.hbm [shape: bf16[9,16], index: 1, kind: input, shape index: {}]   ;;  %s4450_s2 = inlined_call_operand.hbm [shape: bf16[9,16], index: 2, kind: input, shape index: {}]   ;;  %s4451_s3 = inlined_call_operand.hbm [shape: bf16[16,9], index: 3, kind: input, shape index: {}]   ;;  %s4452_s4 = inlined_call_operand.hbm [shape: bf16[16,9], index: 4, kind: input, shape index: {}]   ;;  %s4453_s5 = inlined_call_operand.vmem [shape: f32[4,4], index: 5, kind: input, shape index: {}]   ;;  %s4454_s6 = inlined_call_operand.hbm [shape: f32[4], index: 6, kind: input, shape index: {}]   ;;  %s4455_s7 = inlined_call_operand.vmem [shape: f32[4,12], index: 7, kind: input, shape index: {}]   ;;  %s4456_s8 = inlined_call_operand.hbm [shape: f32[4], index: 8, kind: input, shape index: {}]   ;;  %s4457_s9 = inlined_call_operand.vmem [shape: f32[4,4], index: 9, kind: input, shape index: {}]   ;;  %s4458_s10 = inlined_call_operand.hbm [shape: f32[4], index: 10, kind: input, shape index: {}]   ;;  %s4459_s11 = inlined_call_operand.vmem [shape: f32[4,12], index: 11, kind: input, shape index: {}]   ;;  %s4460_s12 = inlined_call_operand.vmem [shape: f32[4], index: 12, kind: input, shape index: {}]   ;;  %s4461_s13 = inlined_call_operand.vmem [shape: f32[4,4], index: 13, kind: input, shape index: {}]   ;;  %s4462_s14 = inlined_call_operand.vmem [shape: f32[4], index: 14, kind: input, shape index: {}]   ;;  %s4463_s15 = inlined_call_operand.hbm [shape: f32[4,16,32], index: 15, kind: output, shape index: {}]  }
   0x1   :  { %4654 = sst [smem:[#allocation165_spill]] %s4463_s15 }
   0x2   :  { %20 = vsyncpa [#allocation3], 0 }
   0x3   :  { %21 = vsyncpa [#allocation8], 0 }
   0x4   :  { %22 = vsyncpa [#allocation11], 0 }
   0x5   :  { %23 = vsyncpa [#allocation6], 0 }
   0x6   :  { %24 = vsyncpa [#allocation5], 0 }
   0x7   :  { %25 = vsyncpa [#allocation16], 0 }
   0x8   :  { %26 = vsyncpa [#allocation18], 0 }
   0x9   :  { %27 = vsyncpa [#allocation22], 0 }
   0xa   :  { %28 = vsyncpa [#allocation25], 0 }
   0xb   :  { %29 = vsyncpa [#allocation4], 0  ;;  %s2637_s18 = smov [#allocation7]  }
   0xc   :  { %s47_s19 = sshll.u32 %s2637_s18, 4  ;;  %s48_s19 = int_to_ptr.vmem [resolvable:$true] %s47_s19 }
   0xd   :  { %s2393_s20 = scalar_lea.vmem %s48_s19, 128  ;;  %p2398_p1 = scmp.lt.s32.totalorder %s48_s19, %s48_s19 }
   0xe   :  { %p2394_p0 = scmp.ne.s32.totalorder %s48_s19, %s2393_s20  ;;  %p2399_p2 = scmp.lt.s32.totalorder %s2393_s20, %s2393_s20 }
  0x10   :  { %p2400_p3 = por %p2399_p2, %p2398_p1 }
  0x12   :  { %p2401_p4 = pnand %p2400_p3, %p2394_p0 }
  0x14   :  { %2404 = shalt.err (!%p2401_p4)
}
  0x15   :  { %s2638_s21 = smov 64   ;;  %s2639_s22 = smov 4  }
  0x16   :  { %53 = dma.hbm_to_vmem [thread:$0]  %s4449_s1, 128, %s48_s19, [#allocation8], %s2638_s21, %s2638_s21, %s2639_s22  }
  0x17   :  { %s2640_s25 = smov [#allocation10]   ;;  %s114_s29 = sshll.u32 %s4455_s7, 4  ;;  %s115_s29 = int_to_ptr.vmem [resolvable:$true] %s114_s29 }
  0x18   :  { %s71_s26 = sshll.u32 %s2640_s25, 4  ;;  %s72_s26 = int_to_ptr.vmem [resolvable:$true] %s71_s26 }
  0x19   :  { %s2413_s30 = scalar_lea.vmem %s72_s26, 128  ;;  %p2418_p6 = scmp.lt.s32.totalorder %s72_s26, %s72_s26 }
  0x1a   :  { %p2414_p5 = scmp.ne.s32.totalorder %s72_s26, %s2413_s30  ;;  %p2419_p7 = scmp.lt.s32.totalorder %s2413_s30, %s2413_s30 }
  0x1c   :  { %p2420_p8 = por %p2419_p7, %p2418_p6 }
  0x1e   :  { %p2421_p9 = pnand %p2420_p8, %p2414_p5 }
  0x20   :  { %2424 = shalt.err (!%p2421_p9)
}
  0x21   :  { %77 = dma.hbm_to_vmem [thread:$0]  %s4451_s3, 128, %s72_s26, [#allocation11], %s2638_s21, %s2638_s21, %s2639_s22  }
  0x22   :  { %s2425_s17 = scalar_lea.vmem %s115_s29, 64  ;;  %p2430_p11 = scmp.lt.s32.totalorder %s115_s29, %s115_s29 }
  0x23   :  { %p2426_p10 = scmp.ne.s32.totalorder %s115_s29, %s2425_s17  ;;  %p2431_p12 = scmp.lt.s32.totalorder %s2425_s17, %s2425_s17 }
  0x25   :  { %p2432_p13 = por %p2431_p12, %p2430_p11 }
  0x27   :  { %p2433_p0 = pnand %p2432_p13, %p2426_p10 }
  0x29   :  { %2436 = shalt.err (!%p2433_p0)
}
  0x2a   :  { %s2641_s7 = smov [#allocation15]   ;;  %s2642_s18 = smov [#allocation17]  }
  0x2b   :  { %117 = dma.vmem_to_smem %s115_s29, 64, %s2641_s7, [#allocation16]  }
  0x2c   :  { %125 = dma.hbm_to_smem %s4456_s8, 16, %s2642_s18, [#allocation18]  }
  0x2d   :  { %s150_s25 = sshll.u32 %s4459_s11, 4  ;;  %s170_s27 = sshll.u32 %s4461_s13, 4  ;;  %s151_s25 = int_to_ptr.vmem [resolvable:$true] %s150_s25  ;;  %s171_s27 = int_to_ptr.vmem [resolvable:$true] %s170_s27 }
  0x2e   :  { %s2445_s28 = scalar_lea.vmem %s151_s25, 64  ;;  %p2450_p2 = scmp.lt.s32.totalorder %s151_s25, %s151_s25 }
  0x2f   :  { %p2446_p1 = scmp.ne.s32.totalorder %s151_s25, %s2445_s28  ;;  %p2451_p3 = scmp.lt.s32.totalorder %s2445_s28, %s2445_s28 }
  0x31   :  { %p2452_p4 = por %p2451_p3, %p2450_p2 }
  0x33   :  { %p2453_p5 = pnand %p2452_p4, %p2446_p1 }
  0x35   :  { %2456 = shalt.err (!%p2453_p5)
}
  0x36   :  { %s2643_s29 = smov [#allocation21]   ;;  %s2457_s8 = scalar_lea.vmem %s171_s27, 64 }
  0x37   :  { %153 = dma.vmem_to_smem %s151_s25, 64, %s2643_s29, [#allocation22]  }
  0x38   :  { %p2458_p6 = scmp.ne.s32.totalorder %s171_s27, %s2457_s8  ;;  %p2462_p7 = scmp.lt.s32.totalorder %s171_s27, %s171_s27 }
  0x39   :  { %p2463_p8 = scmp.lt.s32.totalorder %s2457_s8, %s2457_s8 }
  0x3b   :  { %p2464_p9 = por %p2463_p8, %p2462_p7 }
  0x3d   :  { %p2465_p10 = pnand %p2464_p9, %p2458_p6 }
  0x3f   :  { %2468 = shalt.err (!%p2465_p10)
}
  0x40   :  { %s2644_s11 = smov [#allocation24]   ;;  %s2645_s13 = smov [#allocation2]  }
  0x41   :  { %173 = dma.vmem_to_smem %s171_s27, 64, %s2644_s11, [#allocation25]  }
  0x42   :  { %s35_s30 = sshll.u32 %s2645_s13, 4  ;;  %s36_s30 = int_to_ptr.vmem [resolvable:$true] %s35_s30 }
  0x43   :  { %s2477_s16 = scalar_lea.vmem %s36_s30, 1024  ;;  %p2482_p12 = scmp.lt.s32.totalorder %s36_s30, %s36_s30 }
  0x44   :  { %p2478_p11 = scmp.ne.s32.totalorder %s36_s30, %s2477_s16  ;;  %p2483_p13 = scmp.lt.s32.totalorder %s2477_s16, %s2477_s16 }
  0x46   :  { %p2484_p0 = por %p2483_p13, %p2482_p12 }
  0x48   :  { %p2485_p1 = pnand %p2484_p0, %p2478_p11 }
  0x4a   :  { %2488 = shalt.err (!%p2485_p1)
}
  0x4b   :  { %s4464_s1 = smov 128   ;;  %s4465_s17 = smov 8  }
  0x4c   :  { %41 = dma.hbm_to_vmem [thread:$0]  %s4448_s0, 1024, %s36_s30, [#allocation3], %s4464_s1, %s4464_s1, %s4465_s17  }
  0x4d   :  { %s2648_s19 = smov [#allocation9]   ;;  %s2649_s23 = smov [#allocation12]  }
  0x4e   :  { %s59_s20 = sshll.u32 %s2648_s19, 4  ;;  %s83_s24 = sshll.u32 %s2649_s23, 4  ;;  %s60_s20 = int_to_ptr.vmem [resolvable:$true] %s59_s20  ;;  %s84_s24 = int_to_ptr.vmem [resolvable:$true] %s83_s24 }
  0x4f   :  { %s2497_s25 = scalar_lea.vmem %s60_s20, 128  ;;  %p2502_p3 = scmp.lt.s32.totalorder %s60_s20, %s60_s20 }
  0x50   :  { %p2498_p2 = scmp.ne.s32.totalorder %s60_s20, %s2497_s25  ;;  %p2503_p4 = scmp.lt.s32.totalorder %s2497_s25, %s2497_s25 }
  0x52   :  { %p2504_p5 = por %p2503_p4, %p2502_p3 }
  0x54   :  { %p2505_p6 = pnand %p2504_p5, %p2498_p2 }
  0x56   :  { %2508 = shalt.err (!%p2505_p6)
}
  0x57   :  { %65 = dma.hbm_to_vmem [thread:$0]  %s4450_s2, 128, %s60_s20, [#allocation8], %s2638_s21, %s2638_s21, %s2639_s22  }
  0x58   :  { %s96_s28 = sshll.u32 %s4453_s5, 4  ;;  %s2517_s29 = scalar_lea.vmem %s84_s24, 128  ;;  %s97_s28 = int_to_ptr.vmem [resolvable:$true] %s96_s28 }
  0x59   :  { %p2518_p7 = scmp.ne.s32.totalorder %s84_s24, %s2517_s29  ;;  %p2522_p8 = scmp.lt.s32.totalorder %s84_s24, %s84_s24 }
  0x5a   :  { %p2523_p9 = scmp.lt.s32.totalorder %s2517_s29, %s2517_s29 }
  0x5c   :  { %p2524_p10 = por %p2523_p9, %p2522_p8 }
  0x5e   :  { %p2525_p11 = pnand %p2524_p10, %p2518_p7 }
  0x60   :  { %2528 = shalt.err (!%p2525_p11)
}
  0x61   :  { %89 = dma.hbm_to_vmem [thread:$0]  %s4452_s4, 128, %s84_s24, [#allocation11], %s2638_s21, %s2638_s21, %s2639_s22  }
  0x62   :  { %s2529_s2 = scalar_lea.vmem %s97_s28, 64  ;;  %p2534_p13 = scmp.lt.s32.totalorder %s97_s28, %s97_s28 }
  0x63   :  { %p2530_p12 = scmp.ne.s32.totalorder %s97_s28, %s2529_s2  ;;  %p2535_p0 = scmp.lt.s32.totalorder %s2529_s2, %s2529_s2 }
  0x65   :  { %p2536_p1 = por %p2535_p0, %p2534_p13 }
  0x67   :  { %p2537_p2 = pnand %p2536_p1, %p2530_p12 }
  0x69   :  { %2540 = shalt.err (!%p2537_p2)
}
  0x6a   :  { %s2650_s5 = smov [#allocation13]   ;;  %s132_s16 = sshll.u32 %s4457_s9, 4  ;;  %s133_s16 = int_to_ptr.vmem [resolvable:$true] %s132_s16 }
  0x6b   :  { %99 = dma.vmem_to_smem %s97_s28, 64, %s2650_s5, [#allocation6]  }
  0x6c   :  { %s2651_s7 = smov [#allocation14]   ;;  %s2549_s4 = scalar_lea.vmem %s133_s16, 64 }
  0x6d   :  { %107 = dma.hbm_to_smem %s4454_s6, 16, %s2651_s7, [#allocation5]  }
  0x6e   :  { %p2550_p3 = scmp.ne.s32.totalorder %s133_s16, %s2549_s4  ;;  %p2554_p4 = scmp.lt.s32.totalorder %s133_s16, %s133_s16 }
  0x6f   :  { %p2555_p5 = scmp.lt.s32.totalorder %s2549_s4, %s2549_s4 }
  0x71   :  { %p2556_p6 = por %p2555_p5, %p2554_p4 }
  0x73   :  { %p2557_p7 = pnand %p2556_p6, %p2550_p3 }
  0x75   :  { %2560 = shalt.err (!%p2557_p7)
}
  0x76   :  { %s2652_s21 = smov [#allocation19]   ;;  %s160_s23 = sshll.u32 %s4460_s12, 4  ;;  %s161_s23 = int_to_ptr.vmem [resolvable:$true] %s160_s23 }
  0x77   :  { %135 = dma.vmem_to_smem %s133_s16, 64, %s2652_s21, [#allocation16]  }
  0x78   :  { %s2653_s9 = smov [#allocation20]   ;;  %s2569_s6 = scalar_lea.vmem %s161_s23, 16 }
  0x79   :  { %143 = dma.hbm_to_smem %s4458_s10, 16, %s2653_s9, [#allocation18]  }
  0x7a   :  { %p2570_p8 = scmp.ne.s32.totalorder %s161_s23, %s2569_s6  ;;  %p2574_p9 = scmp.lt.s32.totalorder %s161_s23, %s161_s23 }
  0x7b   :  { %p2575_p10 = scmp.lt.s32.totalorder %s2569_s6, %s2569_s6 }
  0x7d   :  { %p2576_p11 = por %p2575_p10, %p2574_p9 }
  0x7f   :  { %p2577_p12 = pnand %p2576_p11, %p2570_p8 }
  0x81   :  { %2580 = shalt.err (!%p2577_p12)
}
  0x82   :  { %s2654_s3 = smov [#allocation23]   ;;  %s180_s27 = sshll.u32 %s4462_s14, 4  ;;  %s181_s27 = int_to_ptr.vmem [resolvable:$true] %s180_s27 }
  0x83   :  { %163 = dma.vmem_to_smem %s161_s23, 16, %s2654_s3, [#allocation22]  }
  0x84   :  { %s2581_s12 = scalar_lea.vmem %s181_s27, 16  ;;  %p2586_p0 = scmp.lt.s32.totalorder %s181_s27, %s181_s27 }
  0x85   :  { %p2582_p13 = scmp.ne.s32.totalorder %s181_s27, %s2581_s12  ;;  %p2587_p1 = scmp.lt.s32.totalorder %s2581_s12, %s2581_s12 }
  0x87   :  { %p2588_p2 = por %p2587_p1, %p2586_p0 }
  0x89   :  { %p2589_p3 = pnand %p2588_p2, %p2582_p13 }
  0x8b   :  { %2592 = shalt.err (!%p2589_p3)
}
  0x8c   :  { %s2655_s10 = smov [#allocation26]  }
  0x8d   :  { %183 = dma.vmem_to_smem %s181_s27, 16, %s2655_s10, [#allocation25]  }
  0x8e   :  { %2613 = dma.done.wait [#allocation3], 1024  }
  0x8f   :  { %2614 = vsyncadd [#allocation3], 4294966272 }
  0x90   :  { %2615 = dma.done.wait [#allocation8], 256  }
  0x91   :  { %2616 = vsyncadd [#allocation8], 4294967040 }
  0x92   :  { %2617 = dma.done.wait [#allocation11], 256  }
  0x93   :  { %2618 = vsyncadd [#allocation11], 4294967040 }
  0x94   :  { %2619 = dma.done.wait [#allocation6], 64  }
  0x95   :  { %2620 = vsyncadd [#allocation6], 4294967232 }
  0x96   :  { %2621 = dma.done.wait [#allocation5], 16  }
  0x97   :  { %2622 = vsyncadd [#allocation5], 4294967280 }
  0x98   :  { %2623 = dma.done.wait [#allocation16], 64  }
  0x99   :  { %2624 = vsyncadd [#allocation16], 4294967232 }
  0x9a   :  { %2625 = dma.done.wait [#allocation18], 16  }
  0x9b   :  { %2626 = vsyncadd [#allocation18], 4294967280 }
  0x9c   :  { %2627 = dma.done.wait [#allocation16], 64  }
  0x9d   :  { %2628 = vsyncadd [#allocation16], 4294967232 }
  0x9e   :  { %2629 = dma.done.wait [#allocation18], 16  }
  0x9f   :  { %2630 = vsyncadd [#allocation18], 4294967280 }
  0xa0   :  { %2631 = dma.done.wait [#allocation22], 80  }
  0xa1   :  { %2632 = vsyncadd [#allocation22], 4294967216 }
  0xa2   :  { %2633 = dma.done.wait [#allocation25], 80  }
  0xa3   :  { %2634 = vsyncadd [#allocation25], 4294967216 }
  0xa4   :  { %229 = sfence }
  0xa5   :  { %v231_v0 = vld [vmem:[#allocation2] sm:$0xff]  ;;  %v232_v1 = vld [vmem:[#allocation2 + $0x8] sm:$0xff]  ;;  %v233_v2 = vld [vmem:[#allocation2 + $0x10] sm:$0xff]  ;;  %v4585_v3 = vmov 0.0   ;;  %vm2657_vm0 = vmmov 0   ;;  %vm256_vm1 = vcmask 130048  }
  0xa6   :  { %2254 = vmatprep.subr.bf16.mxu0 %v4585_v3  ;;  %2260 = vmatprep.subr.bf16.mxu1 %v4585_v3  ;;  %v239_v4 = vpack.c.bf16 %v232_v1, %v231_v0  ;;  %v234_v5 = vld [vmem:[#allocation2 + $0x18] sm:$0xff]  ;;  %v2373_v7 = vld [vmem:[#allocation7] sm:$0x1f]   ;;  %v236_v9 = vld [vmem:[#allocation2 + $0x28] sm:$0xff]  ;;  %s2838_s14 = sld [smem:[#allocation13]]  ;;  %vm1532_vm2 = vcmask 1043456  }
  0xa7   :  { %v240_v6 = vpack.c.bf16 %v234_v5, %v233_v2  ;;  %2256 = vmatprep.mubr.msk.bf16.mxu0 %vm2657_vm0, %v4585_v3  ;;  %2262 = vmatprep.mubr.msk.bf16.mxu1 %vm2657_vm0, %v4585_v3  ;;  %v235_v8 = vld [vmem:[#allocation2 + $0x20] sm:$0xff]  ;;  %v237_v11 = vld [vmem:[#allocation2 + $0x30] sm:$0xff]  ;;  %v238_v12 = vld [vmem:[#allocation2 + $0x38] sm:$0xff]  ;;  %s2840_s28 = sld [smem:[#allocation13 + $0x80]]  ;;  %vm1533_vm3 = vcmask 1044480   ;;  %vm555_vm4 = vcmask 1040384  }
  0xa8   :  { %2255 = vmatpush3.bf16.msra.mxu0 %v239_v4  ;;  %v241_v10 = vpack.c.bf16 %v236_v9, %v235_v8  ;;  %v242_v13 = vpack.c.bf16 %v238_v12, %v237_v11  ;;  %v2374_v14 = vld [vmem:[#allocation9] sm:$0x1f]   ;;  %s2842_s29 = sld [smem:[#allocation13 + $0x100]]  ;;  %vm558_vm9 = vcmask 1046528  }
  0xa9   :  { %2261 = vmatpush3.bf16.msra.mxu1 %v240_v6  ;;  %2266 = vmatprep.subr.bf16.mxu0 %v4585_v3  ;;  %s2844_s8 = sld [smem:[#allocation13 + $0x180]] }
  0xaa   :  { %2272 = vmatprep.subr.bf16.mxu1 %v4585_v3  ;;  %s2846_s11 = sld [smem:[#allocation13 + $0x1]] }
  0xab   :  { %2257 = vmatmul.mubr.msk.bf16.vlgmr.msra.gmra.mxu0 %vm256_vm1, %v2373_v7  ;;  %s2848_s2 = sld [smem:[#allocation13 + $0x81]] }
  0xac   :  { %2263 = vmatmul.mubr.msk.bf16.vlgmr.msra.gmra.mxu1 %vm256_vm1, %v2373_v7  ;;  %2267 = vmatpush3.bf16.msra.mxu0 %v241_v10  ;;  %4655 = sst [smem:[#allocation40_spill]] %s2838_s14  ;;  %v425_v15 = vstv %s2838_s14 }
  0xad   :  { %2273 = vmatpush3.bf16.msra.mxu1 %v242_v13  ;;  %2268 = vmatprep.mubr.msk.bf16.mxu0 %vm2657_vm0, %v4585_v3  ;;  %4656 = sst [smem:[#allocation41_spill]] %s2840_s28  ;;  %v451_v16 = vstv %s2840_s28 }
  0xae   :  { %2274 = vmatprep.mubr.msk.bf16.mxu1 %vm2657_vm0, %v4585_v3  ;;  %2278 = vmatprep.subr.bf16.mxu0 %v4585_v3  ;;  %4657 = sst [smem:[#allocation42_spill]] %s2842_s29  ;;  %v477_v17 = vstv %s2842_s29 }
  0xaf   :  { %2284 = vmatprep.subr.bf16.mxu1 %v4585_v3  ;;  %4658 = sst [smem:[#allocation43_spill]] %s2844_s8  ;;  %v503_v18 = vstv %s2844_s8 }
  0xb0   :  { %4659 = sst [smem:[#allocation44_spill]] %s2846_s11  ;;  %v429_v19 = vstv %s2846_s11 }
  0xb1   :  { %4660 = sst [smem:[#allocation45_spill]] %s2848_s2  ;;  %v455_v20 = vstv %s2848_s2 }
  0xb2   :  { %s2850_s5 = sld [smem:[#allocation13 + $0x101]] }
  0xb3   :  { %2269 = vmatmul.mubr.msk.bf16.vlgmr.msra.gmra.mxu0 %vm256_vm1, %v2373_v7  ;;  %s2852_s13 = sld [smem:[#allocation13 + $0x181]] }
  0xb4   :  { %2275 = vmatmul.mubr.msk.bf16.vlgmr.msra.gmra.mxu1 %vm256_vm1, %v2373_v7  ;;  %2279 = vmatpush3.bf16.msra.mxu0 %v239_v4  ;;  %s2854_s30 = sld [smem:[#allocation13 + $0x2]]  ;;  %v2658_v4 = vmov 65535  }
  0xb5   :  { %2285 = vmatpush3.bf16.msra.mxu1 %v240_v6  ;;  %2280 = vmatprep.mubr.msk.bf16.mxu0 %vm2657_vm0, %v4585_v3  ;;  %s2856_s16 = sld [smem:[#allocation13 + $0x82]] }
  0xb6   :  { %2286 = vmatprep.mubr.msk.bf16.mxu1 %vm2657_vm0, %v4585_v3  ;;  %2290 = vmatprep.subr.bf16.mxu0 %v4585_v3  ;;  %s2858_s7 = sld [smem:[#allocation13 + $0x102]] }
  0xb7   :  { %2296 = vmatprep.subr.bf16.mxu1 %v4585_v3  ;;  %s2860_s18 = sld [smem:[#allocation13 + $0x182]] }
  0xb8   :  { %4661 = sst [smem:[#allocation46_spill]] %s2850_s5  ;;  %v481_v21 = vstv %s2850_s5 }
  0xb9   :  { %4662 = sst [smem:[#allocation47_spill]] %s2852_s13  ;;  %v507_v22 = vstv %s2852_s13 }
  0xba   :  { %4663 = sst [smem:[#allocation48_spill]] %s2854_s30  ;;  %v435_v23 = vstv %s2854_s30 }
  0xbb   :  { %2281 = vmatmul.mubr.msk.bf16.vlgmr.msra.gmra.mxu0 %vm256_vm1, %v2374_v14  ;;  %4664 = sst [smem:[#allocation49_spill]] %s2856_s16  ;;  %v461_v24 = vstv %s2856_s16 }
  0xbc   :  { %2287 = vmatmul.mubr.msk.bf16.vlgmr.msra.gmra.mxu1 %vm256_vm1, %v2374_v14  ;;  %2291 = vmatpush3.bf16.msra.mxu0 %v241_v10  ;;  %4665 = sst [smem:[#allocation50_spill]] %s2858_s7  ;;  %v487_v25 = vstv %s2858_s7 }
  0xbd   :  { %2297 = vmatpush3.bf16.msra.mxu1 %v242_v13  ;;  %2292 = vmatprep.mubr.msk.bf16.mxu0 %vm2657_vm0, %v4585_v3  ;;  %4666 = sst [smem:[#allocation51_spill]] %s2860_s18  ;;  %v513_v26 = vstv %s2860_s18 }
  0xbe   :  { %2298 = vmatprep.mubr.msk.bf16.mxu1 %vm2657_vm0, %v4585_v3  ;;  %2308 = vmatprep.subr.bf16.mxu1 %v4585_v3  ;;  %s2862_s19 = sld [smem:[#allocation13 + $0x3]] }
  0xbf   :  { %2302 = vmatprep.subr.bf16.mxu0 %v4585_v3  ;;  %s2864_s4 = sld [smem:[#allocation13 + $0x83]] }
  0xc0   :  { %s2866_s21 = sld [smem:[#allocation14]] }
  0xc1   :  { %s2868_s22 = sld [smem:[#allocation14 + $0x1]] }
  0xc2   :  { %s2870_s20 = sld [smem:[#allocation13 + $0x103]] }
  0xc3   :  { %2293 = vmatmul.mubr.msk.bf16.vlgmr.msra.gmra.mxu0 %vm256_vm1, %v2374_v14  ;;  %s2872_s23 = sld [smem:[#allocation14 + $0x2]] }
  0xc4   :  { %2299 = vmatmul.mubr.msk.bf16.vlgmr.msra.gmra.mxu1 %vm256_vm1, %v2374_v14  ;;  %2304 = vmatprep.mubr.msk.bf16.mxu0 %vm2657_vm0, %v4585_v3  ;;  %4667 = sst [smem:[#allocation52_spill]] %s2862_s19  ;;  %v441_v27 = vstv %s2862_s19 }
  0xc5   :  { %2310 = vmatprep.mubr.msk.bf16.mxu1 %vm2657_vm0, %v4585_v3  ;;  %4668 = sst [smem:[#allocation53_spill]] %s2864_s4  ;;  %v467_v29 = vstv %s2864_s4 }
  0xc6   :  { %4669 = sst [smem:[#allocation54_spill]] %s2866_s21  ;;  %v447_v28 = vstv %s2866_s21 }
  0xc7   :  { %4670 = sst [smem:[#allocation55_spill]] %s2868_s22  ;;  %v473_v30 = vstv %s2868_s22 }
  0xc8   :  { %4671 = sst [smem:[#allocation56_spill]] %s2870_s20  ;;  %v493_v31 = vstv %s2870_s20 }
  0xc9   :  { %4672 = sst [smem:[#allocation57_spill]] %s2872_s23  ;;  %v499_v32 = vstv %s2872_s23 }
  0xca   :  { %s2874_s9 = sld [smem:[#allocation13 + $0x183]] }
  0xcb   :  { %s2876_s24 = sld [smem:[#allocation14 + $0x3]] }
  0xcc   :  { %s2878_s25 = sld [smem:[#allocation15 + $0x1]] }
  0xcd   :  { %s2880_s6 = sld [smem:[#allocation15 + $0x4]] }
  0xce   :  { %s2882_s3 = sld [smem:[#allocation15]] }
  0xcf   :  { %s2884_s26 = sld [smem:[#allocation15 + $0x3]] }
  0xd0   :  { %4673 = sst [smem:[#allocation58_spill]] %s2874_s9  ;;  %v519_v34 = vstv %s2874_s9 }
  0xd1   :  { %4674 = sst [smem:[#allocation59_spill]] %s2876_s24 }
  0xd2   :  { %4675 = sst [smem:[#allocation60_spill]] %s2878_s25 }
  0xd3   :  { %4676 = sst [smem:[#allocation61_spill]] %s2880_s6 }
  0xd4   :  { %4677 = sst [smem:[#allocation62_spill]] %s2882_s3 }
  0xd5   :  { %4678 = sst [smem:[#allocation63_spill]] %s2884_s26 }
  0xd6   :  { %s2886_s0 = sld [smem:[#allocation15 + $0x7]] }
  0xd7   :  { %s2888_s27 = sld [smem:[#allocation15 + $0x80]] }
  0xd8   :  { %s2890_s12 = sld [smem:[#allocation15 + $0x2]] }
  0xd9   :  { %s2892_s10 = sld [smem:[#allocation15 + $0x5]] }
  0xda   :  { %s2894_s1 = sld [smem:[#allocation15 + $0x81]] }
  0xdb   :  { %s2896_s17 = sld [smem:[#allocation15 + $0x82]] }
  0xdc   :  { %4679 = sst [smem:[#allocation64_spill]] %s2886_s0 }
  0xdd   :  { %4680 = sst [smem:[#allocation65_spill]] %s2888_s27 }
  0xde   :  { %4681 = sst [smem:[#allocation66_spill]] %s2890_s12  ;;  %v4634_v33 = vstv %s2890_s12 }
  0xdf   :  { %4682 = sst [smem:[#allocation67_spill]] %s2892_s10  ;;  %v3059_v42 = vmul.f32 0.0, %v4634_v33 }
  0xe0   :  { %4683 = sst [smem:[#allocation68_spill]] %s2894_s1 }
  0xe1   :  { %4684 = sst [smem:[#allocation69_spill]] %s2896_s17 }
  0xe2   :  { %s2898_s15 = sld [smem:[#allocation15 + $0x83]] }
  0xe3   :  { %s2900_s25 = sld [smem:[#allocation15 + $0x84]] }
  0xe4   :  { %s2902_s6 = sld [smem:[#allocation15 + $0x87]] }
  0xe5   :  { %s2904_s3 = sld [smem:[#allocation15 + $0x85]] }
  0xe6   :  { %s2906_s26 = sld [smem:[#allocation15 + $0x100]] }
  0xe7   :  { %s2908_s0 = sld [smem:[#allocation15 + $0x101]] }
  0xe8   :  { %4685 = sst [smem:[#allocation70_spill]] %s2898_s15 }
  0xe9   :  { %4686 = sst [smem:[#allocation71_spill]] %s2900_s25 }
  0xea   :  { %4687 = sst [smem:[#allocation72_spill]] %s2902_s6 }
  0xeb   :  { %4688 = sst [smem:[#allocation73_spill]] %s2904_s3 }
  0xec   :  { %4689 = sst [smem:[#allocation74_spill]] %s2906_s26 }
  0xed   :  { %4690 = sst [smem:[#allocation75_spill]] %s2908_s0 }
  0xee   :  { %s2910_s27 = sld [smem:[#allocation15 + $0x102]] }
  0xef   :  { %s2912_s24 = sld [smem:[#allocation15 + $0x103]] }
  0xf0   :  { %s2914_s10 = sld [smem:[#allocation15 + $0x104]] }
  0xf1   :  { %s2916_s1 = sld [smem:[#allocation15 + $0x105]] }
  0xf2   :  { %s2918_s17 = sld [smem:[#allocation15 + $0x107]] }
  0xf3   :  { %s2920_s15 = sld [smem:[#allocation15 + $0x180]] }
  0xf4   :  { %4691 = sst [smem:[#allocation76_spill]] %s2910_s27 }
  0xf5   :  { %4692 = sst [smem:[#allocation77_spill]] %s2912_s24 }
  0xf6   :  { %4693 = sst [smem:[#allocation78_spill]] %s2914_s10 }
  0xf7   :  { %4694 = sst [smem:[#allocation79_spill]] %s2916_s1 }
  0xf8   :  { %4695 = sst [smem:[#allocation80_spill]] %s2918_s17 }
  0xf9   :  { %4696 = sst [smem:[#allocation81_spill]] %s2920_s15 }
  0xfa   :  { %s2922_s25 = sld [smem:[#allocation15 + $0x181]] }
  0xfb   :  { %s2924_s6 = sld [smem:[#allocation15 + $0x182]] }
  0xfc   :  { %s2926_s3 = sld [smem:[#allocation15 + $0x183]] }
  0xfd   :  { %s2928_s26 = sld [smem:[#allocation15 + $0x184]] }
  0xfe   :  { %s2930_s0 = sld [smem:[#allocation15 + $0x185]] }
  0xff   :  { %s2932_s27 = sld [smem:[#allocation15 + $0x187]] }
 0x100   :  { %4697 = sst [smem:[#allocation82_spill]] %s2922_s25 }
 0x101   :  { %4698 = sst [smem:[#allocation83_spill]] %s2924_s6 }
 0x102   :  { %4699 = sst [smem:[#allocation84_spill]] %s2926_s3 }
 0x103   :  { %4700 = sst [smem:[#allocation85_spill]] %s2928_s26 }
 0x104   :  { %4701 = sst [smem:[#allocation86_spill]] %s2930_s0 }
 0x105   :  { %4702 = sst [smem:[#allocation87_spill]] %s2932_s27 }
 0x106   :  { %s2934_s24 = sld [smem:[#allocation19]] }
 0x107   :  { %s2936_s10 = sld [smem:[#allocation19 + $0x80]] }
 0x108   :  { %s2938_s1 = sld [smem:[#allocation19 + $0x100]] }
 0x109   :  { %s2940_s17 = sld [smem:[#allocation19 + $0x180]] }
 0x10a   :  { %s2942_s15 = sld [smem:[#allocation19 + $0x1]] }
 0x10b   :  { %s2944_s25 = sld [smem:[#allocation19 + $0x81]] }
 0x10c   :  { %4703 = sst [smem:[#allocation88_spill]] %s2934_s24 }
 0x10d   :  { %4704 = sst [smem:[#allocation89_spill]] %s2936_s10 }
 0x10e   :  { %4705 = sst [smem:[#allocation90_spill]] %s2938_s1 }
 0x10f   :  { %4706 = sst [smem:[#allocation91_spill]] %s2940_s17 }
 0x110   :  { %4707 = sst [smem:[#allocation92_spill]] %s2942_s15 }
 0x111   :  { %4708 = sst [smem:[#allocation93_spill]] %s2944_s25 }
 0x112   :  { %s2946_s6 = sld [smem:[#allocation19 + $0x101]] }
 0x113   :  { %s2948_s3 = sld [smem:[#allocation19 + $0x181]] }
 0x114   :  { %s2950_s26 = sld [smem:[#allocation19 + $0x2]] }
 0x115   :  { %s2952_s0 = sld [smem:[#allocation19 + $0x82]] }
 0x116   :  { %s2954_s27 = sld [smem:[#allocation19 + $0x102]] }
 0x117   :  { %s2956_s24 = sld [smem:[#allocation19 + $0x182]] }
 0x118   :  { %4709 = sst [smem:[#allocation94_spill]] %s2946_s6 }
 0x119   :  { %4710 = sst [smem:[#allocation95_spill]] %s2948_s3 }
 0x11a   :  { %4711 = sst [smem:[#allocation96_spill]] %s2950_s26 }
 0x11b   :  { %4712 = sst [smem:[#allocation97_spill]] %s2952_s0 }
 0x11c   :  { %4713 = sst [smem:[#allocation98_spill]] %s2954_s27 }
 0x11d   :  { %4714 = sst [smem:[#allocation99_spill]] %s2956_s24 }
 0x11e   :  { %s2958_s10 = sld [smem:[#allocation19 + $0x3]] }
 0x11f   :  { %s2960_s1 = sld [smem:[#allocation20]] }
 0x120   :  { %s2962_s17 = sld [smem:[#allocation19 + $0x83]] }
 0x121   :  { %s2964_s15 = sld [smem:[#allocation20 + $0x1]] }
 0x122   :  { %s2966_s25 = sld [smem:[#allocation19 + $0x103]] }
 0x123   :  { %s2968_s6 = sld [smem:[#allocation20 + $0x2]] }
 0x124   :  { %4715 = sst [smem:[#allocation100_spill]] %s2958_s10 }
 0x125   :  { %4716 = sst [smem:[#allocation101_spill]] %s2960_s1 }
 0x126   :  { %4717 = sst [smem:[#allocation102_spill]] %s2962_s17 }
 0x127   :  { %4718 = sst [smem:[#allocation103_spill]] %s2964_s15 }
 0x128   :  { %4719 = sst [smem:[#allocation104_spill]] %s2966_s25 }
 0x129   :  { %4720 = sst [smem:[#allocation105_spill]] %s2968_s6 }
 0x12a   :  { %s2970_s3 = sld [smem:[#allocation19 + $0x183]] }
 0x12b   :  { %s2972_s26 = sld [smem:[#allocation20 + $0x3]] }
 0x12c   :  { %s2974_s0 = sld [smem:[#allocation21 + $0x1]] }
 0x12d   :  { %s2976_s27 = sld [smem:[#allocation21]] }
 0x12e   :  { %s2978_s24 = sld [smem:[#allocation21 + $0x3]] }
 0x12f   :  { %s2980_s10 = sld [smem:[#allocation21 + $0x4]] }
 0x130   :  { %s2982_s1 = sld [smem:[#allocation21 + $0x7]] }
 0x131   :  { %4721 = sst [smem:[#allocation106_spill]] %s2972_s26 }
 0x132   :  { %4722 = sst [smem:[#allocation107_spill]] %s2974_s0 }
 0x133   :  { %4723 = sst [smem:[#allocation108_spill]] %s2976_s27 }
 0x134   :  { %4724 = sst [smem:[#allocation109_spill]] %s2978_s24 }
 0x135   :  { %4725 = sst [smem:[#allocation110_spill]] %s2980_s10 }
 0x136   :  { %4726 = sst [smem:[#allocation111_spill]] %s2982_s1 }
 0x137   :  { %s2984_s17 = sld [smem:[#allocation21 + $0x2]] }
 0x138   :  { %s2986_s25 = sld [smem:[#allocation21 + $0x80]] }
 0x139   :  { %s2988_s6 = sld [smem:[#allocation21 + $0x5]] }
 0x13a   :  { %s2990_s26 = sld [smem:[#allocation21 + $0x81]] }
 0x13b   :  { %s2992_s0 = sld [smem:[#allocation21 + $0x82]] }
 0x13c   :  { %s2994_s27 = sld [smem:[#allocation21 + $0x83]] }
 0x13d   :  { %4727 = sst [smem:[#allocation112_spill]] %s2984_s17 }
 0x13e   :  { %4728 = sst [smem:[#allocation113_spill]] %s2986_s25 }
 0x13f   :  { %4729 = sst [smem:[#allocation114_spill]] %s2988_s6 }
 0x140   :  { %4730 = sst [smem:[#allocation115_spill]] %s2990_s26 }
 0x141   :  { %4731 = sst [smem:[#allocation116_spill]] %s2992_s0 }
 0x142   :  { %4732 = sst [smem:[#allocation117_spill]] %s2994_s27 }
 0x143   :  { %s2996_s10 = sld [smem:[#allocation21 + $0x84]] }
 0x144   :  { %s2998_s1 = sld [smem:[#allocation21 + $0x85]] }
 0x145   :  { %s3000_s24 = sld [smem:[#allocation21 + $0x87]] }
 0x146   :  { %s3002_s25 = sld [smem:[#allocation21 + $0x100]] }
 0x147   :  { %s3004_s6 = sld [smem:[#allocation21 + $0x101]] }
 0x148   :  { %s3006_s26 = sld [smem:[#allocation21 + $0x102]] }
 0x149   :  { %4733 = sst [smem:[#allocation118_spill]] %s2996_s10 }
 0x14a   :  { %4734 = sst [smem:[#allocation119_spill]] %s2998_s1 }
 0x14b   :  { %4735 = sst [smem:[#allocation120_spill]] %s3000_s24 }
 0x14c   :  { %4736 = sst [smem:[#allocation121_spill]] %s3002_s25 }
 0x14d   :  { %4737 = sst [smem:[#allocation122_spill]] %s3004_s6 }
 0x14e   :  { %4738 = sst [smem:[#allocation123_spill]] %s3006_s26 }
 0x14f   :  { %s3008_s0 = sld [smem:[#allocation21 + $0x103]] }
 0x150   :  { %s3010_s27 = sld [smem:[#allocation21 + $0x104]] }
 0x151   :  { %s3012_s10 = sld [smem:[#allocation21 + $0x105]] }
 0x152   :  { %s3014_s1 = sld [smem:[#allocation21 + $0x107]] }
 0x153   :  { %s3019_s6 = sld [smem:[#allocation21 + $0x180]] }
 0x154   :  { %s4746_s28 = sld [smem:[#allocation69_spill]] }
 0x155   :  { %4739 = sst [smem:[#allocation124_spill]] %s3008_s0 }
 0x156   :  { %4740 = sst [smem:[#allocation125_spill]] %s3010_s27 }
 0x157   :  { %4741 = sst [smem:[#allocation126_spill]] %s3012_s10  ;;  %v4609_v9 = vstv %s3012_s10 }
 0x158   :  { %4742 = sst [smem:[#allocation127_spill]] %s3014_s1 }
 0x159   :  { %4743 = sst [smem:[#allocation128_spill]] %s3019_s6 }
 0x15a   :  { %s3025_s27 = sld [smem:[#allocation21 + $0x181]]  ;;  %v4633_v37 = vstv %s4746_s28 }
 0x15b   :  { %s4744_s1 = sld [smem:[#allocation59_spill]]  ;;  %v3072_v47 = vmul.f32 0.0, %v4633_v37 }
 0x15c   :  { %s3031_s29 = sld [smem:[#allocation21 + $0x182]] }
 0x15d   :  { %s3037_s5 = sld [smem:[#allocation21 + $0x183]] }
 0x15e   :  { %s4753_s13 = sld [smem:[#allocation67_spill]] }
 0x15f   :  { %s3043_s7 = sld [smem:[#allocation21 + $0x184]] }
 0x160   :  { %s4757_s19 = sld [smem:[#allocation73_spill]] }
 0x161   :  { %v525_v35 = vstv %s4744_s1  ;;  %s4758_s21 = sld [smem:[#allocation76_spill]] }
 0x162   :  { %4747 = sst [smem:[#allocation129_spill]] %s3031_s29  ;;  %v4612_v8 = vstv %s3031_s29 }
 0x163   :  { %4752 = sst [smem:[#allocation130_spill]] %s3037_s5 }
 0x164   :  { %s3049_s4 = sld [smem:[#allocation21 + $0x185]]  ;;  %v4590_v43 = vstv %s4753_s13 }
 0x165   :  { %4756 = sst [smem:[#allocation131_spill]] %s3043_s7  ;;  %v3068_v46 = vmul.f32 0.0, %v4590_v43 }
 0x166   :  { %s3055_s20 = sld [smem:[#allocation21 + $0x187]]  ;;  %v4588_v48 = vstv %s4757_s19 }
 0x167   :  { %s4766_s14 = sld [smem:[#allocation79_spill]]  ;;  %v4632_v49 = vstv %s4758_s21  ;;  %v3082_v52 = vmul.f32 0.0, %v4588_v48  ;;  %v4593_v48 = vstv %s2984_s17 }
 0x168   :  { %s4767_s7 = sld [smem:[#allocation83_spill]]  ;;  %v3095_v58 = vmul.f32 0.0, %v4632_v49  ;;  %v3167_v43 = vmul.f32 0.0, %v4593_v48  ;;  %v4605_v48 = vstv %s3006_s26 }
 0x169   :  { %s3076_s11 = sld [smem:[#allocation15 + $0x8]]  ;;  %v3203_v7 = vmul.f32 0.0, %v4605_v48  ;;  %v3220_v48 = vmul.f32 0.0, %v4612_v8 }
 0x16a   :  { %4759 = sst [smem:[#allocation132_spill]] %s3049_s4 }
 0x16b   :  { %s3064_s4 = sld [smem:[#allocation15 + $0x6]]  ;;  %v294_v62 = vpop.f32.mrf.mxu0 }
 0x16c   :  { %4763 = sst [smem:[#allocation133_spill]] %s3055_s20  ;;  %v452_v49 = vmul.f32 %v451_v16, %v294_v62  ;;  %v478_v55 = vmul.f32 %v477_v17, %v294_v62  ;;  %v504_v54 = vmul.f32 %v503_v18, %v294_v62 }
 0x16d   :  { %s4775_s13 = sld [smem:[#allocation86_spill]]  ;;  %v4587_v56 = vstv %s4766_s14 }
 0x16e   :  { %s3085_s28 = sld [smem:[#allocation15 + $0x9]]  ;;  %v4615_v57 = vstv %s4767_s7  ;;  %v3101_v61 = vmul.f32 0.0, %v4587_v56 }
 0x16f   :  { %4771 = sst [smem:[#allocation135_spill]] %s3076_s11  ;;  %v3113_v2 = vmul.f32 0.0, %v4615_v57 }
 0x170   :  { %s3091_s11 = sld [smem:[#allocation15 + $0xa]] }
 0x171   :  { %4768 = sst [smem:[#allocation134_spill]] %s3064_s4 }
 0x172   :  { %s3103_s9 = sld [smem:[#allocation15 + $0xb]] }
 0x173   :  { %v4584_v1 = vstv %s4775_s13  ;;  %s3121_s8 = sld [smem:[#allocation15 + $0x88]] }
 0x174   :  { %4776 = sst [smem:[#allocation136_spill]] %s3085_s28  ;;  %v3119_v6 = vmul.f32 0.0, %v4584_v1 }
 0x175   :  { %s4795_s30 = sld [smem:[#allocation99_spill]] }
 0x176   :  { %4779 = sst [smem:[#allocation137_spill]] %s3091_s11 }
 0x177   :  { %s3109_s11 = sld [smem:[#allocation15 + $0x86]] }
 0x178   :  { %4784 = sst [smem:[#allocation138_spill]] %s3103_s9 }
 0x179   :  { %4794 = sst [smem:[#allocation140_spill]] %s3121_s8 }
 0x17a   :  { %s4800_s6 = sld [smem:[#allocation104_spill]] }
 0x17b   :  { %s3133_s4 = sld [smem:[#allocation15 + $0x8a]] }
 0x17c   :  { %s4805_s18 = sld [smem:[#allocation116_spill]] }
 0x17d   :  { %4789 = sst [smem:[#allocation139_spill]] %s3109_s11 }
 0x17e   :  { %s3127_s11 = sld [smem:[#allocation15 + $0x89]] }
 0x17f   :  { %s3139_s23 = sld [smem:[#allocation15 + $0x8b]] }
 0x180   :  { %s4809_s20 = sld [smem:[#allocation114_spill]] }
 0x181   :  { %4802 = sst [smem:[#allocation104_spill]] %s3133_s4 }
 0x182   :  { %s3145_s21 = sld [smem:[#allocation17]]  ;;  %v4597_v14 = vstv %s4805_s18 }
 0x183   :  { %s3151_s9 = sld [smem:[#allocation15 + $0x106]]  ;;  %v3180_v3 = vmul.f32 0.0, %v4597_v14  ;;  %v335_v14 = vpop.f32.mrf.mxu1 }
 0x184   :  { %4799 = sst [smem:[#allocation99_spill]] %s3127_s11  ;;  %v430_v51 = vmul.f32 %v429_v19, %v335_v14  ;;  %v456_v63 = vmul.f32 %v455_v20, %v335_v14  ;;  %v482_v59 = vmul.f32 %v481_v21, %v335_v14  ;;  %v508_v53 = vmul.f32 %v507_v22, %v335_v14 }
 0x185   :  { %s4815_s16 = sld [smem:[#allocation119_spill]]  ;;  %v2264_v50 = vpop.f32.mrf.mxu1 }
 0x186   :  { %s3157_s5 = sld [smem:[#allocation15 + $0x108]]  ;;  %v4595_v12 = vstv %s4809_s20  ;;  %v458_v41 = vadd.f32 %v456_v63, %v452_v49  ;;  %v484_v40 = vadd.f32 %v482_v59, %v478_v55  ;;  %v510_v39 = vadd.f32 %v508_v53, %v504_v54 }
 0x187   :  { %s3163_s13 = sld [smem:[#allocation15 + $0x109]]  ;;  %v3171_v13 = vmul.f32 0.0, %v4595_v12  ;;  %v3209_v12 = vmul.f32 0.0, %v4609_v9  ;;  %v1534_v9 = vsel %vm1532_vm2, 4294967295, %v2658_v4  ;;  %v4624_v4 = vstv %s3121_s8  ;;  %v338_v37 = vpop.f32.mrf.mxu1 }
 0x188   :  { %4810 = sst [smem:[#allocation141_spill]] %s3145_s21  ;;  %v3261_v5 = vmul.f32 0.0, %v4624_v4  ;;  %v431_v49 = vmul.f32 %v429_v19, %v338_v37  ;;  %v483_v53 = vmul.f32 %v481_v21, %v338_v37  ;;  %v509_v54 = vmul.f32 %v507_v22, %v338_v37 }
 0x189   :  { %4813 = sst [smem:[#allocation142_spill]] %s3151_s9 }
 0x18a   :  { %s3175_s11 = sld [smem:[#allocation15 + $0x10a]]  ;;  %4844 = vst [vmem:[#allocation151_spill] sm:$0xff] %v3261_v5 }
 0x18b   :  { %v4600_v11 = vstv %s4815_s16  ;;  %s3184_s20 = sld [smem:[#allocation15 + $0x10b]] }
 0x18c   :  { %s4823_s17 = sld [smem:[#allocation128_spill]]  ;;  %v3190_v1 = vmul.f32 0.0, %v4600_v11  ;;  %v4631_v0 = vstv %s3157_s5 }
 0x18d   :  { %4818 = sst [smem:[#allocation143_spill]] %s3163_s13  ;;  %v3278_v60 = vmul.f32 0.0, %v4631_v0  ;;  %v426_v0 = vmul.f32 %v425_v15, %v294_v62 }
 0x18e   :  { %s3193_s14 = sld [smem:[#allocation15 + $0x186]] }
 0x18f   :  { %s4825_s18 = sld [smem:[#allocation130_spill]]  ;;  %4851 = vst [vmem:[#allocation153_spill] sm:$0xff] %v3278_v60  ;;  %v432_v44 = vadd.f32 %v430_v51, %v426_v0  ;;  %v457_v51 = vmul.f32 %v455_v20, %v338_v37 }
 0x190   :  { %s4826_s2 = sld [smem:[#allocation132_spill]] }
 0x191   :  { %4821 = sst [smem:[#allocation144_spill]] %s3184_s20  ;;  %v4637_v4 = vstv %s3184_s20 }
 0x192   :  { %s4827_s12 = sld [smem:[#allocation131_spill]]  ;;  %v3309_v62 = vmul.f32 0.0, %v4637_v4 }
 0x193   :  { %s3199_s22 = sld [smem:[#allocation15 + $0x189]] }
 0x194   :  { %4824 = sst [smem:[#allocation128_spill]] %s3193_s14  ;;  %4856 = vst [vmem:[#allocation154_spill] sm:$0xff] %v3309_v62 }
 0x195   :  { %s4831_s25 = sld [smem:[#allocation135_spill]] }
 0x196   :  { %s3211_s15 = sld [smem:[#allocation21 + $0xa]]  ;;  %v4614_v10 = vstv %s4826_s2 }
 0x197   :  { %s4833_s19 = sld [smem:[#allocation138_spill]]  ;;  %v3229_v56 = vmul.f32 0.0, %v4614_v10 }
 0x198   :  { %s3215_s7 = sld [smem:[#allocation15 + $0x18a]] }
 0x199   :  { %4828 = sst [smem:[#allocation130_spill]] %s3199_s22  ;;  %4838 = vst [vmem:[#allocation146_spill] sm:$0xff] %v3229_v56 }
 0x19a   :  { %s3224_s10 = sld [smem:[#allocation21 + $0x6]] }
 0x19b   :  { %s3233_s29 = sld [smem:[#allocation17 + $0x1]]  ;;  %v4616_v8 = vstv %s4831_s25 }
 0x19c   :  { %4832 = sst [smem:[#allocation131_spill]] %s3211_s15  ;;  %v3242_v10 = vmul.f32 0.0, %v4616_v8  ;;  %v3257_v8 = vsel %vm1533_vm3, %v1534_v9, 0 }
 0x19d   :  { %v4617_v11 = vstv %s4833_s19  ;;  %s3238_s2 = sld [smem:[#allocation21 + $0x9]]  ;;  %4843 = vst [vmem:[#allocation150_spill] sm:$0xff] %v3257_v8 }
 0x19e   :  { %4834 = sst [smem:[#allocation145_spill]] %s3215_s7  ;;  %4841 = vst [vmem:[#allocation148_spill] sm:$0xff] %v3242_v10  ;;  %v3248_v57 = vmul.f32 0.0, %v4617_v11  ;;  %v4630_v11 = vstv %s3139_s23 }
 0x19f   :  { %s3250_s24 = sld [smem:[#allocation15 + $0x188]]  ;;  %v3274_v9 = vmul.f32 0.0, %v4630_v11  ;;  %v2258_v11 = vpop.f32.mrf.mxu0 }
 0x1a0   :  { %4842 = vst [vmem:[#allocation149_spill] sm:$0xff] %v3248_v57  ;;  %s3264_s19 = sld [smem:[#allocation15 + $0x18b]] }
 0x1a1   :  { %s3270_s4 = sld [smem:[#allocation21 + $0x8]]  ;;  %4849 = vst [vmem:[#allocation152_spill] sm:$0xff] %v3274_v9  ;;  %v297_v14 = vpop.f32.mrf.mxu0 }
 0x1a2   :  { %s3281_s9 = sld [smem:[#allocation21 + $0xb]]  ;;  %v427_v50 = vmul.f32 %v425_v15, %v297_v14  ;;  %v453_v11 = vmul.f32 %v451_v16, %v297_v14  ;;  %v479_v4 = vmul.f32 %v477_v17, %v297_v14  ;;  %v505_v45 = vmul.f32 %v503_v18, %v297_v14  ;;  %v2265_v16 = vpop.f32.mrf.mxu1 }
 0x1a3   :  { %4840 = sst [smem:[#allocation147_spill]] %s3238_s2  ;;  %v2259_v15 = vpop.f32.mrf.mxu0 }
 0x1a4   :  { %s3284_s13 = sld [smem:[#allocation17 + $0x2]]  ;;  %v433_v19 = vadd.f32 %v431_v49, %v427_v50  ;;  %v459_v63 = vadd.f32 %v457_v51, %v453_v11  ;;  %v485_v0 = vadd.f32 %v483_v53, %v479_v4  ;;  %v511_v20 = vadd.f32 %v509_v54, %v505_v45  ;;  %v417_v15 = vpop.f32.mrf.mxu1 }
 0x1a5   :  { %v4651_v33 = vstv %s3250_s24  ;;  %s3313_s7 = sld [smem:[#allocation23]]  ;;  %v376_v14 = vpop.f32.mrf.mxu0  ;;  %v442_v16 = vmul.f32 %v441_v27, %v417_v15  ;;  %v468_v50 = vmul.f32 %v467_v29, %v417_v15  ;;  %v494_v45 = vmul.f32 %v493_v31, %v417_v15 }
 0x1a6   :  { %v4652_v59 = vstv %s3264_s19  ;;  %v436_v21 = vmul.f32 %v435_v23, %v376_v14  ;;  %v462_v36 = vmul.f32 %v461_v24, %v376_v14  ;;  %v488_v22 = vmul.f32 %v487_v25, %v376_v14  ;;  %s3351_s8 = sld [smem:[#allocation21 + $0x86]] }
 0x1a7   :  { %v4650_v18 = vstv %s3270_s4  ;;  %v514_v37 = vmul.f32 %v513_v26, %v376_v14  ;;  %v520_v4 = vmul.f32 %v519_v34, %v417_v15  ;;  %v2270_v11 = vpop.f32.mrf.mxu0  ;;  %v2276_v14 = vpop.f32.mrf.mxu1  ;;  %s3366_s20 = sld [smem:[#allocation21 + $0x8a]] }
 0x1a8   :  { %v4649_v55 = vstv %s3281_s9  ;;  %v438_v49 = vadd.f32 %v436_v21, %v432_v44  ;;  %v464_v51 = vadd.f32 %v462_v36, %v458_v41  ;;  %v490_v53 = vadd.f32 %v488_v22, %v484_v40  ;;  %s4873_s15 = sld [smem:[#allocation62_spill]] }
 0x1a9   :  { %v516_v54 = vadd.f32 %v514_v37, %v510_v39  ;;  %v379_v17 = vpop.f32.mrf.mxu0  ;;  %v3355_v38 = vmul.f32 0.0, %v4650_v18  ;;  %v3359_v15 = vmul.f32 0.0, %v4649_v55  ;;  %v3364_v39 = vmul.f32 0.0, %v4651_v33  ;;  %v420_v22 = vpop.f32.mrf.mxu1  ;;  %s4874_s14 = sld [smem:[#allocation60_spill]] }
 0x1aa   :  { %4855 = sst [smem:[#allocation40_spill]] %s3284_s13  ;;  %v444_v40 = vadd.f32 %v442_v16, %v438_v49  ;;  %v470_v41 = vadd.f32 %v468_v50, %v464_v51  ;;  %v496_v44 = vadd.f32 %v494_v45, %v490_v53  ;;  %v437_v37 = vmul.f32 %v435_v23, %v379_v17 }
 0x1ab   :  { %4866 = vst [vmem:[#allocation155_spill] sm:$0xff] %v3355_v38  ;;  %4868 = vst [vmem:[#allocation156_spill] sm:$0xff] %v3359_v15  ;;  %v522_v21 = vadd.f32 %v520_v4, %v516_v54  ;;  %v463_v11 = vmul.f32 %v461_v24, %v379_v17  ;;  %v489_v14 = vmul.f32 %v487_v25, %v379_v17  ;;  %v2271_v36 = vpop.f32.mrf.mxu0  ;;  %v2277_v45 = vpop.f32.mrf.mxu1  ;;  %s4877_s2 = sld [smem:[#allocation63_spill]] }
 0x1ac   :  { %4871 = vst [vmem:[#allocation157_spill] sm:$0xff] %v3364_v39  ;;  %v515_v55 = vmul.f32 %v513_v26, %v379_v17  ;;  %v448_v18 = vadd.f32 %v447_v28, %v444_v40  ;;  %v474_v33 = vadd.f32 %v473_v30, %v470_v41  ;;  %v500_v16 = vadd.f32 %v499_v32, %v496_v44  ;;  %s4879_s22 = sld [smem:[#allocation61_spill]] }
 0x1ad   :  { %v526_v50 = vadd.f32 %v525_v35, %v522_v21  ;;  %v439_v4 = vadd.f32 %v437_v37, %v433_v19  ;;  %v465_v49 = vadd.f32 %v463_v11, %v459_v63  ;;  %v491_v51 = vadd.f32 %v489_v14, %v485_v0  ;;  %v3384_v24 = vpop.f32.mrf.mxu0  ;;  %v3386_v17 = vpop.f32.mrf.mxu1  ;;  %s4880_s28 = sld [smem:[#allocation64_spill]] }
 0x1ae   :  { %v517_v23 = vadd.f32 %v515_v55, %v511_v20  ;;  %vm528_vm5 = vcmp.gt.f32.partialorder %v448_v18, 0.0  ;;  %v530_v25 = vmul.f32 0.1, %v448_v18  ;;  %vm534_vm6 = vcmp.gt.f32.partialorder %v474_v33, 0.0  ;;  %s4882_s1 = sld [smem:[#allocation65_spill]] }
 0x1af   :  { %v536_v26 = vmul.f32 0.1, %v474_v33  ;;  %vm540_vm7 = vcmp.gt.f32.partialorder %v500_v16, 0.0  ;;  %v542_v53 = vmul.f32 0.1, %v500_v16  ;;  %vm546_vm8 = vcmp.gt.f32.partialorder %v526_v50, 0.0  ;;  %v2282_v19 = vpop.f32.mrf.mxu0  ;;  %v2288_v0 = vpop.f32.mrf.mxu1 }
 0x1b0   :  { %v548_v54 = vmul.f32 0.1, %v526_v50  ;;  %v3388_v63 = vsel %vm528_vm5, %v448_v18, %v530_v25  ;;  %v3394_v20 = vmul.f32 0.0, %v4652_v59  ;;  %v443_v44 = vmul.f32 %v441_v27, %v420_v22  ;;  %s4883_s13 = sld [smem:[#allocation66_spill]] }
 0x1b1   :  { %v3390_v55 = vsel %vm534_vm6, %v474_v33, %v536_v26  ;;  %v3397_v40 = vsel %vm540_vm7, %v500_v16, %v542_v53  ;;  %v3400_v41 = vrot.slane %v3388_v63, 7  ;;  %v469_v21 = vmul.f32 %v467_v29, %v420_v22  ;;  %v3406_v18 = vpop.f32.mrf.mxu0  ;;  %v3414_v14 = vpop.f32.mrf.mxu1  ;;  %s4885_s21 = sld [smem:[#allocation68_spill]] }
 0x1b2   :  { %4872 = vst [vmem:[#allocation158_spill] sm:$0xff] %v3394_v20  ;;  %v3408_v33 = vsel %vm546_vm8, %v526_v50, %v548_v54  ;;  %v559_v37 = vrot.slane %v3388_v63, 1  ;;  %v3412_v11 = vrot.slane %v3390_v55, 7  ;;  %v568_v27 = vrot.slane %v3390_v55, 1  ;;  %s4888_s26 = sld [smem:[#allocation69_spill]] }
 0x1b3   :  { %v3419_v29 = vrot.slane %v3397_v40, 7  ;;  %v445_v45 = vadd.f32 %v443_v44, %v439_v4  ;;  %v471_v50 = vadd.f32 %v469_v21, %v465_v49  ;;  %v2283_v25 = vpop.f32.mrf.mxu0  ;;  %v577_v26 = vrot.slane %v3397_v40, 1  ;;  %v2289_v0 = vpop.f32.mrf.mxu1  ;;  %s4892_s16 = sld [smem:[#allocation70_spill]] }
 0x1b4   :  { %v495_v53 = vmul.f32 %v493_v31, %v420_v22  ;;  %v521_v54 = vmul.f32 %v519_v34, %v420_v22  ;;  %v3428_v19 = vsel %vm555_vm4, 0.0, %v3400_v41  ;;  %v3431_v16 = vrot.slane %v3408_v33, 7  ;;  %s4896_s25 = sld [smem:[#allocation71_spill]] }
 0x1b5   :  { %v449_v4 = vadd.f32 %v447_v28, %v445_v45  ;;  %v475_v49 = vadd.f32 %v473_v30, %v471_v50  ;;  %v4875_v44 = vstv %s4873_s15  ;;  %v3440_v21 = vpop.f32.mrf.mxu0  ;;  %v3444_v25 = vsel %vm555_vm4, 0.0, %v3412_v11  ;;  %v3449_v28 = vpop.f32.mrf.mxu1  ;;  %s4899_s0 = sld [smem:[#allocation74_spill]] }
 0x1b6   :  { %v592_v31 = vmul.f32 %v4875_v44, %v3428_v19  ;;  %v497_v34 = vadd.f32 %v495_v53, %v491_v51  ;;  %v523_v22 = vadd.f32 %v521_v54, %v517_v23  ;;  %v4876_v0 = vstv %s4874_s14  ;;  %s4901_s15 = sld [smem:[#allocation75_spill]] }
 0x1b7   :  { %v596_v36 = vmul.f32 %v4876_v0, %v3388_v63  ;;  %vm529_vm10 = vcmp.gt.f32.partialorder %v449_v4, 0.0  ;;  %v531_v30 = vmul.f32 0.1, %v449_v4  ;;  %vm535_vm11 = vcmp.gt.f32.partialorder %v475_v49, 0.0  ;;  %v2294_v50 = vpop.f32.mrf.mxu0  ;;  %v2300_v59 = vpop.f32.mrf.mxu1 }
 0x1b8   :  { %v537_v45 = vmul.f32 0.1, %v475_v49  ;;  %v501_v51 = vadd.f32 %v499_v32, %v497_v34  ;;  %v527_v23 = vadd.f32 %v525_v35, %v523_v22  ;;  %v4878_v53 = vmov %v4875_v44 }
 0x1b9   :  { %v593_v54 = vmul.f32 %v4878_v53, %v3400_v41  ;;  %v3459_v0 = vsel %vm529_vm10, %v449_v4, %v531_v30  ;;  %v598_v20 = vadd.f32 %v596_v36, %v592_v31  ;;  %v4881_v50 = vstv %s4877_s2  ;;  %v3466_v32 = vpop.f32.mrf.mxu0  ;;  %v3468_v22 = vpop.f32.mrf.mxu1  ;;  %s4906_s2 = sld [smem:[#allocation72_spill]] }
 0x1ba   :  { %v3461_v56 = vsel %vm535_vm11, %v475_v49, %v537_v45  ;;  %v608_v44 = vmul.f32 %v4881_v50, %v3444_v25  ;;  %vm541_vm12 = vcmp.gt.f32.partialorder %v501_v51, 0.0  ;;  %v543_v35 = vmul.f32 0.1, %v501_v51 }
 0x1bb   :  { %vm547_vm13 = vcmp.gt.f32.partialorder %v527_v23, 0.0  ;;  %v549_v34 = vmul.f32 0.1, %v527_v23  ;;  %v560_v59 = vrot.slane %v3459_v0, 1  ;;  %v569_v4 = vrot.slane %v3461_v56, 1  ;;  %v2295_v45 = vpop.f32.mrf.mxu0 }
 0x1bc   :  { %v4884_v36 = vstv %s4874_s14  ;;  %v4886_v31 = vmov %v4881_v50  ;;  %v3478_v53 = vsel %vm541_vm12, %v501_v51, %v543_v35  ;;  %v4887_v50 = vstv %s4879_s22  ;;  %s4905_s14 = sld [smem:[#allocation76_spill]] }
 0x1bd   :  { %v597_v49 = vmul.f32 %v4884_v36, %v3459_v0  ;;  %v609_v30 = vmul.f32 %v4886_v31, %v3412_v11  ;;  %v614_v39 = vmul.f32 %v4887_v50, %v3390_v55  ;;  %v4889_v15 = vstv %s4880_s28  ;;  %v2301_v36 = vpop.f32.mrf.mxu1 }
 0x1be   :  { %v3486_v38 = vmul.f32 %v4889_v15, %v3397_v40  ;;  %v4891_v62 = vstv %s4882_s1  ;;  %v3491_v9 = vsel %vm547_vm13, %v527_v23, %v549_v34  ;;  %v561_v31 = vsel %vm558_vm9, %v559_v37, %v560_v59 }
 0x1bf   :  { %v666_v8 = vmul.f32 %v4891_v62, %v3428_v19  ;;  %v3495_v51 = vsel %vm558_vm9, %v568_v27, %v569_v4  ;;  %v578_v35 = vrot.slane %v3478_v53, 1  ;;  %v599_v45 = vadd.f32 %v597_v49, %v593_v54 }
 0x1c0   :  { %4890 = vst [vmem:[#allocation159_spill] sm:$0xff] %v3486_v38  ;;  %v4893_v50 = vstv %s4883_s13  ;;  %v4894_v60 = vstv %s4879_s22  ;;  %v4895_v62 = vstv %s4885_s21  ;;  %v4897_v37 = vstv %s4882_s1  ;;  %s4911_s22 = sld [smem:[#allocation77_spill]] }
 0x1c1   :  { %v602_v15 = vmul.f32 %v4893_v50, %v561_v31  ;;  %v615_v57 = vmul.f32 %v4894_v60, %v3461_v56  ;;  %v670_v23 = vmul.f32 %v4895_v62, %v3388_v63  ;;  %v3507_v34 = vsel %vm558_vm9, %v577_v26, %v578_v35  ;;  %s4914_s1 = sld [smem:[#allocation81_spill]] }
 0x1c2   :  { %v667_v27 = vmul.f32 %v4897_v37, %v3400_v41  ;;  %v4898_v59 = vmov %v4895_v62  ;;  %v4900_v54 = vstv %s4888_s26  ;;  %v605_v50 = vadd.f32 %v3059_v42, %v599_v45  ;;  %s4917_s13 = sld [smem:[#allocation80_spill]] }
 0x1c3   :  { %v671_v4 = vmul.f32 %v4898_v59, %v3459_v0  ;;  %v676_v49 = vmul.f32 %v4900_v54, %v561_v31  ;;  %v604_v36 = vadd.f32 %v602_v15, %v598_v20  ;;  %v672_v62 = vadd.f32 %v670_v23, %v666_v8  ;;  %s4918_s21 = sld [smem:[#allocation82_spill]] }
 0x1c4   :  { %v4902_v26 = vstv %s4880_s28  ;;  %v4903_v5 = vstv %s4892_s16  ;;  %v611_v60 = vadd.f32 %v609_v30, %v605_v50  ;;  %v4907_v42 = vstv %s4896_s25  ;;  %s4913_s28 = sld [smem:[#allocation78_spill]] }
 0x1c5   :  { %v3522_v35 = vmul.f32 %v4902_v26, %v3478_v53  ;;  %v673_v37 = vadd.f32 %v671_v4, %v667_v27  ;;  %v682_v59 = vmul.f32 %v4903_v5, %v3444_v25  ;;  %v4904_v10 = vmov %v4903_v5  ;;  %s4921_s26 = sld [smem:[#allocation83_spill]] }
 0x1c6   :  { %v683_v54 = vmul.f32 %v4904_v10, %v3412_v11  ;;  %v610_v38 = vadd.f32 %v608_v44, %v604_v36  ;;  %v678_v20 = vadd.f32 %v676_v49, %v672_v62  ;;  %v688_v8 = vmul.f32 %v4907_v42, %v3390_v55  ;;  %s4926_s16 = sld [smem:[#allocation84_spill]] }
 0x1c7   :  { %v679_v45 = vadd.f32 %v3072_v47, %v673_v37  ;;  %v4908_v15 = vstv %s4899_s0  ;;  %v4910_v4 = vstv %s4901_s15  ;;  %v617_v30 = vadd.f32 %v615_v57, %v611_v60  ;;  %s4929_s25 = sld [smem:[#allocation85_spill]] }
 0x1c8   :  { %v740_v23 = vmul.f32 %v4908_v15, %v3428_v19  ;;  %v4909_v27 = vmov %v4908_v15  ;;  %v744_v10 = vmul.f32 %v4910_v4, %v3388_v63  ;;  %v3543_v44 = vadd.f32 %v614_v39, %v610_v38  ;;  %s4931_s0 = sld [smem:[#allocation88_spill]] }
 0x1c9   :  { %v741_v5 = vmul.f32 %v4909_v27, %v3400_v41  ;;  %v684_v49 = vadd.f32 %v682_v59, %v678_v20  ;;  %v4912_v36 = vmov %v4910_v4  ;;  %v685_v47 = vadd.f32 %v683_v54, %v679_v45  ;;  %s4932_s15 = sld [smem:[#allocation89_spill]] }
 0x1ca   :  { %v745_v50 = vmul.f32 %v4912_v36, %v3459_v0  ;;  %v4915_v62 = vmov %v4907_v42  ;;  %v746_v37 = vadd.f32 %v744_v10, %v740_v23  ;;  %v4916_v42 = vstv %s4905_s14  ;;  %s4936_s14 = sld [smem:[#allocation90_spill]] }
 0x1cb   :  { %v689_v26 = vmul.f32 %v4915_v62, %v3461_v56  ;;  %v750_v15 = vmul.f32 %v4916_v42, %v561_v31  ;;  %v3553_v38 = vadd.f32 %v688_v8, %v684_v49  ;;  %v4919_v57 = vstv %s4906_s2  ;;  %s4937_s2 = sld [smem:[#allocation91_spill]] }
 0x1cc   :  { %v3558_v39 = vmul.f32 %v4919_v57, %v3397_v40  ;;  %v4920_v60 = vmov %v4919_v57  ;;  %v747_v54 = vadd.f32 %v745_v50, %v741_v5  ;;  %v3566_v20 = vadd.f32 %v3068_v46, %v617_v30 }
 0x1cd   :  { %v3563_v59 = vmul.f32 %v4920_v60, %v3478_v53  ;;  %v691_v45 = vadd.f32 %v689_v26, %v685_v47  ;;  %v752_v23 = vadd.f32 %v750_v15, %v746_v37  ;;  %v4922_v8 = vstv %s4911_s22  ;;  %s4939_s22 = sld [smem:[#allocation92_spill]] }
 0x1ce   :  { %v756_v27 = vmul.f32 %v4922_v8, %v3444_v25  ;;  %v753_v4 = vadd.f32 %v3095_v58, %v747_v54  ;;  %v4923_v10 = vmov %v4922_v8  ;;  %v4924_v36 = vstv %s4913_s28  ;;  %s4940_s28 = sld [smem:[#allocation93_spill]] }
 0x1cf   :  { %v757_v49 = vmul.f32 %v4923_v10, %v3412_v11  ;;  %v762_v62 = vmul.f32 %v4924_v36, %v3390_v55  ;;  %v4925_v5 = vstv %s4914_s1  ;;  %v4927_v30 = vmov %v4924_v36  ;;  %s4941_s1 = sld [smem:[#allocation94_spill]] }
 0x1d0   :  { %v814_v50 = vmul.f32 %v4925_v5, %v3428_v19  ;;  %v758_v46 = vadd.f32 %v756_v27, %v752_v23  ;;  %v763_v47 = vmul.f32 %v4927_v30, %v3461_v56  ;;  %v4928_v26 = vstv %s4917_s13  ;;  %s4955_s13 = sld [smem:[#allocation87_spill]] }
 0x1d1   :  { %v3587_v37 = vmul.f32 %v4928_v26, %v3397_v40  ;;  %v4930_v58 = vstv %s4918_s21  ;;  %v759_v15 = vadd.f32 %v757_v49, %v753_v4  ;;  %v4933_v57 = vmov %v4925_v5  ;;  %s4943_s21 = sld [smem:[#allocation95_spill]] }
 0x1d2   :  { %v818_v42 = vmul.f32 %v4930_v58, %v3388_v63  ;;  %v815_v60 = vmul.f32 %v4933_v57, %v3400_v41  ;;  %v4934_v19 = vmov %v4930_v58  ;;  %v4935_v23 = vstv %s4921_s26  ;;  %s4957_s26 = sld [smem:[#allocation96_spill]] }
 0x1d3   :  { %v819_v54 = vmul.f32 %v4934_v19, %v3459_v0  ;;  %v824_v8 = vmul.f32 %v4935_v23, %v561_v31  ;;  %v3601_v27 = vadd.f32 %v3082_v52, %v691_v45  ;;  %v3603_v10 = vadd.f32 %v762_v62, %v758_v46 }
 0x1d4   :  { %v4938_v63 = vmov %v4928_v26  ;;  %v820_v41 = vadd.f32 %v818_v42, %v814_v50  ;;  %v3610_v49 = vadd.f32 %v763_v47, %v759_v15  ;;  %v4942_v36 = vstv %s4926_s16  ;;  %s4959_s16 = sld [smem:[#allocation97_spill]] }
 0x1d5   :  { %v3608_v4 = vmul.f32 %v4938_v63, %v3478_v53  ;;  %v821_v0 = vadd.f32 %v819_v54, %v815_v60  ;;  %v830_v31 = vmul.f32 %v4942_v36, %v3444_v25  ;;  %v4944_v52 = vmov %v4942_v36 }
 0x1d6   :  { %v831_v45 = vmul.f32 %v4944_v52, %v3412_v11  ;;  %v826_v62 = vadd.f32 %v824_v8, %v820_v41  ;;  %v4945_v5 = vstv %s4929_s25  ;;  %v4946_v30 = vstv %s4931_s0  ;;  %s4960_s25 = sld [smem:[#allocation98_spill]] }
 0x1d7   :  { %v836_v46 = vmul.f32 %v4945_v5, %v3390_v55  ;;  %v1064_v50 = vmul.f32 %v4946_v30, %v3384_v24  ;;  %v4947_v47 = vstv %s4932_s15  ;;  %v827_v58 = vadd.f32 %v3113_v2, %v821_v0  ;;  %s4965_s0 = sld [smem:[#allocation100_spill]] }
 0x1d8   :  { %v1090_v26 = vmul.f32 %v4947_v47, %v3384_v24  ;;  %v4948_v42 = vmov %v4945_v5  ;;  %v4949_v15 = vstv %s4936_s14  ;;  %v4950_v11 = vstv %s4937_s2  ;;  %s4967_s15 = sld [smem:[#allocation102_spill]] }
 0x1d9   :  { %v837_v25 = vmul.f32 %v4948_v42, %v3461_v56  ;;  %v1116_v57 = vmul.f32 %v4949_v15, %v3384_v24  ;;  %v1142_v60 = vmul.f32 %v4950_v11, %v3384_v24  ;;  %v832_v55 = vadd.f32 %v830_v31, %v826_v62  ;;  %s4977_s14 = sld [smem:[#allocation101_spill]] }
 0x1da   :  { %v4951_v19 = vstv %s4939_s22  ;;  %v4952_v23 = vstv %s4940_s28  ;;  %v4953_v8 = vstv %s4941_s1  ;;  %v833_v63 = vadd.f32 %v831_v45, %v827_v58  ;;  %s4979_s2 = sld [smem:[#allocation103_spill]] }
 0x1db   :  { %v1068_v54 = vmul.f32 %v4951_v19, %v3386_v17  ;;  %v1094_v2 = vmul.f32 %v4952_v23, %v3386_v17  ;;  %v1120_v56 = vmul.f32 %v4953_v8, %v3386_v17  ;;  %v4954_v41 = vstv %s4943_s21  ;;  %s4981_s22 = sld [smem:[#allocation105_spill]] }
 0x1dc   :  { %v1146_v24 = vmul.f32 %v4954_v41, %v3386_v17  ;;  %v4956_v0 = vmov %v4946_v30  ;;  %v4958_v31 = vmov %v4947_v47  ;;  %v3655_v62 = vadd.f32 %v836_v46, %v832_v55  ;;  %s5010_s21 = sld [smem:[#allocation110_spill]] }
 0x1dd   :  { %v1065_v36 = vmul.f32 %v4956_v0, %v3406_v18  ;;  %v1091_v52 = vmul.f32 %v4958_v31, %v3406_v18  ;;  %v1070_v5 = vadd.f32 %v1068_v54, %v1064_v50  ;;  %v1096_v30 = vadd.f32 %v1094_v2, %v1090_v26 }
 0x1de   :  { %4961 = vst [vmem:[#allocation160_spill] sm:$0xff] %v3655_v62  ;;  %v1122_v47 = vadd.f32 %v1120_v56, %v1116_v57  ;;  %v839_v42 = vadd.f32 %v837_v25, %v833_v63  ;;  %v1148_v45 = vadd.f32 %v1146_v24, %v1142_v60  ;;  %v4962_v58 = vmov %v4949_v15 }
 0x1df   :  { %v1117_v15 = vmul.f32 %v4962_v58, %v3406_v18  ;;  %v4963_v17 = vmov %v4950_v11  ;;  %v1069_v23 = vmul.f32 %v4951_v19, %v3414_v14  ;;  %v4964_v8 = vstv %s4940_s28  ;;  %s4984_s28 = sld [smem:[#allocation106_spill]] }
 0x1e0   :  { %v1143_v11 = vmul.f32 %v4963_v17, %v3406_v18  ;;  %v1095_v46 = vmul.f32 %v4964_v8, %v3414_v14  ;;  %v4966_v50 = vstv %s4941_s1  ;;  %v4968_v25 = vmov %v4954_v41  ;;  %s5000_s1 = sld [smem:[#allocation107_spill]] }
 0x1e1   :  { %v1121_v26 = vmul.f32 %v4966_v50, %v3414_v14  ;;  %v1147_v57 = vmul.f32 %v4968_v25, %v3414_v14  ;;  %v4969_v60 = vstv %s4955_s13  ;;  %v4971_v55 = vstv %s4957_s26 }
 0x1e2   :  { %v3678_v18 = vmul.f32 %v4969_v60, %v3397_v40  ;;  %v1074_v54 = vmul.f32 %v4971_v55, %v3440_v21  ;;  %v4972_v2 = vstv %s4959_s16  ;;  %v4973_v63 = vstv %s4960_s25  ;;  %s5016_s25 = sld [smem:[#allocation111_spill]] }
 0x1e3   :  { %v1100_v56 = vmul.f32 %v4972_v2, %v3440_v21  ;;  %v1126_v41 = vmul.f32 %v4973_v63, %v3440_v21  ;;  %v1071_v24 = vadd.f32 %v1069_v23, %v1065_v36  ;;  %v1097_v0 = vadd.f32 %v1095_v46, %v1091_v52 }
 0x1e4   :  { %4970 = vst [vmem:[#allocation161_spill] sm:$0xff] %v3678_v18  ;;  %v1123_v14 = vadd.f32 %v1121_v26, %v1117_v15  ;;  %v1149_v31 = vadd.f32 %v1147_v57, %v1143_v11  ;;  %v1076_v58 = vadd.f32 %v1074_v54, %v1070_v5  ;;  %v4974_v19 = vstv %s4795_s30  ;;  %s4997_s30 = sld [smem:[#allocation108_spill]] }
 0x1e5   :  { %v1102_v40 = vadd.f32 %v1100_v56, %v1096_v30  ;;  %v1128_v17 = vadd.f32 %v1126_v41, %v1122_v47  ;;  %v1152_v8 = vmul.f32 %v4974_v19, %v3440_v21  ;;  %v4975_v50 = vstv %s4965_s0 }
 0x1e6   :  { %v1080_v25 = vmul.f32 %v4975_v50, %v3449_v28  ;;  %v4976_v60 = vstv %s4967_s15  ;;  %v4978_v2 = vstv %s4800_s6  ;;  %v4980_v52 = vstv %s2970_s3 }
 0x1e7   :  { %v1106_v55 = vmul.f32 %v4976_v60, %v3449_v28  ;;  %v1132_v36 = vmul.f32 %v4978_v2, %v3449_v28  ;;  %v1158_v5 = vmul.f32 %v4980_v52, %v3449_v28  ;;  %v1154_v30 = vadd.f32 %v1152_v8, %v1148_v45 }
 0x1e8   :  { %v4982_v47 = vstv %s4957_s26  ;;  %v4983_v15 = vstv %s4959_s16  ;;  %v4985_v23 = vmov %v4973_v63  ;;  %v1082_v26 = vadd.f32 %v1080_v25, %v1076_v58  ;;  %s5012_s26 = sld [smem:[#allocation115_spill]] }
 0x1e9   :  { %v1075_v21 = vmul.f32 %v4982_v47, %v3466_v32  ;;  %v1101_v11 = vmul.f32 %v4983_v15, %v3466_v32  ;;  %v1127_v46 = vmul.f32 %v4985_v23, %v3466_v32  ;;  %v1108_v57 = vadd.f32 %v1106_v55, %v1102_v40  ;;  %s5014_s16 = sld [smem:[#allocation116_spill]] }
 0x1ea   :  { %v1134_v54 = vadd.f32 %v1132_v36, %v1128_v17  ;;  %v4986_v56 = vmov %v4974_v19  ;;  %v1160_v45 = vadd.f32 %v1158_v5, %v1154_v30  ;;  %v4987_v8 = vstv %s4977_s14  ;;  %s5025_s14 = sld [smem:[#allocation121_spill]] }
 0x1eb   :  { %v1153_v28 = vmul.f32 %v4986_v56, %v3466_v32  ;;  %v1077_v63 = vadd.f32 %v1075_v21, %v1071_v24  ;;  %v1103_v41 = vadd.f32 %v1101_v11, %v1097_v0  ;;  %v1129_v19 = vadd.f32 %v1127_v46, %v1123_v14 }
 0x1ec   :  { %v1086_v50 = vadd.f32 %v4987_v8, %v1082_v26  ;;  %v4988_v60 = vstv %s4979_s2  ;;  %v4989_v52 = vstv %s4981_s22  ;;  %v4990_v23 = vstv %s4955_s13  ;;  %s5011_s13 = sld [smem:[#allocation113_spill]] }
 0x1ed   :  { %v1112_v2 = vadd.f32 %v4988_v60, %v1108_v57  ;;  %v1138_v47 = vadd.f32 %v4989_v52, %v1134_v54  ;;  %v1155_v15 = vadd.f32 %v1153_v28, %v1149_v31  ;;  %v3725_v18 = vmul.f32 %v4990_v23, %v3478_v53  ;;  %s5028_s2 = sld [smem:[#allocation120_spill]] }
 0x1ee   :  { %v4992_v58 = vstv %s4984_s28  ;;  %v4993_v17 = vstv %s4965_s0  ;;  %v4994_v24 = vstv %s4967_s15  ;;  %vm1166_vm14 = vcmp.gt.f32.partialorder %v1086_v50, 0.0  ;;  %s5020_s0 = sld [smem:[#allocation117_spill]] }
 0x1ef   :  { %4991 = vst [vmem:[#allocation162_spill] sm:$0xff] %v3725_v18  ;;  %v1164_v40 = vadd.f32 %v4992_v58, %v1160_v45  ;;  %v1081_v32 = vmul.f32 %v4993_v17, %v3468_v22  ;;  %v1107_v0 = vmul.f32 %v4994_v24, %v3468_v22  ;;  %v1168_v14 = vmul.f32 0.1, %v1086_v50  ;;  %s5024_s15 = sld [smem:[#allocation118_spill]] }
 0x1f0   :  { %vm1172_vm15 = vcmp.gt.f32.partialorder %v1112_v2, 0.0  ;;  %v1174_v25 = vmul.f32 0.1, %v1112_v2  ;;  %vm1178_vm1 = vcmp.gt.f32.partialorder %v1138_v47, 0.0  ;;  %v1180_v55 = vmul.f32 0.1, %v1138_v47 }
 0x1f1   :  { %vm1184_vm2 = vcmp.gt.f32.partialorder %v1164_v40, 0.0  ;;  %v1186_v31 = vmul.f32 0.1, %v1164_v40  ;;  %v3735_v53 = vsel %vm1166_vm14, %v1086_v50, %v1168_v14  ;;  %v1083_v5 = vadd.f32 %v1081_v32, %v1077_v63 }
 0x1f2   :  { %v3737_v36 = vsel %vm1172_vm15, %v1112_v2, %v1174_v25  ;;  %v1109_v30 = vadd.f32 %v1107_v0, %v1103_v41  ;;  %v3741_v21 = vadd.f32 %v3101_v61, %v3610_v49  ;;  %v3744_v11 = vadd.f32 %v3119_v6, %v839_v42 }
 0x1f3   :  { %v3746_v46 = vsel %vm1178_vm1, %v1138_v47, %v1180_v55  ;;  %v3749_v26 = vrot.slane %v3735_v53, 7  ;;  %v3751_v57 = vsel %vm1184_vm2, %v1164_v40, %v1186_v31  ;;  %v1195_v54 = vrot.slane %v3735_v53, 1 }
 0x1f4   :  { %4995 = vst [vmem:[#allocation163_spill] sm:$0xff] %v3744_v11  ;;  %v3755_v56 = vrot.slane %v3737_v36, 7  ;;  %v4996_v28 = vstv %s4800_s6  ;;  %v1204_v6 = vrot.slane %v3737_v36, 1  ;;  %v3762_v49 = vrot.slane %v3746_v46, 7  ;;  %s5006_s6 = sld [smem:[#allocation112_spill]] }
 0x1f5   :  { %v1133_v61 = vmul.f32 %v4996_v28, %v3468_v22  ;;  %v4998_v42 = vmov %v4987_v8  ;;  %v4999_v63 = vmov %v4988_v60  ;;  %v1213_v8 = vrot.slane %v3746_v46, 1 }
 0x1f6   :  { %v1087_v45 = vadd.f32 %v4998_v42, %v1083_v5  ;;  %v1113_v41 = vadd.f32 %v4999_v63, %v1109_v30  ;;  %v5001_v60 = vstv %s2970_s3  ;;  %v3774_v52 = vsel %vm555_vm4, 0.0, %v3749_v26  ;;  %s5007_s3 = sld [smem:[#allocation109_spill]] }
 0x1f7   :  { %v1135_v50 = vadd.f32 %v1133_v61, %v1129_v19  ;;  %v1159_v2 = vmul.f32 %v5001_v60, %v3468_v22  ;;  %v3777_v58 = vrot.slane %v3751_v57, 7  ;;  %v5002_v40 = vstv %s4981_s22  ;;  %s5029_s22 = sld [smem:[#allocation122_spill]] }
 0x1f8   :  { %vm1167_vm3 = vcmp.gt.f32.partialorder %v1087_v45, 0.0  ;;  %v1169_v47 = vmul.f32 0.1, %v1087_v45  ;;  %vm1173_vm5 = vcmp.gt.f32.partialorder %v1113_v41, 0.0  ;;  %v1175_v23 = vmul.f32 0.1, %v1113_v41 }
 0x1f9   :  { %v1139_v17 = vadd.f32 %v5002_v40, %v1135_v50  ;;  %v1161_v32 = vadd.f32 %v1159_v2, %v1155_v15  ;;  %v5003_v19 = vstv %s4997_s30  ;;  %v3790_v14 = vsel %vm555_vm4, 0.0, %v3755_v56  ;;  %s5037_s30 = sld [smem:[#allocation124_spill]] }
 0x1fa   :  { %v1228_v24 = vmul.f32 %v5003_v19, %v3774_v52  ;;  %v3784_v22 = vsel %vm1167_vm3, %v1087_v45, %v1169_v47  ;;  %v3786_v0 = vsel %vm1173_vm5, %v1113_v41, %v1175_v23  ;;  %v5004_v25 = vstv %s5000_s1  ;;  %s5042_s1 = sld [smem:[#allocation125_spill]] }
 0x1fb   :  { %v1232_v55 = vmul.f32 %v5004_v25, %v3735_v53  ;;  %v5005_v31 = vstv %s4984_s28  ;;  %vm1179_vm6 = vcmp.gt.f32.partialorder %v1139_v17, 0.0  ;;  %v1181_v30 = vmul.f32 0.1, %v1139_v17  ;;  %s5032_s28 = sld [smem:[#allocation123_spill]] }
 0x1fc   :  { %v1165_v5 = vadd.f32 %v5005_v31, %v1161_v32  ;;  %v1196_v15 = vrot.slane %v3784_v22, 1  ;;  %v1205_v28 = vrot.slane %v3786_v0, 1  ;;  %v5008_v61 = vmov %v5003_v19 }
 0x1fd   :  { %v1229_v42 = vmul.f32 %v5008_v61, %v3749_v26  ;;  %v5009_v45 = vmov %v5004_v25  ;;  %v1234_v41 = vadd.f32 %v1232_v55, %v1228_v24  ;;  %v3805_v50 = vsel %vm1179_vm6, %v1139_v17, %v1181_v30 }
 0x1fe   :  { %v1233_v63 = vmul.f32 %v5009_v45, %v3784_v22  ;;  %vm1185_vm7 = vcmp.gt.f32.partialorder %v1165_v5, 0.0  ;;  %v1187_v60 = vmul.f32 0.1, %v1165_v5  ;;  %v1197_v2 = vsel %vm558_vm9, %v1195_v54, %v1196_v15 }
 0x1ff   :  { %v3809_v47 = vsel %vm558_vm9, %v1204_v6, %v1205_v28  ;;  %v1214_v23 = vrot.slane %v3805_v50, 1  ;;  %v5013_v32 = vstv %s5006_s6  ;;  %v5015_v25 = vstv %s5007_s3  ;;  %s5046_s6 = sld [smem:[#allocation127_spill]] }
 0x200   :  { %v1235_v40 = vadd.f32 %v1233_v63, %v1229_v42  ;;  %v1238_v19 = vmul.f32 %v5013_v32, %v1197_v2  ;;  %v3815_v24 = vsel %vm1185_vm7, %v1165_v5, %v1187_v60  ;;  %v1244_v55 = vmul.f32 %v5015_v25, %v3790_v14  ;;  %s5047_s3 = sld [smem:[#allocation129_spill]] }
 0x201   :  { %v5017_v54 = vmov %v5015_v25  ;;  %v3824_v31 = vsel %vm558_vm9, %v1213_v8, %v1214_v23  ;;  %v5018_v28 = vstv %s5010_s21  ;;  %v5021_v45 = vstv %s5011_s13  ;;  %s5058_s21 = sld [smem:[#allocation67_spill]] }
 0x202   :  { %v1245_v6 = vmul.f32 %v5017_v54, %v3755_v56  ;;  %v1240_v30 = vadd.f32 %v1238_v19, %v1234_v41  ;;  %v1241_v15 = vadd.f32 %v3167_v43, %v1235_v40  ;;  %v1250_v61 = vmul.f32 %v5018_v28, %v3737_v36  ;;  %s5065_s13 = sld [smem:[#allocation135_spill]] }
 0x203   :  { %v5019_v5 = vmov %v5018_v28  ;;  %v1302_v63 = vmul.f32 %v5021_v45, %v3774_v52  ;;  %v5022_v60 = vmov %v5021_v45  ;;  %v5023_v8 = vstv %s5012_s26  ;;  %s5066_s26 = sld [smem:[#allocation136_spill]] }
 0x204   :  { %v1251_v42 = vmul.f32 %v5019_v5, %v3786_v0  ;;  %v1303_v32 = vmul.f32 %v5022_v60, %v3749_v26  ;;  %v1306_v41 = vmul.f32 %v5023_v8, %v3735_v53  ;;  %v1246_v43 = vadd.f32 %v1244_v55, %v1240_v30 }
 0x205   :  { %v1247_v23 = vadd.f32 %v1245_v6, %v1241_v15  ;;  %v5026_v40 = vmov %v5023_v8  ;;  %v5027_v25 = vstv %s5014_s16  ;;  %v5030_v5 = vstv %s5016_s25  ;;  %s5072_s16 = sld [smem:[#allocation138_spill]] }
 0x206   :  { %v1307_v19 = vmul.f32 %v5026_v40, %v3784_v22  ;;  %v1312_v54 = vmul.f32 %v5027_v25, %v1197_v2  ;;  %v3851_v45 = vmul.f32 %v5030_v5, %v3746_v46  ;;  %v5031_v60 = vmov %v5030_v5  ;;  %s5074_s25 = sld [smem:[#allocation73_spill]] }
 0x207   :  { %v3856_v8 = vmul.f32 %v5031_v60, %v3805_v50  ;;  %v1308_v55 = vadd.f32 %v1306_v41, %v1302_v63  ;;  %v3858_v6 = vadd.f32 %v1250_v61, %v1246_v43  ;;  %v1253_v30 = vadd.f32 %v1251_v42, %v1247_v23 }
 0x208   :  { %v1309_v15 = vadd.f32 %v1307_v19, %v1303_v32  ;;  %v5033_v40 = vstv %s5020_s0  ;;  %v5035_v18 = vstv %s5024_s15  ;;  %v5036_v60 = vstv %s5025_s14  ;;  %s5075_s0 = sld [smem:[#allocation139_spill]] }
 0x209   :  { %v1318_v25 = vmul.f32 %v5033_v40, %v3790_v14  ;;  %v1314_v17 = vadd.f32 %v1312_v54, %v1308_v55  ;;  %v5034_v5 = vmov %v5033_v40  ;;  %v1324_v11 = vmul.f32 %v5035_v18, %v3737_v36  ;;  %s5081_s15 = sld [smem:[#allocation99_spill]] }
 0x20a   :  { %v1319_v28 = vmul.f32 %v5034_v5, %v3755_v56  ;;  %v1376_v63 = vmul.f32 %v5036_v60, %v3774_v52  ;;  %v1315_v61 = vadd.f32 %v3180_v3, %v1309_v15  ;;  %v5038_v42 = vmov %v5035_v18  ;;  %s5084_s14 = sld [smem:[#allocation104_spill]] }
 0x20b   :  { %v1325_v32 = vmul.f32 %v5038_v42, %v3786_v0  ;;  %v5039_v41 = vstv %s5028_s2  ;;  %v5041_v23 = vstv %s5029_s22  ;;  %v1320_v18 = vadd.f32 %v1318_v25, %v1314_v17  ;;  %s5090_s2 = sld [smem:[#allocation79_spill]] }
 0x20c   :  { %v3879_v43 = vmul.f32 %v5039_v41, %v3746_v46  ;;  %v1380_v19 = vmul.f32 %v5041_v23, %v3735_v53  ;;  %v5043_v54 = vmov %v5036_v60  ;;  %v5044_v40 = vmov %v5041_v23  ;;  %s5093_s22 = sld [smem:[#allocation142_spill]] }
 0x20d   :  { %v1377_v55 = vmul.f32 %v5043_v54, %v3749_v26  ;;  %v1381_v3 = vmul.f32 %v5044_v40, %v3784_v22  ;;  %v5045_v15 = vstv %s5032_s28  ;;  %v3893_v60 = vadd.f32 %v3171_v13, %v1253_v30  ;;  %s5099_s28 = sld [smem:[#allocation143_spill]] }
 0x20e   :  { %5040 = vst [vmem:[#allocation164_spill] sm:$0xff] %v3879_v43  ;;  %v1386_v5 = vmul.f32 %v5045_v15, %v1197_v2  ;;  %v1321_v42 = vadd.f32 %v1319_v28, %v1315_v61  ;;  %v3898_v23 = vmul.f32 %v5039_v41, %v3805_v50  ;;  %v1382_v17 = vadd.f32 %v1380_v19, %v1376_v63 }
 0x20f   :  { %v3900_v25 = vadd.f32 %v1324_v11, %v1320_v18  ;;  %v1383_v54 = vadd.f32 %v1381_v3, %v1377_v55  ;;  %v5048_v40 = vstv %s5037_s30  ;;  %v5050_v61 = vstv %s5042_s1  ;;  %s5122_s30 = sld [smem:[#allocation147_spill]] }
 0x210   :  { %v1392_v15 = vmul.f32 %v5048_v40, %v3790_v14  ;;  %v5049_v43 = vmov %v5048_v40  ;;  %v1327_v30 = vadd.f32 %v1325_v32, %v1321_v42  ;;  %v1388_v28 = vadd.f32 %v1386_v5, %v1382_v17  ;;  %s5126_s1 = sld [smem:[#allocation131_spill]] }
 0x211   :  { %v1393_v13 = vmul.f32 %v5049_v43, %v3755_v56  ;;  %v1398_v62 = vmul.f32 %v5050_v61, %v3737_v36  ;;  %v5051_v41 = vstv %s4823_s17  ;;  %v1389_v11 = vadd.f32 %v3203_v7, %v1383_v54  ;;  %s5060_s17 = sld [smem:[#allocation133_spill]] }
 0x212   :  { %v1450_v63 = vmul.f32 %v5051_v41, %v3774_v52  ;;  %v5052_v19 = vmov %v5051_v41  ;;  %v5053_v55 = vstv %s3025_s27  ;;  %v1394_v5 = vadd.f32 %v1392_v15, %v1388_v28  ;;  %s5063_s27 = sld [smem:[#allocation134_spill]] }
 0x213   :  { %v1451_v18 = vmul.f32 %v5052_v19, %v3749_v26  ;;  %v1454_v3 = vmul.f32 %v5053_v55, %v3735_v53  ;;  %v5054_v43 = vmov %v5053_v55  ;;  %v5055_v42 = vmov %v5050_v61 }
 0x214   :  { %v1455_v32 = vmul.f32 %v5054_v43, %v3784_v22  ;;  %v1399_v17 = vmul.f32 %v5055_v42, %v3786_v0  ;;  %v5056_v40 = vstv %s5046_s6  ;;  %v5057_v61 = vstv %s5047_s3  ;;  %s5128_s6 = sld [smem:[#allocation40_spill]] }
 0x215   :  { %v3930_v52 = vmul.f32 %v5056_v40, %v3746_v46  ;;  %v1460_v7 = vmul.f32 %v5057_v61, %v1197_v2  ;;  %v1395_v54 = vadd.f32 %v1393_v13, %v1389_v11  ;;  %v5059_v26 = vmov %v5056_v40  ;;  %s5140_s3 = sld [smem:[#allocation130_spill]] }
 0x216   :  { %v3937_v41 = vmul.f32 %v5059_v26, %v3805_v50  ;;  %v1456_v53 = vadd.f32 %v1454_v3, %v1450_v63  ;;  %v1457_v22 = vadd.f32 %v1455_v32, %v1451_v18  ;;  %v3940_v15 = vadd.f32 %v3190_v1, %v1327_v30 }
 0x217   :  { %v3942_v28 = vadd.f32 %v1398_v62, %v1394_v5  ;;  %v5061_v19 = vstv %s4825_s18  ;;  %v1401_v11 = vadd.f32 %v1399_v17, %v1395_v54  ;;  %v5064_v18 = vstv %s4827_s12  ;;  %s5070_s18 = sld [smem:[#allocation137_spill]] }
 0x218   :  { %v1466_v55 = vmul.f32 %v5061_v19, %v3790_v14  ;;  %v5062_v2 = vmov %v5061_v19  ;;  %v1462_v43 = vadd.f32 %v1460_v7, %v1456_v53  ;;  %v1463_v63 = vadd.f32 %v3220_v48, %v1457_v22  ;;  %s5078_s12 = sld [smem:[#allocation140_spill]] }
 0x219   :  { %v1467_v13 = vmul.f32 %v5062_v2, %v3755_v56  ;;  %v1472_v3 = vmul.f32 %v5064_v18, %v3737_v36  ;;  %v3956_v1 = vsel %vm555_vm4, 0.0, %v3419_v29  ;;  %v3960_v62 = vsel %vm555_vm4, 0.0, %v3431_v16 }
 0x21a   :  { %v5067_v56 = vrot.slane %v3491_v9, 1  ;;  %v5068_v14 = vrot.slane %v3408_v33, 1  ;;  %v5069_v48 = vstv %s5058_s21  ;;  %v1468_v32 = vadd.f32 %v1466_v55, %v1462_v43  ;;  %s4153_s21 = sld [smem:[#allocation21 + $0x88]] }
 0x21b   :  { %v620_v36 = vmul.f32 %v5069_v48, %v3495_v51  ;;  %v1469_v5 = vadd.f32 %v1467_v13, %v1463_v63  ;;  %v5071_v42 = vmov %v5064_v18  ;;  %v5073_v40 = vstv %s5060_s17 }
 0x21c   :  { %v3967_v30 = vsel %vm558_vm9, %v5068_v14, %v5067_v56  ;;  %v1473_v17 = vmul.f32 %v5071_v42, %v3786_v0  ;;  %v3978_v61 = vmul.f32 %v5073_v40, %v3805_v50  ;;  %v3981_v7 = vadd.f32 %v3209_v12, %v1401_v11 }
 0x21d   :  { %v622_v54 = vadd.f32 %v620_v36, %v3543_v44  ;;  %v5076_v26 = vstv %s5063_s27  ;;  %v3990_v0 = vadd.f32 %v1472_v3, %v1468_v32  ;;  %v5079_v50 = vstv %s5065_s13  ;;  %s5146_s27 = sld [smem:[#allocation145_spill]] }
 0x21e   :  { %v626_v53 = vmul.f32 %v5076_v26, %v3956_v1  ;;  %v5077_v22 = vmov %v5076_v26  ;;  %v3992_v55 = vadd.f32 %v1473_v17, %v1469_v5  ;;  %v638_v2 = vmul.f32 %v5079_v50, %v3507_v34  ;;  %v5089_v17 = vld [vmem:[#allocation159_spill] sm:$0xff]  ;;  %s5151_s13 = sld [smem:[#allocation119_spill]] }
 0x21f   :  { %v627_v19 = vmul.f32 %v5077_v22, %v3419_v29  ;;  %v5080_v12 = vstv %s5066_s26  ;;  %v5083_v18 = vstv %s5070_s18  ;;  %v5086_v48 = vstv %s5072_s16  ;;  %s4222_s26 = sld [smem:[#allocation21 + $0x108]] }
 0x220   :  { %v644_v13 = vmul.f32 %v5080_v12, %v3960_v62  ;;  %v628_v44 = vadd.f32 %v626_v53, %v622_v54  ;;  %v5082_v43 = vmov %v5080_v12  ;;  %v650_v3 = vmul.f32 %v5083_v18, %v3408_v33  ;;  %s5167_s18 = sld [smem:[#allocation126_spill]] }
 0x221   :  { %v629_v11 = vadd.f32 %v627_v19, %v3566_v20  ;;  %v645_v63 = vmul.f32 %v5082_v43, %v3431_v16  ;;  %v5085_v56 = vmov %v5083_v18  ;;  %v656_v36 = vmul.f32 %v5086_v48, %v3967_v30  ;;  %s4236_s16 = sld [smem:[#allocation21 + $0x10a]] }
 0x222   :  { %v651_v14 = vmul.f32 %v5085_v56, %v3491_v9  ;;  %v5087_v32 = vstv %s5074_s25  ;;  %v5088_v42 = vstv %s5075_s0  ;;  %v634_v40 = vadd.f32 %v5089_v17, %v628_v44  ;;  %s4243_s25 = sld [smem:[#allocation21 + $0x10b]] }
 0x223   :  { %v694_v5 = vmul.f32 %v5087_v32, %v3495_v51  ;;  %v701_v20 = vmul.f32 %v5088_v42, %v3419_v29  ;;  %v635_v54 = vadd.f32 %v3522_v35, %v629_v11  ;;  %v5091_v26 = vmov %v5088_v42  ;;  %v5096_v11 = vld [vmem:[#allocation148_spill] sm:$0xff]  ;;  %s4264_s0 = sld [smem:[#allocation21 + $0x188]] }
 0x224   :  { %v700_v53 = vmul.f32 %v5091_v26, %v3956_v1  ;;  %v5092_v22 = vstv %s5078_s12  ;;  %v5094_v43 = vstv %s5081_s15  ;;  %v640_v35 = vadd.f32 %v638_v2, %v634_v40  ;;  %s4270_s12 = sld [smem:[#allocation21 + $0x189]] }
 0x225   :  { %v712_v19 = vmul.f32 %v5092_v22, %v3507_v34  ;;  %v696_v50 = vadd.f32 %v694_v5, %v3553_v38  ;;  %v703_v12 = vadd.f32 %v701_v20, %v3601_v27  ;;  %v718_v18 = vmul.f32 %v5094_v43, %v3960_v62  ;;  %s4275_s15 = sld [smem:[#allocation23 + $0x2]] }
 0x226   :  { %v5095_v56 = vmov %v5094_v43  ;;  %v641_v48 = vadd.f32 %v5096_v11, %v635_v54  ;;  %v5097_v32 = vstv %s5084_s14  ;;  %v5100_v5 = vstv %s3139_s23  ;;  %s5106_s23 = sld [smem:[#allocation141_spill]] }
 0x227   :  { %v719_v44 = vmul.f32 %v5095_v56, %v3431_v16  ;;  %v724_v42 = vmul.f32 %v5097_v32, %v3408_v33  ;;  %v5098_v17 = vmov %v5097_v32  ;;  %v702_v38 = vadd.f32 %v700_v53, %v696_v50  ;;  %v5104_v53 = vld [vmem:[#allocation151_spill] sm:$0xff]  ;;  %s5173_s14 = sld [smem:[#allocation132_spill]] }
 0x228   :  { %v725_v26 = vmul.f32 %v5098_v17, %v3491_v9  ;;  %v709_v27 = vadd.f32 %v3563_v59, %v703_v12  ;;  %v730_v20 = vmul.f32 %v5100_v5, %v3967_v30  ;;  %v5101_v22 = vstv %s5090_s2  ;;  %s4286_s2 = sld [smem:[#allocation21 + $0x18a]] }
 0x229   :  { %v768_v43 = vmul.f32 %v5101_v22, %v3495_v51  ;;  %v646_v2 = vadd.f32 %v644_v13, %v640_v35  ;;  %v647_v40 = vadd.f32 %v645_v63, %v641_v48  ;;  %v5102_v54 = vstv %s5093_s22  ;;  %s4293_s22 = sld [smem:[#allocation21 + $0x18b]] }
 0x22a   :  { %v774_v56 = vmul.f32 %v5102_v54, %v3956_v1  ;;  %v5103_v11 = vmov %v5102_v54  ;;  %v708_v17 = vadd.f32 %v3558_v39, %v702_v38  ;;  %v715_v59 = vadd.f32 %v5104_v53, %v709_v27 }
 0x22b   :  { %v775_v32 = vmul.f32 %v5103_v11, %v3419_v29  ;;  %v770_v50 = vadd.f32 %v768_v43, %v3603_v10  ;;  %v5105_v12 = vstv %s3157_s5  ;;  %v652_v22 = vadd.f32 %v650_v3, %v646_v2  ;;  %v5109_v43 = vld [vmem:[#allocation149_spill] sm:$0xff]  ;;  %s5111_s5 = sld [smem:[#allocation114_spill]] }
 0x22c   :  { %v786_v5 = vmul.f32 %v5105_v12, %v3507_v34  ;;  %v653_v13 = vadd.f32 %v651_v14, %v647_v40  ;;  %v5107_v35 = vstv %s5099_s28  ;;  %v714_v54 = vadd.f32 %v712_v19, %v708_v17  ;;  %s4307_s28 = sld [smem:[#allocation23 + $0x3]] }
 0x22d   :  { %v777_v63 = vadd.f32 %v775_v32, %v3741_v21  ;;  %v792_v48 = vmul.f32 %v5107_v35, %v3960_v62  ;;  %v721_v39 = vadd.f32 %v719_v44, %v715_v59  ;;  %v776_v38 = vadd.f32 %v774_v56, %v770_v50  ;;  %v5115_v50 = vld [vmem:[#allocation153_spill] sm:$0xff] }
 0x22e   :  { %v5108_v27 = vmov %v5107_v35  ;;  %v658_v10 = vadd.f32 %v656_v36, %v652_v22  ;;  %v659_v53 = vadd.f32 %v5109_v43, %v653_v13  ;;  %vm1528_vm8 = vcmask 72704  }
 0x22f   :  { %v793_v11 = vmul.f32 %v5108_v27, %v3431_v16  ;;  %v783_v3 = vadd.f32 %v3608_v4, %v777_v63  ;;  %v5110_v14 = vstv %s3175_s11  ;;  %v720_v21 = vadd.f32 %v718_v18, %v714_v54  ;;  %s5117_s11 = sld [smem:[#allocation144_spill]] }
 0x230   :  { %v798_v2 = vmul.f32 %v5110_v14, %v3408_v33  ;;  %v727_v40 = vadd.f32 %v725_v26, %v721_v39  ;;  %v782_v19 = vadd.f32 %v3587_v37, %v776_v38  ;;  %v5112_v44 = vmov %v5110_v14  ;;  %v5116_v26 = vld [vmem:[#allocation152_spill] sm:$0xff] }
 0x231   :  { %v799_v56 = vmul.f32 %v5112_v44, %v3491_v9  ;;  %v5113_v32 = vstv %s5106_s23  ;;  %v789_v12 = vadd.f32 %v5115_v50, %v783_v3  ;;  %v4084_v4 = vsel %vm555_vm4, 0.0, %v3762_v49  ;;  %s4335_s23 = sld [smem:[#allocation24 + $0x80]] }
 0x232   :  { %v662_v36 = vadd.f32 %v5113_v32, %v658_v10  ;;  %v5114_v17 = vmov %v5113_v32  ;;  %v726_v18 = vadd.f32 %v724_v42, %v720_v21  ;;  %v733_v22 = vadd.f32 %v5116_v26, %v727_v40  ;;  %v5124_v21 = vld [vmem:[#allocation150_spill] sm:$0xff] }
 0x233   :  { %v663_v59 = vadd.f32 %v5114_v17, %v659_v53  ;;  %v788_v37 = vadd.f32 %v786_v5, %v782_v19  ;;  %v4089_v13 = vsel %vm555_vm4, 0.0, %v3777_v58  ;;  %v795_v35 = vadd.f32 %v793_v11, %v789_v12 }
 0x234   :  { %v5118_v54 = vrot.slane %v3815_v24, 1  ;;  %v5119_v39 = vrot.slane %v3751_v57, 1  ;;  %v5120_v42 = vstv %s5111_s5  ;;  %v732_v10 = vadd.f32 %v730_v20, %v726_v18  ;;  %v5131_v18 = vld [vmem:[#allocation154_spill] sm:$0xff]  ;;  %s4337_s5 = sld [smem:[#allocation24 + $0x100]] }
 0x235   :  { %v886_v63 = vpack.c.bf16 %v663_v59, %v662_v36  ;;  %v1256_v27 = vmul.f32 %v5120_v42, %v3809_v47  ;;  %v5121_v5 = vstv %s3233_s29  ;;  %v794_v53 = vadd.f32 %v792_v48, %v788_v37  ;;  %v4111_v36 = vld [vmem:[#allocation10] sm:$0xff]   ;;  %s5133_s29 = sld [smem:[#allocation86_spill]] }
 0x236   :  { %v4096_v38 = vsel %vm558_vm9, %v5119_v39, %v5118_v54  ;;  %v737_v43 = vadd.f32 %v5121_v5, %v733_v22  ;;  %v5123_v3 = vstv %s3224_s10  ;;  %v801_v40 = vadd.f32 %v799_v56, %v795_v35  ;;  %s4133_s10 = sld [smem:[#allocation17 + $0x3]] }
 0x237   :  { %v1262_v14 = vmul.f32 %v5123_v3, %v4084_v4  ;;  %v1589_v11 = vand.u32 %v5124_v21, %v886_v63  ;;  %v1258_v19 = vadd.f32 %v1256_v27, %v3858_v6  ;;  %v5125_v44 = vmov %v5123_v3 }
 0x238   :  { %v1263_v32 = vmul.f32 %v5125_v44, %v3762_v49  ;;  %v5127_v20 = vmov %v5121_v5  ;;  %v800_v59 = vadd.f32 %v798_v2, %v794_v53  ;;  %v5129_v48 = vstv %s5117_s11  ;;  %s4339_s11 = sld [smem:[#allocation24 + $0x180]] }
 0x239   :  { %v736_v17 = vadd.f32 %v5127_v20, %v732_v10  ;;  %v804_v50 = vmul.f32 %v5129_v48, %v3967_v30  ;;  %v5130_v12 = vstv %s3270_s4  ;;  %2309 = vmatpush3.bf16.msra.mxu1 %v1589_v11  ;;  %v807_v6 = vadd.f32 %v5131_v18, %v801_v40  ;;  %s5137_s4 = sld [smem:[#allocation128_spill]] }
 0x23a   :  { %v1274_v56 = vmul.f32 %v5130_v12, %v3824_v31  ;;  %v1264_v26 = vadd.f32 %v1262_v14, %v1258_v19  ;;  %v1265_v22 = vadd.f32 %v1263_v32, %v3893_v60  ;;  %v5132_v37 = vstv %s5122_s30  ;;  %s4341_s30 = sld [smem:[#allocation24 + $0x1]] }
 0x23b   :  { %v1280_v63 = vmul.f32 %v5132_v37, %v4089_v13  ;;  %v5134_v2 = vmov 0.0   ;;  %v887_v35 = vpack.c.bf16 %v737_v43, %v736_v17  ;;  %v806_v54 = vadd.f32 %v804_v50, %v800_v59  ;;  %v5144_v17 = vld [vmem:[#allocation155_spill] sm:$0xff] }
 0x23c   :  { %2320 = vmatprep.subr.bf16.mxu1 %v5134_v2  ;;  %v5135_v39 = vmov %v5132_v37  ;;  %v5136_v27 = vstv %s5126_s1  ;;  %v5138_v5 = vstv %s5128_s6  ;;  %v1270_v53 = vadd.f32 %v3851_v45, %v1264_v26  ;;  %2311 = vmatmul.mubr.msk.bf16.vlgmr.msra.gmra.mxu1 %vm1528_vm8, %v4111_v36  ;;  %s4345_s1 = sld [smem:[#allocation24 + $0x81]] }
 0x23d   :  { %v1281_v42 = vmul.f32 %v5135_v39, %v3777_v58  ;;  %v1286_v10 = vmul.f32 %v5136_v27, %v3751_v57  ;;  %v811_v60 = vadd.f32 %v5138_v5, %v807_v6  ;;  %v1271_v3 = vadd.f32 %v3856_v8, %v1265_v22  ;;  %2322 = vmatprep.mubr.msk.bf16.mxu1 %vm2657_vm0, %v5134_v2  ;;  %s4347_s6 = sld [smem:[#allocation24 + $0x101]] }
 0x23e   :  { %v5139_v14 = vmov %v5136_v27  ;;  %v1678_v11 = vand.u32 %v5124_v21, %v887_v35  ;;  %v5141_v40 = vmov %v5138_v5  ;;  %v5142_v44 = vstv %s3281_s9  ;;  %s4171_s9 = sld [smem:[#allocation21 + $0x89]] }
 0x23f   :  { %v1287_v43 = vmul.f32 %v5139_v14, %v3815_v24  ;;  %v810_v19 = vadd.f32 %v5141_v40, %v806_v54  ;;  %v1292_v32 = vmul.f32 %v5142_v44, %v4096_v38  ;;  %v5143_v20 = vstv %s5133_s29  ;;  %v5152_v54 = vld [vmem:[#allocation163_spill] sm:$0xff]  ;;  %s4349_s29 = sld [smem:[#allocation24 + $0x181]] }
 0x240   :  { %v842_v45 = vmul.f32 %v5143_v20, %v3495_v51  ;;  %v1276_v8 = vadd.f32 %v1274_v56, %v1270_v53  ;;  %v1277_v59 = vadd.f32 %v5144_v17, %v1271_v3  ;;  %v5145_v48 = vstv %s5137_s4  ;;  %2321 = vmatpush3.bf16.msra.mxu1 %v1678_v11  ;;  %v5148_v51 = vld [vmem:[#allocation160_spill] sm:$0xff]  ;;  %s4351_s4 = sld [smem:[#allocation24 + $0x2]] }
 0x241   :  { %v848_v50 = vmul.f32 %v5145_v48, %v3956_v1  ;;  %v5147_v12 = vmov %v5145_v48  ;;  %v888_v6 = vpack.c.bf16 %v811_v60, %v810_v19  ;;  %v5149_v22 = vstv %s3250_s24  ;;  %2332 = vmatprep.subr.bf16.mxu1 %v5134_v2  ;;  %s4189_s24 = sld [smem:[#allocation21 + $0x8b]]  ;;  %v5161_v17 = vld [vmem:[#allocation156_spill] sm:$0xff]  ;;  %v5162_v48 = vld [vmem:[#allocation157_spill] sm:$0xff] }
 0x242   :  { %v849_v18 = vmul.f32 %v5147_v12, %v3419_v29  ;;  %v844_v26 = vadd.f32 %v842_v45, %v5148_v51  ;;  %v860_v37 = vmul.f32 %v5149_v22, %v3507_v34  ;;  %v5150_v56 = vstv %s5140_s3  ;;  %s4357_s3 = sld [smem:[#allocation24 + $0x102]] }
 0x243   :  { %v866_v35 = vmul.f32 %v5150_v56, %v3960_v62  ;;  %v1282_v1 = vadd.f32 %v1280_v63, %v1276_v8  ;;  %v1283_v29 = vadd.f32 %v1281_v42, %v1277_v59  ;;  %v5153_v27 = vmov %v5150_v56  ;;  %v5156_v63 = vld [vmem:[#allocation162_spill] sm:$0xff] }
 0x244   :  { %v851_v39 = vadd.f32 %v849_v18, %v5152_v54  ;;  %v867_v5 = vmul.f32 %v5153_v27, %v3431_v16  ;;  %v1767_v60 = vand.u32 %v5124_v21, %v888_v6  ;;  %v850_v34 = vadd.f32 %v848_v50, %v844_v26  ;;  %v5158_v16 = vld [vmem:[#allocation161_spill] sm:$0xff]  ;;  %2323 = vmatmul.mubr.msk.bf16.vlgmr.msra.gmra.mxu1 %vm1528_vm8, %v4111_v36 }
 0x245   :  { %v5154_v62 = vstv %s5146_s27  ;;  %v1288_v11 = vadd.f32 %v1286_v10, %v1282_v1  ;;  %v1289_v40 = vadd.f32 %v1287_v43, %v1283_v29  ;;  %v5157_v19 = vstv %s3264_s19  ;;  %s4209_s19 = sld [smem:[#allocation21 + $0x106]]  ;;  %2334 = vmatprep.mubr.msk.bf16.mxu1 %vm2657_vm0, %v5134_v2 }
 0x246   :  { %v872_v53 = vmul.f32 %v5154_v62, %v3408_v33  ;;  %v5155_v3 = vmov %v5154_v62  ;;  %v857_v42 = vadd.f32 %v5156_v63, %v851_v39  ;;  %v878_v44 = vmul.f32 %v5157_v19, %v3967_v30  ;;  %2333 = vmatpush3.bf16.msra.mxu1 %v1767_v60  ;;  %v5168_v63 = vld [vmem:[#allocation158_spill] sm:$0xff]  ;;  %s4361_s27 = sld [smem:[#allocation24 + $0x3]] }
 0x247   :  { %v873_v14 = vmul.f32 %v5155_v3, %v3491_v9  ;;  %v856_v20 = vadd.f32 %v5158_v16, %v850_v34  ;;  %v883_v45 = vstv %s4133_s10  ;;  %v5159_v33 = vstv %s5151_s13  ;;  %2344 = vmatprep.subr.bf16.mxu1 %v5134_v2  ;;  %v5166_v3 = vld [vmem:[#allocation164_spill] sm:$0xff]  ;;  %s4353_s10 = sld [smem:[#allocation24 + $0x82]] }
 0x248   :  { %v1330_v8 = vmul.f32 %v5159_v33, %v3809_v47  ;;  %v5160_v9 = vstv %s3351_s8  ;;  %v1294_v43 = vadd.f32 %v1292_v32, %v1288_v11  ;;  %v1295_v59 = vadd.f32 %v5161_v17, %v1289_v40  ;;  %s4217_s8 = sld [smem:[#allocation23 + $0x1]] }
 0x249   :  { %v1337_v10 = vmul.f32 %v5160_v9, %v3762_v49  ;;  %v863_v50 = vadd.f32 %v5162_v48, %v857_v42  ;;  %v5163_v30 = vmov %v5160_v9  ;;  %v862_v18 = vadd.f32 %v860_v37, %v856_v20  ;;  %v4238_v20 = vld [vmem:[#allocation12] sm:$0xff]   ;;  %s4367_s13 = sld [smem:[#allocation24 + $0x83]] }
 0x24a   :  { %v1336_v12 = vmul.f32 %v5163_v30, %v4084_v4  ;;  %v1332_v6 = vadd.f32 %v1330_v8, %v3900_v25  ;;  %v1347_v26 = vstv %s4153_s21  ;;  %v5164_v32 = vstv %s3313_s7  ;;  %s4226_s7 = sld [smem:[#allocation21 + $0x109]] }
 0x24b   :  { %v1339_v51 = vadd.f32 %v1337_v10, %v3940_v15  ;;  %v1298_v22 = vadd.f32 %v5164_v32, %v1294_v43  ;;  %v5165_v56 = vmov %v5164_v32  ;;  %v869_v29 = vadd.f32 %v867_v5, %v863_v50  ;;  %s4359_s21 = sld [smem:[#allocation24 + $0x182]] }
 0x24c   :  { %v1299_v1 = vadd.f32 %v5165_v56, %v1295_v59  ;;  %v1349_v54 = vmul.f32 0.0, %v1347_v26  ;;  %v868_v25 = vadd.f32 %v866_v35, %v862_v18  ;;  %v1338_v15 = vadd.f32 %v1336_v12, %v1332_v6  ;;  %2335 = vmatmul.mubr.msk.bf16.vlgmr.msra.gmra.mxu1 %vm1528_vm8, %v4111_v36 }
 0x24d   :  { %v1345_v37 = vadd.f32 %v3898_v23, %v1339_v51  ;;  %v1353_v39 = vstv %s4171_s9  ;;  %v875_v60 = vadd.f32 %v873_v14, %v869_v29  ;;  %v1348_v34 = vmul.f32 %v1347_v26, %v3824_v31  ;;  %2346 = vmatprep.mubr.msk.bf16.mxu1 %vm2657_vm0, %v5134_v2  ;;  %s4363_s9 = sld [smem:[#allocation26]] }
 0x24e   :  { %v1522_v27 = vpack.c.bf16 %v1299_v1, %v1298_v22  ;;  %v1354_v5 = vmul.f32 %v1353_v39, %v4089_v13  ;;  %v874_v62 = vadd.f32 %v872_v53, %v868_v25  ;;  %v1344_v35 = vadd.f32 %v5166_v3, %v1338_v15  ;;  %v5172_v15 = vld [vmem:[#allocation146_spill] sm:$0xff] }
 0x24f   :  { %v1351_v11 = vadd.f32 %v1349_v54, %v1345_v37  ;;  %v1355_v40 = vmul.f32 %v1353_v39, %v3777_v58  ;;  %v881_v42 = vadd.f32 %v5168_v63, %v875_v60  ;;  %v5169_v14 = vstv %s3366_s20  ;;  %s4253_s20 = sld [smem:[#allocation21 + $0x186]] }
 0x250   :  { %v1537_v23 = vand.u32 %v5124_v21, %v1522_v27  ;;  %v1360_v19 = vmul.f32 %v5169_v14, %v3751_v57  ;;  %v1365_v16 = vstv %s4189_s24  ;;  %v880_v53 = vadd.f32 %v878_v44, %v874_v62  ;;  %s4369_s24 = sld [smem:[#allocation26 + $0x1]] }
 0x251   :  { %v1350_v33 = vadd.f32 %v1348_v34, %v1344_v35  ;;  %v1357_v8 = vadd.f32 %v1355_v40, %v1351_v11  ;;  %v5170_v9 = vmov %v5169_v14  ;;  %v885_v43 = vadd.f32 %v883_v45, %v881_v42 }
 0x252   :  { %v1361_v10 = vmul.f32 %v5170_v9, %v3815_v24  ;;  %2303 = vmatpush3.bf16.msra.mxu0 %v1537_v23  ;;  %v1366_v17 = vmul.f32 %v1365_v16, %v4096_v38  ;;  %v1367_v59 = vmul.f32 0.0, %v1365_v16  ;;  %v5171_v48 = vstv %s5167_s18  ;;  %s2659_s18 = smov [#allocation27]  }
 0x253   :  { %v1404_v50 = vmul.f32 %v5171_v48, %v3809_v47  ;;  %2314 = vmatprep.subr.bf16.mxu0 %v5134_v2  ;;  %v884_v44 = vadd.f32 %v883_v45, %v880_v53  ;;  %v1356_v30 = vadd.f32 %v1354_v5, %v1350_v33  ;;  %v1409_v18 = vstv %s4209_s19  ;;  %s4371_s19 = sld [smem:[#allocation24 + $0x103]] }
 0x254   :  { %v1363_v12 = vadd.f32 %v1361_v10, %v1357_v8  ;;  %v1371_v6 = vstv %s4217_s8  ;;  %v1410_v26 = vmul.f32 %v1409_v18, %v4084_v4  ;;  %v1411_v32 = vmul.f32 %v1409_v18, %v3762_v49  ;;  %s4373_s8 = sld [smem:[#allocation26 + $0x2]] }
 0x255   :  { %v1406_v51 = vadd.f32 %v1404_v50, %v3942_v28  ;;  %2305 = vmatmul.mubr.msk.bf16.vlgmr.msra.gmra.mxu0 %vm1528_vm8, %v4238_v20  ;;  %v889_v45 = vpack.c.bf16 %v885_v43, %v884_v44  ;;  %v1362_v22 = vadd.f32 %v1360_v19, %v1356_v30  ;;  %v1421_v1 = vstv %s4222_s26  ;;  %s4375_s26 = sld [smem:[#allocation24 + $0x183]] }
 0x256   :  { %v1369_v56 = vadd.f32 %v1367_v59, %v1363_v12  ;;  %2316 = vmatprep.mubr.msk.bf16.mxu0 %vm2657_vm0, %v5134_v2  ;;  %v1413_v29 = vadd.f32 %v1411_v32, %v3981_v7  ;;  %v1423_v54 = vmul.f32 0.0, %v1421_v1  ;;  %v1427_v25 = vstv %s4226_s7  ;;  %s4377_s7 = sld [smem:[#allocation26 + $0x3]] }
 0x257   :  { %v1412_v28 = vadd.f32 %v1410_v26, %v1406_v51  ;;  %v1481_v37 = vadd.f32 %v5172_v15, %v3992_v55  ;;  %v1856_v39 = vand.u32 %v5124_v21, %v889_v45  ;;  %v1368_v27 = vadd.f32 %v1366_v17, %v1362_v22 }
 0x258   :  { %v1373_v60 = vadd.f32 %v1371_v6, %v1369_v56  ;;  %v1419_v5 = vadd.f32 %v3937_v41, %v1413_v29  ;;  %v1422_v7 = vmul.f32 %v1421_v1, %v3824_v31  ;;  %v1433_v62 = vstv %s4236_s16  ;;  %s2028_s16 = sshll.u32 %s2659_s18, 4  ;;  %s2029_s16 = int_to_ptr.vmem [resolvable:$true] %s2028_s16 }
 0x259   :  { %v1418_v34 = vadd.f32 %v3930_v52, %v1412_v28  ;;  %2345 = vmatpush3.bf16.msra.mxu1 %v1856_v39  ;;  %v1372_v3 = vadd.f32 %v1371_v6, %v1368_v27  ;;  %v1428_v35 = vmul.f32 %v1427_v25, %v4089_v13  ;;  %v1429_v55 = vmul.f32 %v1427_v25, %v3777_v58  ;;  %p2598_p5 = scmp.lt.s32.totalorder %s2029_s16, %s2029_s16 }
 0x25a   :  { %v1439_v11 = vstv %s4243_s25  ;;  %v1425_v23 = vadd.f32 %v1423_v54, %v1419_v5  ;;  %v1434_v63 = vmul.f32 %v1433_v62, %v3751_v57  ;;  %v1435_v52 = vmul.f32 %v1433_v62, %v3815_v24  ;;  %s2593_s25 = scalar_lea.vmem %s2029_s16, 1024 }
 0x25b   :  { %v1424_v40 = vadd.f32 %v1422_v7, %v1418_v34  ;;  %v1632_v41 = vpack.c.bf16 %v1373_v60, %v1372_v3  ;;  %v1440_v42 = vmul.f32 %v1439_v11, %v4096_v38  ;;  %v5174_v14 = vstv %s5173_s14  ;;  %p2594_p4 = scmp.ne.s32.totalorder %s2029_s16, %s2593_s25  ;;  %p2599_p6 = scmp.lt.s32.totalorder %s2593_s25, %s2593_s25 }
 0x25c   :  { %v1478_v19 = vmul.f32 %v5174_v14, %v3809_v47  ;;  %v1483_v16 = vstv %s4253_s20  ;;  %v1431_v33 = vadd.f32 %v1429_v55, %v1425_v23  ;;  %v1441_v8 = vmul.f32 0.0, %v1439_v11  ;;  %2347 = vmatmul.mubr.msk.bf16.vlgmr.msra.gmra.mxu1 %vm1528_vm8, %v4111_v36 }
 0x25d   :  { %v1430_v53 = vadd.f32 %v1428_v35, %v1424_v40  ;;  %v1485_v9 = vmul.f32 %v1483_v16, %v3762_v49  ;;  %v1634_v10 = vand.u32 %v1632_v41, %v5124_v21  ;;  %v1484_v17 = vmul.f32 %v1483_v16, %v4084_v4  ;;  %p2600_p7 = por %p2599_p6, %p2598_p5 }
 0x25e   :  { %v1480_v43 = vadd.f32 %v1478_v19, %v3990_v0  ;;  %v1495_v47 = vstv %s4264_s0  ;;  %v1437_v48 = vadd.f32 %v1435_v52, %v1431_v33  ;;  %v1501_v44 = vstv %s4270_s12 }
 0x25f   :  { %v1436_v59 = vadd.f32 %v1434_v63, %v1430_v53  ;;  %v1487_v50 = vadd.f32 %v1485_v9, %v1481_v37  ;;  %v5175_v30 = vstv %s5060_s17  ;;  %2315 = vmatpush3.bf16.msra.mxu0 %v1634_v10  ;;  %v1445_v49 = vstv %s4275_s15  ;;  %s4333_s17 = sld [smem:[#allocation24]]  ;;  %p2601_p8 = pnand %p2600_p7, %p2594_p4 }
 0x260   :  { %v1490_v12 = vmul.f32 %v5175_v30, %v3746_v46  ;;  %v1486_v18 = vadd.f32 %v1484_v17, %v1480_v43  ;;  %v1497_v6 = vmul.f32 0.0, %v1495_v47  ;;  %2326 = vmatprep.subr.bf16.mxu0 %v5134_v2  ;;  %v1443_v4 = vadd.f32 %v1441_v8, %v1437_v48 }
 0x261   :  { %v1442_v0 = vadd.f32 %v1440_v42, %v1436_v59  ;;  %v1493_v36 = vadd.f32 %v3978_v61, %v1487_v50  ;;  %v1496_v26 = vmul.f32 %v1495_v47, %v3824_v31  ;;  %v1503_v32 = vmul.f32 %v1501_v44, %v3777_v58 }
 0x262   :  { %v1492_v51 = vadd.f32 %v1490_v12, %v1486_v18  ;;  %2317 = vmatmul.mubr.msk.bf16.vlgmr.msra.gmra.mxu0 %vm1528_vm8, %v4238_v20  ;;  %v1447_v45 = vadd.f32 %v1445_v49, %v1443_v4  ;;  %v1507_v56 = vstv %s4286_s2  ;;  %v1502_v28 = vmul.f32 %v1501_v44, %v4089_v13 }
 0x263   :  { %v1446_v46 = vadd.f32 %v1445_v49, %v1442_v0  ;;  %v1499_v22 = vadd.f32 %v1497_v6, %v1493_v36  ;;  %2328 = vmatprep.mubr.msk.bf16.mxu0 %vm2657_vm0, %v5134_v2  ;;  %v1513_v61 = vstv %s4293_s22  ;;  %v1509_v31 = vmul.f32 %v1507_v56, %v3815_v24 }
 0x264   :  { %v1498_v1 = vadd.f32 %v1496_v26, %v1492_v51  ;;  %v1515_v58 = vmul.f32 0.0, %v1513_v61  ;;  %v1508_v15 = vmul.f32 %v1507_v56, %v3751_v57  ;;  %v1514_v60 = vmul.f32 %v1513_v61, %v4096_v38 }
 0x265   :  { %v1721_v29 = vpack.c.bf16 %v1447_v45, %v1446_v46  ;;  %v1505_v54 = vadd.f32 %v1503_v32, %v1499_v22  ;;  %v1519_v34 = vstv %s4307_s28  ;;  %v1900_v17 = vstv %s4333_s17 }
 0x266   :  { %v1504_v25 = vadd.f32 %v1502_v28, %v1498_v1  ;;  %v1926_v47 = vstv %s4335_s23  ;;  %v1952_v59 = vstv %s4337_s5  ;;  %v1978_v48 = vstv %s4339_s11 }
 0x267   :  { %v1723_v37 = vand.u32 %v1721_v29, %v5124_v21  ;;  %v1511_v39 = vadd.f32 %v1509_v31, %v1505_v54  ;;  %v1904_v44 = vstv %s4341_s30  ;;  %v1930_v30 = vstv %s4345_s1 }
 0x268   :  { %v1510_v27 = vadd.f32 %v1508_v15, %v1504_v25  ;;  %v1956_v12 = vstv %s4347_s6  ;;  %v1982_v49 = vstv %s4349_s29  ;;  %v1910_v0 = vstv %s4351_s4 }
 0x269   :  { %2327 = vmatpush3.bf16.msra.mxu0 %v1723_v37  ;;  %v1517_v5 = vadd.f32 %v1515_v58, %v1511_v39  ;;  %v1936_v4 = vstv %s4353_s10  ;;  %v1962_v51 = vstv %s4357_s3  ;;  %v1988_v26 = vstv %s4359_s21 }
 0x26a   :  { %2338 = vmatprep.subr.bf16.mxu0 %v5134_v2  ;;  %v1516_v13 = vadd.f32 %v1514_v60, %v1510_v27  ;;  %v1916_v32 = vstv %s4361_s27  ;;  %v1922_v46 = vstv %s4363_s9  ;;  %v1942_v56 = vstv %s4367_s13 }
 0x26b   :  { %v1521_v7 = vadd.f32 %v1519_v34, %v1517_v5  ;;  %v1948_v1 = vstv %s4369_s24  ;;  %v1968_v29 = vstv %s4371_s19  ;;  %v1974_v54 = vstv %s4373_s8 }
 0x26c   :  { %2329 = vmatmul.mubr.msk.bf16.vlgmr.msra.gmra.mxu0 %vm1528_vm8, %v4238_v20  ;;  %v1520_v24 = vadd.f32 %v1519_v34, %v1516_v13  ;;  %v1994_v31 = vstv %s4375_s26  ;;  %v2000_v37 = vstv %s4377_s7 }
 0x26d   :  { %2340 = vmatprep.mubr.msk.bf16.mxu0 %vm2657_vm0, %v5134_v2  ;;  %vm2005_vm0 = vcmask 261120  }
 0x26e   :  { %v1810_v57 = vpack.c.bf16 %v1521_v7, %v1520_v24 }
 0x270   :  { %v1812_v62 = vand.u32 %v1810_v57, %v5124_v21 }
 0x272   :  { %2339 = vmatpush3.bf16.msra.mxu0 %v1812_v62 }
 0x275   :  { %2341 = vmatmul.mubr.msk.bf16.vlgmr.msra.gmra.mxu0 %vm1528_vm8, %v4238_v20 }
 0x2fc   :  { %v1625_v38 = vpop.f32.mrf.mxu1 }
 0x2fe   :  { %v2312_v3 = vpop.f32.mrf.mxu1 }
 0x300   :  { %v1628_v35 = vpop.f32.mrf.mxu1 }
 0x302   :  { %v2313_v55 = vpop.f32.mrf.mxu1 }
 0x304   :  { %v1714_v11 = vpop.f32.mrf.mxu1 }
 0x306   :  { %v2324_v40 = vpop.f32.mrf.mxu1 }
 0x308   :  { %v1717_v23 = vpop.f32.mrf.mxu1 }
 0x30a   :  { %v2325_v63 = vpop.f32.mrf.mxu1 }
 0x30c   :  { %v1803_v52 = vpop.f32.mrf.mxu1 }
 0x30e   :  { %v2336_v21 = vpop.f32.mrf.mxu1 }
 0x310   :  { %v4343_v41 = vpop.f32.mrf.mxu1 }
 0x312   :  { %v2337_v14 = vpop.f32.mrf.mxu1 }
 0x315   :  { %v1573_v2 = vpop.f32.mrf.mxu0 }
 0x316   :  { %v1626_v18 = vadd.f32 %v1625_v38, %v1573_v2 }
 0x317   :  { %v2306_v20 = vpop.f32.mrf.mxu0 }
 0x318   :  { %v1901_v58 = vmul.f32 %v1900_v17, %v1626_v18  ;;  %v1927_v25 = vmul.f32 %v1926_v47, %v1626_v18  ;;  %v1953_v39 = vmul.f32 %v1952_v59, %v1626_v18  ;;  %v1979_v13 = vmul.f32 %v1978_v48, %v1626_v18 }
 0x319   :  { %v1576_v42 = vpop.f32.mrf.mxu0 }
 0x31a   :  { %v1629_v45 = vadd.f32 %v1628_v35, %v1576_v42 }
 0x31b   :  { %v2307_v19 = vpop.f32.mrf.mxu0 }
 0x31c   :  { %v4355_v16 = vpop.f32.mrf.mxu1  ;;  %v1902_v7 = vmul.f32 %v1900_v17, %v1629_v45  ;;  %v1928_v62 = vmul.f32 %v1926_v47, %v1629_v45  ;;  %v1980_v40 = vmul.f32 %v1978_v48, %v1629_v45 }
 0x31e   :  { %v2348_v53 = vpop.f32.mrf.mxu1 }
 0x320   :  { %v4365_v33 = vpop.f32.mrf.mxu1 }
 0x322   :  { %v1670_v8 = vpop.f32.mrf.mxu0  ;;  %v2349_v9 = vpop.f32.mrf.mxu1 }
 0x323   :  { %v1715_v6 = vadd.f32 %v1714_v11, %v1670_v8  ;;  %v1954_v11 = vmul.f32 %v1952_v59, %v1629_v45 }
 0x324   :  { %v2318_v10 = vpop.f32.mrf.mxu0 }
 0x325   :  { %v1905_v15 = vmul.f32 %v1904_v44, %v1715_v6  ;;  %v1931_v27 = vmul.f32 %v1930_v30, %v1715_v6  ;;  %v1957_v60 = vmul.f32 %v1956_v12, %v1715_v6  ;;  %v1983_v34 = vmul.f32 %v1982_v49, %v1715_v6 }
 0x326   :  { %v1673_v43 = vpop.f32.mrf.mxu0 }
 0x327   :  { %v1718_v22 = vadd.f32 %v1717_v23, %v1673_v43  ;;  %v1907_v23 = vadd.f32 %v1905_v15, %v1901_v58  ;;  %v1959_v2 = vadd.f32 %v1957_v60, %v1953_v39  ;;  %v1985_v21 = vadd.f32 %v1983_v34, %v1979_v13 }
 0x328   :  { %v2319_v50 = vpop.f32.mrf.mxu0 }
 0x329   :  { %v1906_v24 = vmul.f32 %v1904_v44, %v1718_v22  ;;  %v1932_v20 = vmul.f32 %v1930_v30, %v1718_v22  ;;  %v1958_v14 = vmul.f32 %v1956_v12, %v1718_v22  ;;  %v1984_v19 = vmul.f32 %v1982_v49, %v1718_v22 }
 0x32b   :  { %v1908_v42 = vadd.f32 %v1906_v24, %v1902_v7  ;;  %v1934_v18 = vadd.f32 %v1932_v20, %v1928_v62  ;;  %v1960_v6 = vadd.f32 %v1958_v14, %v1954_v11  ;;  %v2377_v24 = vld [vmem:[#allocation2] sm:$0xff] }
 0x32c   :  { %v1759_v36 = vpop.f32.mrf.mxu0 }
 0x32d   :  { %v1804_v28 = vadd.f32 %v1803_v52, %v1759_v36  ;;  %v1933_v52 = vadd.f32 %v1931_v27, %v1927_v25 }
 0x32e   :  { %v2330_v61 = vpop.f32.mrf.mxu0 }
 0x32f   :  { %v1911_v38 = vmul.f32 %v1910_v0, %v1804_v28  ;;  %v1937_v3 = vmul.f32 %v1936_v4, %v1804_v28  ;;  %v1963_v35 = vmul.f32 %v1962_v51, %v1804_v28  ;;  %v1989_v63 = vmul.f32 %v1988_v26, %v1804_v28 }
 0x330   :  { %v1762_v5 = vpop.f32.mrf.mxu0 }
 0x331   :  { %v1807_v57 = vadd.f32 %v4343_v41, %v1762_v5  ;;  %v1913_v8 = vadd.f32 %v1911_v38, %v1907_v23  ;;  %v1939_v9 = vadd.f32 %v1937_v3, %v1933_v52  ;;  %v1965_v10 = vadd.f32 %v1963_v35, %v1959_v2  ;;  %v2379_v38 = vld [vmem:[#allocation2 + $0x20] sm:$0xff]  ;;  %v2380_v35 = vld [vmem:[#allocation2 + $0x30] sm:$0xff]  ;;  %v2381_v52 = vld [vmem:[#allocation2 + $0x8] sm:$0xff] }
 0x332   :  { %v2331_v55 = vpop.f32.mrf.mxu0  ;;  %v1991_v17 = vadd.f32 %v1989_v63, %v1985_v21  ;;  %v2382_v21 = vld [vmem:[#allocation2 + $0x18] sm:$0xff] }
 0x333   :  { %v1912_v41 = vmul.f32 %v1910_v0, %v1807_v57  ;;  %v1938_v47 = vmul.f32 %v1936_v4, %v1807_v57  ;;  %v1964_v59 = vmul.f32 %v1962_v51, %v1807_v57  ;;  %v1990_v48 = vmul.f32 %v1988_v26, %v1807_v57 }
 0x335   :  { %v1848_v53 = vpop.f32.mrf.mxu0  ;;  %v1914_v0 = vadd.f32 %v1912_v41, %v1908_v42  ;;  %v1940_v22 = vadd.f32 %v1938_v47, %v1934_v18  ;;  %v1966_v28 = vadd.f32 %v1964_v59, %v1960_v6  ;;  %v2383_v42 = vld [vmem:[#allocation2 + $0x28] sm:$0xff] }
 0x336   :  { %v1893_v43 = vadd.f32 %v4355_v16, %v1848_v53  ;;  %v1986_v16 = vadd.f32 %v1984_v19, %v1980_v40  ;;  %v2384_v19 = vld [vmem:[#allocation2 + $0x38] sm:$0xff] }
 0x337   :  { %v2342_v50 = vpop.f32.mrf.mxu0 }
 0x338   :  { %v1917_v44 = vmul.f32 %v1916_v32, %v1893_v43  ;;  %v1943_v30 = vmul.f32 %v1942_v56, %v1893_v43  ;;  %v1969_v12 = vmul.f32 %v1968_v29, %v1893_v43  ;;  %v1995_v49 = vmul.f32 %v1994_v31, %v1893_v43 }
 0x339   :  { %v1851_v4 = vpop.f32.mrf.mxu0  ;;  %v1992_v61 = vadd.f32 %v1990_v48, %v1986_v16 }
 0x33a   :  { %v1919_v36 = vadd.f32 %v1917_v44, %v1913_v8  ;;  %v1945_v51 = vadd.f32 %v1943_v30, %v1939_v9  ;;  %v1971_v26 = vadd.f32 %v1969_v12, %v1965_v10  ;;  %v1997_v45 = vadd.f32 %v1995_v49, %v1991_v17 }
 0x33b   :  { %v1896_v58 = vadd.f32 %v4365_v33, %v1851_v4  ;;  %v2343_v25 = vpop.f32.mrf.mxu0  ;;  %v2378_v33 = vld [vmem:[#allocation2 + $0x10] sm:$0xff] }
 0x33c   :  { %v1923_v15 = vadd.f32 %v1922_v46, %v1919_v36  ;;  %v1949_v39 = vadd.f32 %v1948_v1, %v1945_v51  ;;  %v1975_v27 = vadd.f32 %v1974_v54, %v1971_v26  ;;  %v2001_v60 = vadd.f32 %v2000_v37, %v1997_v45 }
 0x33d   :  { %v1918_v34 = vmul.f32 %v1916_v32, %v1896_v58  ;;  %v1944_v5 = vmul.f32 %v1942_v56, %v1896_v58  ;;  %v1970_v13 = vmul.f32 %v1968_v29, %v1896_v58  ;;  %v1996_v7 = vmul.f32 %v1994_v31, %v1896_v58 }
 0x33e   :  { %v2003_v57 = vadd.f32 %v2377_v24, %v1923_v15  ;;  %v2008_v62 = vadd.f32 %v2378_v33, %v1949_v39  ;;  %v2013_v3 = vadd.f32 %v2379_v38, %v1975_v27  ;;  %v2018_v55 = vadd.f32 %v2380_v35, %v2001_v60 }
 0x33f   :  { %v1920_v11 = vadd.f32 %v1918_v34, %v1914_v0  ;;  %v1946_v32 = vadd.f32 %v1944_v5, %v1940_v22  ;;  %v1972_v40 = vadd.f32 %v1970_v13, %v1966_v28  ;;  %v1998_v56 = vadd.f32 %v1996_v7, %v1992_v61 }
 0x340   :  { %2006 = vst.msk [vmem:[#allocation27] sm:$0xff] %vm2005_vm0, %v2003_v57  ;;  %2011 = vst.msk [vmem:[#allocation27 + $0x10] sm:$0xff] %vm2005_vm0, %v2008_v62 }
 0x341   :  { %2016 = vst.msk [vmem:[#allocation27 + $0x20] sm:$0xff] %vm2005_vm0, %v2013_v3  ;;  %2021 = vst.msk [vmem:[#allocation27 + $0x30] sm:$0xff] %vm2005_vm0, %v2018_v55  ;;  %v1924_v29 = vadd.f32 %v1922_v46, %v1920_v11  ;;  %v1950_v31 = vadd.f32 %v1948_v1, %v1946_v32  ;;  %v1976_v23 = vadd.f32 %v1974_v54, %v1972_v40 }
 0x342   :  { %v2002_v63 = vadd.f32 %v2000_v37, %v1998_v56 }
 0x343   :  { %v2004_v2 = vadd.f32 %v2381_v52, %v1924_v29  ;;  %v2009_v20 = vadd.f32 %v2382_v21, %v1950_v31  ;;  %v2014_v14 = vadd.f32 %v2383_v42, %v1976_v23 }
 0x344   :  { %v2019_v41 = vadd.f32 %v2384_v19, %v2002_v63 }
 0x345   :  { %2007 = vst.msk [vmem:[#allocation27 + $0x8] sm:$0xff] %vm2005_vm0, %v2004_v2  ;;  %2012 = vst.msk [vmem:[#allocation27 + $0x18] sm:$0xff] %vm2005_vm0, %v2009_v20 }
 0x346   :  { %2017 = vst.msk [vmem:[#allocation27 + $0x28] sm:$0xff] %vm2005_vm0, %v2014_v14  ;;  %2022 = vst.msk [vmem:[#allocation27 + $0x38] sm:$0xff] %vm2005_vm0, %v2019_v41 }
 0x347   :  { %2604 = shalt.err (!%p2601_p8)
}
 0x348   :  { %s5176_s20 = smov 8   ;;  %s5177_s0 = smov 128  }
 0x349   :  { %s5178_s14 = sld [smem:[#allocation165_spill]] }
 0x34f   :  { %2034 = dma.vmem_to_hbm [thread:$0]  %s2029_s16, 1024, %s5178_s14, [#allocation4], %s5177_s0, %s5177_s0, %s5176_s20  }
 0x350   :  { %2635 = dma.done.wait [#allocation4], 1024  }
 0x351   :  { %2636 = vsyncadd [#allocation4], 4294966272 }
 0x352   :  { %2038 = vsyncpa [#allocation3], 1 }
 0x353   :  { %2039 = vsyncpa [#allocation8], 1 }
 0x354   :  { %2040 = vsyncpa [#allocation11], 1 }
 0x355   :  { %2041 = vsyncpa [#allocation4], 1 }
 0x356   :  { %2042 = vsyncpa [#allocation5], 1 }
 0x357   :  { %2043 = vsyncpa [#allocation18], 1 }
 0x358   :  { %2044 = vsyncpa [#allocation6], 1 }
 0x359   :  { %2045 = vsyncpa [#allocation16], 1 }
 0x35a   :  { %2046 = vsyncpa [#allocation22], 1 }
 0x35b   :  { %2047 = vsyncpa [#allocation25], 1 }

</bundles_post_ra>
